<compile_context>
chip_gen: v7x
topology: tpu7x:2x2x1
jax: 0.10.0
libtpu: 0.0.40
codegen_flags: <defaults>
</compile_context>

<pallas_src>
import functools

import jax
import jax.numpy as jnp
import numpy as np
from jax.experimental import pallas as pl
from jax.experimental.pallas import tpu as pltpu

LANE = 128
# Left zero-pad inside the stage-2 VMEM halo window so the bulk BN+ReLU store
# lands sublane-aligned for both f32 (8) and packed bf16 (16) layouts.
LPAD = 16


def _round_up(x, m):
    return (x + m - 1) // m * m


def _itemsize(dt):
    return np.dtype(dt).itemsize


def _pick_tile_h(H, W, max_rows=1024):
    cands = [t for t in range(1, H + 1) if H % t == 0 and (t * W) % 8 == 0]
    if not cands:
        raise ValueError("need a row tile with (tile_h * W) % 8 == 0")
    fitting = [t for t in cands if t * W <= max_rows]
    return max(fitting) if fitting else min(cands)


def _compiler_params(semantics, vmem_bytes):
    # Explicit scoped-VMEM limit sized from the actual buffers (+2x headroom),
    # floored at 16 MiB and capped to stay portable across v5e/v6e/v7x.
    limit = int(min(100 * 1024 * 1024, max(16 * 1024 * 1024, 2 * vmem_bytes)))
    return pltpu.CompilerParams(dimension_semantics=semantics,
                                vmem_limit_bytes=limit)


# -----------------------------------------------------------------------------
# Stage 1: 3x3 conv (pre-padded input, no bias) + streaming BN1 partial sums
# -----------------------------------------------------------------------------
def _conv1_stats_kernel(xpad_ref, w_ref, y_ref, psum_ref, psq_ref,
                        *, TH, W, Cin, Cp):
    # xpad_ref: (1, H+2, W+2, Cin)  -- resident per image (const along h)
    # w_ref:    (9*Cin, Cp)         -- resident for the whole grid
    # y_ref:    (1, TH, W, Cp)      -- lane-dense raw conv output tile
    # psum/psq: (1, 1, 8, Cp)       -- per-tile stat partials
    row0 = pl.multiple_of(pl.program_id(1) * TH, TH)
    xt = xpad_ref[0, pl.ds(row0, TH + 2), :, :]            # (TH+2, W+2, Cin)

    # im2col slab is cheap here (Cin is small) -> one deep-K MXU matmul.
    taps = []
    for dy in range(3):
        for dx in range(3):
            taps.append(xt[dy:dy + TH, dx:dx + W, :].reshape(TH * W, Cin))
    slab = jnp.concatenate(taps, axis=-1)                   # (TH*W, 9*Cin)

    acc = jnp.dot(slab, w_ref[...], preferred_element_type=jnp.float32)

    y_ref[0] = acc.reshape(TH, W, Cp).astype(y_ref.dtype)
    g = (TH * W) // 8
    psum_ref[0, 0] = jnp.sum(acc.reshape(g, 8, Cp), axis=0)
    psq_ref[0, 0] = jnp.sum((acc * acc).reshape(g, 8, Cp), axis=0)


def conv1_stats(xpad, w_flat, *, Cp, tile_h, out_dtype):
    """xpad: (N, H+2, W+2, Cin) f32; w_flat: (9*Cin, Cp) f32.

    Returns (y_raw (N,H,W,Cp), psum (N,HT,8,Cp), psq (N,HT,8,Cp))."""
    N, Hp2, Wp2, Cin = xpad.shape
    H, W = Hp2 - 2, Wp2 - 2
    TH = tile_h
    assert H % TH == 0 and (TH * W) % 8 == 0, (H, W, TH)
    HT = H // TH

    vmem = 2 * (Hp2 * Wp2 * Cin * 4                          # resident padded image
                + 9 * Cin * Cp * 4                           # weights
                + TH * W * Cp * _itemsize(out_dtype)         # y tile
                + 2 * 8 * Cp * 4)                            # stats tiles
    vmem += 3 * TH * W * 9 * Cin * 4                         # slab/tap temporaries

    kernel = functools.partial(_conv1_stats_kernel, TH=TH, W=W, Cin=Cin, Cp=Cp)
    return pl.pallas_call(
        kernel,
        out_shape=(
            jax.ShapeDtypeStruct((N, H, W, Cp), out_dtype),
            jax.ShapeDtypeStruct((N, HT, 8, Cp), jnp.float32),
            jax.ShapeDtypeStruct((N, HT, 8, Cp), jnp.float32),
        ),
        grid=(N, HT),
        in_specs=[
            pl.BlockSpec((1, Hp2, Wp2, Cin), lambda n, h: (n, 0, 0, 0)),
            pl.BlockSpec(w_flat.shape, lambda n, h: (0, 0)),
        ],
        out_specs=(
            pl.BlockSpec((1, TH, W, Cp), lambda n, h: (n, h, 0, 0)),
            pl.BlockSpec((1, 1, 8, Cp), lambda n, h: (n, h, 0, 0)),
            pl.BlockSpec((1, 1, 8, Cp), lambda n, h: (n, h, 0, 0)),
        ),
        compiler_params=_compiler_params(("parallel", "parallel"), vmem),
    )(xpad, w_flat)


# -----------------------------------------------------------------------------
# Stage 2 (fused): BN1 + ReLU + zero halo + 3x3 conv2 + streaming BN2 stats
# -----------------------------------------------------------------------------
def _bn1_relu_conv2_stats_kernel(y1_ref, sc_ref, sh_ref, w_ref,
                                 y2_ref, psum_ref, psq_ref, zbuf_ref,
                                 *, TH, W, Cp, z_dtype, mxu_dtype):
    # y1_ref:   (1, H, W, Cp)   raw conv1 output, resident per image
    # sc/sh:    (1, Cp) f32     BN1 scale / shift
    # w_ref:    (9, Cp, Cp)     conv2 weights, resident
    # y2_ref:   (1, TH, W, Cp)  raw conv2 output tile
    # psum/psq: (1, 1, 8, Cp)   per-tile BN2 stat partials
    # zbuf_ref: (TH+2, LPAD+W+16, Cp) VMEM halo window (scratch)
    h = pl.program_id(1)
    HT = pl.num_programs(1)
    row0 = pl.multiple_of(h * TH, TH)
    sc = sc_ref[...]                                         # (1, Cp) f32
    sh = sh_ref[...]

    def _bn1(rows_raw):                                      # (r, W, Cp) raw conv1
        z = jnp.maximum(rows_raw.astype(jnp.float32) * sc + sh, 0.0)
        return z.astype(z_dtype)

    # 1-wide zero halo columns (lane-dense stores; only these columns are read
    # outside the center region).
    zcol = jnp.zeros((TH + 2, 1, Cp), z_dtype)
    zbuf_ref[:, LPAD - 1:LPAD, :] = zcol
    zbuf_ref[:, LPAD + W:LPAD + W + 1, :] = zcol

    # Center rows: BN1+ReLU applied once to this tile's TH rows (aligned store).
    zbuf_ref[pl.ds(1, TH), pl.ds(LPAD, W), :] = _bn1(
        y1_ref[0, pl.ds(row0, TH), :, :])

    zrow = jnp.zeros((1, W, Cp), z_dtype)

    # Top halo row: zeros at the image boundary, else BN1+ReLU of row row0-1.
    @pl.when(h == 0)
    def _():
        zbuf_ref[0:1, pl.ds(LPAD, W), :] = zrow

    @pl.when(h > 0)
    def _():
        zbuf_ref[0:1, pl.ds(LPAD, W), :] = _bn1(
            y1_ref[0, pl.ds(row0 - 1, 1), :, :])

    # Bottom halo row.
    @pl.when(h == HT - 1)
    def _():
        zbuf_ref[TH + 1:TH + 2, pl.ds(LPAD, W), :] = zrow

    @pl.when(h < HT - 1)
    def _():
        zbuf_ref[TH + 1:TH + 2, pl.ds(LPAD, W), :] = _bn1(
            y1_ref[0, pl.ds(row0 + TH, 1), :, :])

    # 3x3 conv as 9 accumulated MXU taps (no materialized im2col slab).
    acc = jnp.zeros((TH * W, Cp), jnp.float32)
    for dy in range(3):
        for dx in range(3):
            c0 = LPAD - 1 + dx
            lhs = zbuf_ref[dy:dy + TH, c0:c0 + W, :]
            lhs = lhs.reshape(TH * W, Cp).astype(mxu_dtype)
            acc = acc + jnp.dot(lhs, w_ref[3 * dy + dx],
                                preferred_element_type=jnp.float32)

    y2_ref[0] = acc.reshape(TH, W, Cp).astype(y2_ref.dtype)
    g = (TH * W) // 8
    psum_ref[0, 0] = jnp.sum(acc.reshape(g, 8, Cp), axis=0)
    psq_ref[0, 0] = jnp.sum((acc * acc).reshape(g, 8, Cp), axis=0)


def bn1_relu_conv2_stats(y1, sc1, sh1, w2, *, tile_h, out_dtype, mxu_dtype):
    """y1: (N,H,W,Cp) raw conv1; sc1/sh1: (1,Cp) f32; w2: (9,Cp,Cp)."""
    N, H, W, Cp = y1.shape
    TH = tile_h
    assert H % TH == 0 and (TH * W) % 8 == 0, (H, W, TH)
    HT = H // TH
    Wb = LPAD + W + 16
    z_dtype = mxu_dtype

    vmem = 2 * (H * W * Cp * _itemsize(y1.dtype)             # resident conv1 image
                + 9 * Cp * Cp * _itemsize(w2.dtype)          # conv2 weights
                + TH * W * Cp * _itemsize(out_dtype)         # y2 tile
                + 2 * 8 * Cp * 4                             # stats tiles
                + 2 * Cp * 4)                                # scale/shift
    vmem += (TH + 2) * Wb * Cp * _itemsize(z_dtype)          # halo window scratch
    vmem += 3 * TH * W * Cp * 4                              # acc + tap temporaries

    kernel = functools.partial(_bn1_relu_conv2_stats_kernel, TH=TH, W=W, Cp=Cp,
                               z_dtype=z_dtype, mxu_dtype=mxu_dtype)
    return pl.pallas_call(
        kernel,
        out_shape=(
            jax.ShapeDtypeStruct((N, H, W, Cp), out_dtype),
            jax.ShapeDtypeStruct((N, HT, 8, Cp), jnp.float32),
            jax.ShapeDtypeStruct((N, HT, 8, Cp), jnp.float32),
        ),
        grid=(N, HT),
        in_specs=[
            pl.BlockSpec((1, H, W, Cp), lambda n, h: (n, 0, 0, 0)),
            pl.BlockSpec((1, Cp), lambda n, h: (0, 0)),
            pl.BlockSpec((1, Cp), lambda n, h: (0, 0)),
            pl.BlockSpec((9, Cp, Cp), lambda n, h: (0, 0, 0)),
        ],
        out_specs=(
            pl.BlockSpec((1, TH, W, Cp), lambda n, h: (n, h, 0, 0)),
            pl.BlockSpec((1, 1, 8, Cp), lambda n, h: (n, h, 0, 0)),
            pl.BlockSpec((1, 1, 8, Cp), lambda n, h: (n, h, 0, 0)),
        ),
        scratch_shapes=[pltpu.VMEM((TH + 2, Wb, Cp), z_dtype)],
        compiler_params=_compiler_params(("parallel", "parallel"), vmem),
    )(y1, sc1, sh1, w2)


# -----------------------------------------------------------------------------
# Final normalize + ReLU (BN2 apply), tiled over (N, H-tiles)
# -----------------------------------------------------------------------------
def _bn_relu_kernel(y_ref, sc_ref, sh_ref, o_ref):
    z = y_ref[...].astype(jnp.float32) * sc_ref[...] + sh_ref[...]
    o_ref[...] = jnp.maximum(z, 0.0).astype(o_ref.dtype)


def bn_relu(y_raw, scale, shift, *, tile_h, out_dtype=jnp.float32):
    N, H, W, Cp = y_raw.shape
    TH = tile_h
    HT = H // TH
    vmem = 2 * (TH * W * Cp * (_itemsize(y_raw.dtype) + _itemsize(out_dtype))
                + 2 * Cp * 4)
    vmem += 2 * TH * W * Cp * 4
    return pl.pallas_call(
        _bn_relu_kernel,
        out_shape=jax.ShapeDtypeStruct((N, H, W, Cp), out_dtype),
        grid=(N, HT),
        in_specs=[
            pl.BlockSpec((1, TH, W, Cp), lambda n, h: (n, h, 0, 0)),
            pl.BlockSpec((1, Cp), lambda n, h: (0, 0)),
            pl.BlockSpec((1, Cp), lambda n, h: (0, 0)),
        ],
        out_specs=pl.BlockSpec((1, TH, W, Cp), lambda n, h: (n, h, 0, 0)),
        compiler_params=_compiler_params(("parallel", "parallel"), vmem),
    )(y_raw, scale, shift)


# -----------------------------------------------------------------------------
# Tiny JAX glue: reduce streamed partials -> per-channel scale / shift (f32)
# -----------------------------------------------------------------------------
def _bn_scale_shift(psum, psq, gamma, beta, M, Cp, Cout, eps):
    total = jnp.sum(psum, axis=(0, 1, 2))                    # (Cp,)
    total_sq = jnp.sum(psq, axis=(0, 1, 2))
    mean = total / M
    var = jnp.maximum(total_sq / M - mean * mean, 0.0)       # biased (training) var
    g = jnp.pad(gamma, (0, Cp - Cout))                       # padded channels -> 0
    b = jnp.pad(beta, (0, Cp - Cout))
    scale = g * jax.lax.rsqrt(var + eps)
    shift = b - mean * scale
    return scale.reshape(1, Cp), shift.reshape(1, Cp)


# -----------------------------------------------------------------------------
# UNetBlock wrapper (default up=False, down=False path), PyTorch NCHW interface
# -----------------------------------------------------------------------------
def init_unet_block_params(key, in_channels, out_channels):
    k1, k2, k3, k4 = jax.random.split(key, 4)
    fan1 = in_channels * 9
    fan2 = out_channels * 9
    b1 = 1.0 / np.sqrt(fan1)
    b2 = 1.0 / np.sqrt(fan2)
    return {
        "w1": jax.random.uniform(k1, (3, 3, in_channels, out_channels),
                                 jnp.float32, -b1, b1),
        "b1": jax.random.uniform(k2, (out_channels,), jnp.float32, -b1, b1),
        "g1": jnp.ones((out_channels,), jnp.float32),
        "be1": jnp.zeros((out_channels,), jnp.float32),
        "w2": jax.random.uniform(k3, (3, 3, out_channels, out_channels),
                                 jnp.float32, -b2, b2),
        "b2": jax.random.uniform(k4, (out_channels,), jnp.float32, -b2, b2),
        "g2": jnp.ones((out_channels,), jnp.float32),
        "be2": jnp.zeros((out_channels,), jnp.float32),
    }


def unet_block_forward(params, x_nchw, *, tile_h=None, eps=1e-5,
                       compute_dtype=jnp.bfloat16):
    """x_nchw: (N, Cin, H, W) f32 -> (N, Cout, H, W) f32 (PyTorch conventions).

    compute_dtype controls the stored intermediate activations, the stage-2
    MXU operands and the conv2 weights (bf16 by default per the perf review;
    jnp.float32 reproduces the f32 reference to ~1e-5). BatchNorm statistics
    and normalization math are always f32.
    """
    x = jnp.transpose(x_nchw, (0, 2, 3, 1))                  # NCHW -> NHWC (once)
    N, H, W, Cin = x.shape
    Cout = params["w1"].shape[-1]
    Cp = _round_up(Cout, LANE)                               # lane-dense channel pad
    TH = _pick_tile_h(H, W) if tile_h is None else tile_h
    M = N * H * W

    # ---- stage 1: conv1 (bias dropped: a pre-BN per-channel bias cancels
    #      exactly under training-mode BatchNorm) + streamed BN1 stats ----
    xpad = jnp.pad(x, ((0, 0), (1, 1), (1, 1), (0, 0)))
    w1 = jnp.pad(params["w1"].reshape(9 * Cin, Cout), ((0, 0), (0, Cp - Cout)))
    y1, s1, q1 = conv1_stats(xpad, w1, Cp=Cp, tile_h=TH, out_dtype=compute_dtype)
    sc1, sh1 = _bn_scale_shift(s1, q1, params["g1"], params["be1"],
                               M, Cp, Cout, eps)

    # ---- stage 2: fused BN1+ReLU+halo+conv2 + streamed BN2 stats ----
    w2 = jnp.pad(params["w2"].reshape(9, Cout, Cout),
                 ((0, 0), (0, Cp - Cout), (0, Cp - Cout))).astype(compute_dtype)
    y2, s2, q2 = bn1_relu_conv2_stats(y1, sc1, sh1, w2, tile_h=TH,
                                      out_dtype=compute_dtype,
                                      mxu_dtype=compute_dtype)
    sc2, sh2 = _bn_scale_shift(s2, q2, params["g2"], params["be2"],
                               M, Cp, Cout, eps)

    out = bn_relu(y2, sc2, sh2, tile_h=TH)                   # (N, H, W, Cp) f32
    return jnp.transpose(out[..., :Cout], (0, 3, 1, 2))      # NHWC -> NCHW (once)


# -----------------------------------------------------------------------------
# Pure-JAX reference (for correctness check) — includes the conv biases
# -----------------------------------------------------------------------------
def _ref_stage(x_nhwc, w, b, g, be, eps=1e-5):
    y = jax.lax.conv_general_dilated(
        x_nhwc, w, window_strides=(1, 1), padding="SAME",
        dimension_numbers=("NHWC", "HWIO", "NHWC")) + b
    mean = jnp.mean(y, axis=(0, 1, 2), keepdims=True)
    var = jnp.mean((y - mean) ** 2, axis=(0, 1, 2), keepdims=True)
    y = (y - mean) * jax.lax.rsqrt(var + eps) * g + be
    return jnp.maximum(y, 0.0)


def unet_block_ref(params, x_nchw):
    x = jnp.transpose(x_nchw, (0, 2, 3, 1))
    x = _ref_stage(x, params["w1"], params["b1"], params["g1"], params["be1"])
    x = _ref_stage(x, params["w2"], params["b2"], params["g2"], params["be2"])
    return jnp.transpose(x, (0, 3, 1, 2))


if __name__ == "__main__":
    N, Cin, Cout, H, W = 2, 4, 8, 16, 16
    key = jax.random.PRNGKey(0)
    kx, kp = jax.random.split(key)
    x = jax.random.normal(kx, (N, Cin, H, W), jnp.float32)   # PyTorch NCHW input
    params = init_unet_block_params(kp, Cin, Cout)

    ref = jax.block_until_ready(unet_block_ref(params, x))

    # tile_h=8 -> grid (N=2, H-tiles=2): exercises the multi-tile streamed BN
    # statistics and the interior/boundary halo paths of the fused stage 2.

    # f32 path: validates the restructured kernels (fusion, in-kernel halo,
    # per-tap MXU accumulation, dropped bias) tightly against the reference.
    fwd_f32 = jax.jit(functools.partial(unet_block_forward, tile_h=8,
                                        compute_dtype=jnp.float32))
    out_f32 = jax.block_until_ready(fwd_f32(params, x))
    assert out_f32.shape == (N, Cout, H, W), out_f32.shape
    np.testing.assert_allclose(np.asarray(out_f32), np.asarray(ref),
                               rtol=1e-4, atol=1e-4)

    # bf16 fast path (default): bf16 MXU operands + bf16 intermediate
    # activations per the perf review; tolerance relaxed accordingly.
    fwd_bf16 = jax.jit(functools.partial(unet_block_forward, tile_h=8))
    out_bf16 = jax.block_until_ready(fwd_bf16(params, x))
    assert out_bf16.shape == (N, Cout, H, W), out_bf16.shape
    np.testing.assert_allclose(np.asarray(out_bf16), np.asarray(ref),
                               rtol=3e-2, atol=3e-2)

    print("KERNEL_OK")
</pallas_src>

<mosaic_0001>
module attributes {stable_mosaic.version = 11 : i64} {
  func.func @_conv1_stats_kernel(%arg0: i32, %arg1: i32, %arg2: memref<1x18x18x4xf32, #tpu.memory_space<vmem>>, %arg3: memref<36x128xf32, #tpu.memory_space<vmem>>, %arg4: memref<1x8x16x128xf32, #tpu.memory_space<vmem>>, %arg5: memref<1x1x8x128xf32, #tpu.memory_space<vmem>>, %arg6: memref<1x1x8x128xf32, #tpu.memory_space<vmem>>) attributes {dimension_semantics = [#tpu.dimension_semantics<parallel>, #tpu.dimension_semantics<parallel>], iteration_bounds = array<i64: 2, 2>, scalar_prefetch = 0 : i64, scratch_operands = 0 : i64, tpu.core_type = #tpu.core_type<tc>, window_params = [{transform_indices = @transform_0, window_bounds = array<i64: 1, 18, 18, 4>}, {pipeline_mode = #tpu.pipeline_mode<synchronous>, transform_indices = @transform_1, window_bounds = array<i64: 36, 128>}, {transform_indices = @transform_2, window_bounds = array<i64: 1, 8, 16, 128>}, {transform_indices = @transform_3, window_bounds = array<i64: 1, 1, 8, 128>}, {transform_indices = @transform_4, window_bounds = array<i64: 1, 1, 8, 128>}]} {
    %c8_i32 = arith.constant 8 : i32
    %0 = arith.muli %arg1, %c8_i32 : i32
    %1 = tpu.assume_multiple %0, 8 : i32
    %c0 = arith.constant 0 : index
    %2 = arith.index_cast %1 : i32 to index
    %c0_0 = arith.constant 0 : index
    %c0_1 = arith.constant 0 : index
    %3 = vector.load %arg2[%c0, %2, %c0_0, %c0_1] : memref<1x18x18x4xf32, #tpu.memory_space<vmem>>, vector<1x10x18x4xf32>
    %4 = vector.shape_cast %3 : vector<1x10x18x4xf32> to vector<10x18x4xf32>
    %5 = vector.extract_strided_slice %4 {offsets = [0, 0, 0], sizes = [8, 16, 4], strides = [1, 1, 1]} : vector<10x18x4xf32> to vector<8x16x4xf32>
    %6 = vector.shape_cast %5 : vector<8x16x4xf32> to vector<128x4xf32>
    %7 = vector.extract_strided_slice %4 {offsets = [0, 1, 0], sizes = [8, 16, 4], strides = [1, 1, 1]} : vector<10x18x4xf32> to vector<8x16x4xf32>
    %8 = vector.shape_cast %7 : vector<8x16x4xf32> to vector<128x4xf32>
    %9 = vector.extract_strided_slice %4 {offsets = [0, 2, 0], sizes = [8, 16, 4], strides = [1, 1, 1]} : vector<10x18x4xf32> to vector<8x16x4xf32>
    %10 = vector.shape_cast %9 : vector<8x16x4xf32> to vector<128x4xf32>
    %11 = vector.extract_strided_slice %4 {offsets = [1, 0, 0], sizes = [8, 16, 4], strides = [1, 1, 1]} : vector<10x18x4xf32> to vector<8x16x4xf32>
    %12 = vector.shape_cast %11 : vector<8x16x4xf32> to vector<128x4xf32>
    %13 = vector.extract_strided_slice %4 {offsets = [1, 1, 0], sizes = [8, 16, 4], strides = [1, 1, 1]} : vector<10x18x4xf32> to vector<8x16x4xf32>
    %14 = vector.shape_cast %13 : vector<8x16x4xf32> to vector<128x4xf32>
    %15 = vector.extract_strided_slice %4 {offsets = [1, 2, 0], sizes = [8, 16, 4], strides = [1, 1, 1]} : vector<10x18x4xf32> to vector<8x16x4xf32>
    %16 = vector.shape_cast %15 : vector<8x16x4xf32> to vector<128x4xf32>
    %17 = vector.extract_strided_slice %4 {offsets = [2, 0, 0], sizes = [8, 16, 4], strides = [1, 1, 1]} : vector<10x18x4xf32> to vector<8x16x4xf32>
    %18 = vector.shape_cast %17 : vector<8x16x4xf32> to vector<128x4xf32>
    %19 = vector.extract_strided_slice %4 {offsets = [2, 1, 0], sizes = [8, 16, 4], strides = [1, 1, 1]} : vector<10x18x4xf32> to vector<8x16x4xf32>
    %20 = vector.shape_cast %19 : vector<8x16x4xf32> to vector<128x4xf32>
    %21 = vector.extract_strided_slice %4 {offsets = [2, 2, 0], sizes = [8, 16, 4], strides = [1, 1, 1]} : vector<10x18x4xf32> to vector<8x16x4xf32>
    %22 = vector.shape_cast %21 : vector<8x16x4xf32> to vector<128x4xf32>
    %23 = tpu.concatenate %6, %8, %10, %12, %14, %16, %18, %20, %22 in 1 : vector<128x4xf32>, vector<128x4xf32>, vector<128x4xf32>, vector<128x4xf32>, vector<128x4xf32>, vector<128x4xf32>, vector<128x4xf32>, vector<128x4xf32>, vector<128x4xf32> -> vector<128x36xf32>
    %c0_2 = arith.constant 0 : index
    %c0_3 = arith.constant 0 : index
    %24 = vector.load %arg3[%c0_2, %c0_3] : memref<36x128xf32, #tpu.memory_space<vmem>>, vector<36x128xf32>
    %cst = arith.constant dense<0.000000e+00> : vector<128x128xf32>
    %25 = tpu.matmul %23, %24, %cst {dimension_numbers = #tpu.dot_dimension_numbers<[1], [0], [0], [1], [0, 0, 1, 1], [], []>} : vector<128x36xf32>, vector<36x128xf32>, vector<128x128xf32> -> vector<128x128xf32>
    %26 = vector.shape_cast %25 : vector<128x128xf32> to vector<8x16x128xf32>
    %c0_4 = arith.constant 0 : index
    %c0_5 = arith.constant 0 : index
    %c0_6 = arith.constant 0 : index
    %c0_7 = arith.constant 0 : index
    %27 = vector.load %arg4[%c0_4, %c0_5, %c0_6, %c0_7] : memref<1x8x16x128xf32, #tpu.memory_space<vmem>>, vector<1x8x16x128xf32>
    %28 = vector.shape_cast %27 : vector<1x8x16x128xf32> to vector<8x16x128xf32>
    %29 = vector.shape_cast %26 : vector<8x16x128xf32> to vector<1x8x16x128xf32>
    tpu.vector_store %arg4[%c0_4, %c0_5, %c0_6, %c0_7], %29 {strides = array<i32>} : memref<1x8x16x128xf32, #tpu.memory_space<vmem>>, vector<1x8x16x128xf32>,
    %30 = vector.shape_cast %25 : vector<128x128xf32> to vector<16x8x128xf32>
    %cst_8 = arith.constant dense<0.000000e+00> : vector<8x128xf32>
    %31 = vector.multi_reduction <add>, %30, %cst_8 [0] : vector<16x8x128xf32> to vector<8x128xf32>
    %c0_9 = arith.constant 0 : index
    %c0_10 = arith.constant 0 : index
    %c0_11 = arith.constant 0 : index
    %c0_12 = arith.constant 0 : index
    %32 = vector.load %arg5[%c0_9, %c0_10, %c0_11, %c0_12] : memref<1x1x8x128xf32, #tpu.memory_space<vmem>>, vector<1x1x8x128xf32>
    %33 = vector.shape_cast %32 : vector<1x1x8x128xf32> to vector<8x128xf32>
    %34 = vector.shape_cast %31 : vector<8x128xf32> to vector<1x1x8x128xf32>
    tpu.vector_store %arg5[%c0_9, %c0_10, %c0_11, %c0_12], %34 {strides = array<i32>} : memref<1x1x8x128xf32, #tpu.memory_space<vmem>>, vector<1x1x8x128xf32>,
    %35 = arith.mulf %25, %25 : vector<128x128xf32>
    %36 = vector.shape_cast %35 : vector<128x128xf32> to vector<16x8x128xf32>
    %cst_13 = arith.constant dense<0.000000e+00> : vector<8x128xf32>
    %37 = vector.multi_reduction <add>, %36, %cst_13 [0] : vector<16x8x128xf32> to vector<8x128xf32>
    %c0_14 = arith.constant 0 : index
    %c0_15 = arith.constant 0 : index
    %c0_16 = arith.constant 0 : index
    %c0_17 = arith.constant 0 : index
    %38 = vector.load %arg6[%c0_14, %c0_15, %c0_16, %c0_17] : memref<1x1x8x128xf32, #tpu.memory_space<vmem>>, vector<1x1x8x128xf32>
    %39 = vector.shape_cast %38 : vector<1x1x8x128xf32> to vector<8x128xf32>
    %40 = vector.shape_cast %37 : vector<8x128xf32> to vector<1x1x8x128xf32>
    tpu.vector_store %arg6[%c0_14, %c0_15, %c0_16, %c0_17], %40 {strides = array<i32>} : memref<1x1x8x128xf32, #tpu.memory_space<vmem>>, vector<1x1x8x128xf32>,
    return
  }
  func.func @transform_0(%arg0: i32, %arg1: i32) -> (i32, i32, i32, i32) {
    %c0_i32 = arith.constant 0 : i32
    %c0_i32_0 = arith.constant 0 : i32
    %c0_i32_1 = arith.constant 0 : i32
    %c0_i32_2 = arith.constant 0 : i32
    return %arg0, %c0_i32, %c0_i32_0, %c0_i32_1 : i32, i32, i32, i32
  }
  func.func @transform_1(%arg0: i32, %arg1: i32) -> (i32, i32) {
    %c0_i32 = arith.constant 0 : i32
    %c0_i32_0 = arith.constant 0 : i32
    %c0_i32_1 = arith.constant 0 : i32
    return %c0_i32, %c0_i32_0 : i32, i32
  }
  func.func @transform_2(%arg0: i32, %arg1: i32) -> (i32, i32, i32, i32) {
    %c0_i32 = arith.constant 0 : i32
    %c0_i32_0 = arith.constant 0 : i32
    %c0_i32_1 = arith.constant 0 : i32
    return %arg0, %arg1, %c0_i32, %c0_i32_0 : i32, i32, i32, i32
  }
  func.func @transform_3(%arg0: i32, %arg1: i32) -> (i32, i32, i32, i32) {
    %c0_i32 = arith.constant 0 : i32
    %c0_i32_0 = arith.constant 0 : i32
    %c0_i32_1 = arith.constant 0 : i32
    return %arg0, %arg1, %c0_i32, %c0_i32_0 : i32, i32, i32, i32
  }
  func.func @transform_4(%arg0: i32, %arg1: i32) -> (i32, i32, i32, i32) {
    %c0_i32 = arith.constant 0 : i32
    %c0_i32_0 = arith.constant 0 : i32
    %c0_i32_1 = arith.constant 0 : i32
    return %arg0, %arg1, %c0_i32, %c0_i32_0 : i32, i32, i32, i32
  }
}

module attributes {stable_mosaic.version = 11 : i64} {
  func.func @_bn_relu_kernel(%arg0: i32, %arg1: i32, %arg2: memref<1x8x16x128xf32, #tpu.memory_space<vmem>>, %arg3: memref<1x128xf32, #tpu.memory_space<vmem>>, %arg4: memref<1x128xf32, #tpu.memory_space<vmem>>, %arg5: memref<1x8x16x128xf32, #tpu.memory_space<vmem>>) attributes {dimension_semantics = [#tpu.dimension_semantics<parallel>, #tpu.dimension_semantics<parallel>], iteration_bounds = array<i64: 2, 2>, scalar_prefetch = 0 : i64, scratch_operands = 0 : i64, tpu.core_type = #tpu.core_type<tc>, window_params = [{transform_indices = @transform_0, window_bounds = array<i64: 1, 8, 16, 128>}, {pipeline_mode = #tpu.pipeline_mode<synchronous>, transform_indices = @transform_1, window_bounds = array<i64: 1, 128>}, {pipeline_mode = #tpu.pipeline_mode<synchronous>, transform_indices = @transform_2, window_bounds = array<i64: 1, 128>}, {transform_indices = @transform_3, window_bounds = array<i64: 1, 8, 16, 128>}]} {
    %c0 = arith.constant 0 : index
    %c0_0 = arith.constant 0 : index
    %c0_1 = arith.constant 0 : index
    %c0_2 = arith.constant 0 : index
    %0 = vector.load %arg2[%c0, %c0_0, %c0_1, %c0_2] : memref<1x8x16x128xf32, #tpu.memory_space<vmem>>, vector<1x8x16x128xf32>
    %c0_3 = arith.constant 0 : index
    %c0_4 = arith.constant 0 : index
    %1 = vector.load %arg3[%c0_3, %c0_4] : memref<1x128xf32, #tpu.memory_space<vmem>>, vector<1x128xf32>
    %2 = vector.shape_cast %1 : vector<1x128xf32> to vector<1x1x1x128xf32>
    %3 = vector.broadcast %2 : vector<1x1x1x128xf32> to vector<1x8x16x128xf32>
    %4 = arith.mulf %0, %3 : vector<1x8x16x128xf32>
    %c0_5 = arith.constant 0 : index
    %c0_6 = arith.constant 0 : index
    %5 = vector.load %arg4[%c0_5, %c0_6] : memref<1x128xf32, #tpu.memory_space<vmem>>, vector<1x128xf32>
    %6 = vector.shape_cast %5 : vector<1x128xf32> to vector<1x1x1x128xf32>
    %7 = vector.broadcast %6 : vector<1x1x1x128xf32> to vector<1x8x16x128xf32>
    %8 = arith.addf %4, %7 : vector<1x8x16x128xf32>
    %cst = arith.constant 0.000000e+00 : f32
    %9 = vector.broadcast %cst : f32 to vector<1x8x16x128xf32>
    %10 = arith.maximumf %8, %9 : vector<1x8x16x128xf32>
    %c0_7 = arith.constant 0 : index
    %c0_8 = arith.constant 0 : index
    %c0_9 = arith.constant 0 : index
    %c0_10 = arith.constant 0 : index
    %11 = vector.load %arg5[%c0_7, %c0_8, %c0_9, %c0_10] : memref<1x8x16x128xf32, #tpu.memory_space<vmem>>, vector<1x8x16x128xf32>
    tpu.vector_store %arg5[%c0_7, %c0_8, %c0_9, %c0_10], %10 {strides = array<i32>} : memref<1x8x16x128xf32, #tpu.memory_space<vmem>>, vector<1x8x16x128xf32>,
    return
  }
  func.func @transform_0(%arg0: i32, %arg1: i32) -> (i32, i32, i32, i32) {
    %c0_i32 = arith.constant 0 : i32
    %c0_i32_0 = arith.constant 0 : i32
    %c0_i32_1 = arith.constant 0 : i32
    return %arg0, %arg1, %c0_i32, %c0_i32_0 : i32, i32, i32, i32
  }
  func.func @transform_1(%arg0: i32, %arg1: i32) -> (i32, i32) {
    %c0_i32 = arith.constant 0 : i32
    %c0_i32_0 = arith.constant 0 : i32
    %c0_i32_1 = arith.constant 0 : i32
    return %c0_i32, %c0_i32_0 : i32, i32
  }
  func.func @transform_2(%arg0: i32, %arg1: i32) -> (i32, i32) {
    %c0_i32 = arith.constant 0 : i32
    %c0_i32_0 = arith.constant 0 : i32
    %c0_i32_1 = arith.constant 0 : i32
    return %c0_i32, %c0_i32_0 : i32, i32
  }
  func.func @transform_3(%arg0: i32, %arg1: i32) -> (i32, i32, i32, i32) {
    %c0_i32 = arith.constant 0 : i32
    %c0_i32_0 = arith.constant 0 : i32
    %c0_i32_1 = arith.constant 0 : i32
    return %arg0, %arg1, %c0_i32, %c0_i32_0 : i32, i32, i32, i32
  }
}

module attributes {stable_mosaic.version = 11 : i64} {
  func.func @_bn1_relu_conv2_stats_kernel(%arg0: i32, %arg1: i32, %arg2: memref<1x16x16x128xf32, #tpu.memory_space<vmem>>, %arg3: memref<1x128xf32, #tpu.memory_space<vmem>>, %arg4: memref<1x128xf32, #tpu.memory_space<vmem>>, %arg5: memref<9x128x128xf32, #tpu.memory_space<vmem>>, %arg6: memref<1x8x16x128xf32, #tpu.memory_space<vmem>>, %arg7: memref<1x1x8x128xf32, #tpu.memory_space<vmem>>, %arg8: memref<1x1x8x128xf32, #tpu.memory_space<vmem>>, %arg9: memref<10x48x128xf32, #tpu.memory_space<vmem>>) attributes {dimension_semantics = [#tpu.dimension_semantics<parallel>, #tpu.dimension_semantics<parallel>], iteration_bounds = array<i64: 2, 2>, scalar_prefetch = 0 : i64, scratch_operands = 1 : i64, tpu.core_type = #tpu.core_type<tc>, window_params = [{transform_indices = @transform_0, window_bounds = array<i64: 1, 16, 16, 128>}, {pipeline_mode = #tpu.pipeline_mode<synchronous>, transform_indices = @transform_1, window_bounds = array<i64: 1, 128>}, {pipeline_mode = #tpu.pipeline_mode<synchronous>, transform_indices = @transform_2, window_bounds = array<i64: 1, 128>}, {pipeline_mode = #tpu.pipeline_mode<synchronous>, transform_indices = @transform_3, window_bounds = array<i64: 9, 128, 128>}, {transform_indices = @transform_4, window_bounds = array<i64: 1, 8, 16, 128>}, {transform_indices = @transform_5, window_bounds = array<i64: 1, 1, 8, 128>}, {transform_indices = @transform_6, window_bounds = array<i64: 1, 1, 8, 128>}]} {
    %c8_i32 = arith.constant 8 : i32
    %0 = arith.muli %arg1, %c8_i32 : i32
    %1 = tpu.assume_multiple %0, 8 : i32
    %c0 = arith.constant 0 : index
    %c0_0 = arith.constant 0 : index
    %2 = vector.load %arg3[%c0, %c0_0] : memref<1x128xf32, #tpu.memory_space<vmem>>, vector<1x128xf32>
    %c0_1 = arith.constant 0 : index
    %c0_2 = arith.constant 0 : index
    %3 = vector.load %arg4[%c0_1, %c0_2] : memref<1x128xf32, #tpu.memory_space<vmem>>, vector<1x128xf32>
    %cst = arith.constant 0.000000e+00 : f32
    %4 = vector.broadcast %cst : f32 to vector<10x1x128xf32>
    %c0_3 = arith.constant 0 : index
    %c15 = arith.constant 15 : index
    %c0_4 = arith.constant 0 : index
    %5 = vector.load %arg9[%c0_3, %c15, %c0_4] : memref<10x48x128xf32, #tpu.memory_space<vmem>>, vector<10x1x128xf32>
    tpu.vector_store %arg9[%c0_3, %c15, %c0_4], %4 {strides = array<i32>} : memref<10x48x128xf32, #tpu.memory_space<vmem>>, vector<10x1x128xf32>,
    %c0_5 = arith.constant 0 : index
    %c32 = arith.constant 32 : index
    %c0_6 = arith.constant 0 : index
    %6 = vector.load %arg9[%c0_5, %c32, %c0_6] : memref<10x48x128xf32, #tpu.memory_space<vmem>>, vector<10x1x128xf32>
    tpu.vector_store %arg9[%c0_5, %c32, %c0_6], %4 {strides = array<i32>} : memref<10x48x128xf32, #tpu.memory_space<vmem>>, vector<10x1x128xf32>,
    %c0_7 = arith.constant 0 : index
    %7 = arith.index_cast %1 : i32 to index
    %c0_8 = arith.constant 0 : index
    %c0_9 = arith.constant 0 : index
    %8 = vector.load %arg2[%c0_7, %7, %c0_8, %c0_9] : memref<1x16x16x128xf32, #tpu.memory_space<vmem>>, vector<1x8x16x128xf32>
    %9 = vector.shape_cast %8 : vector<1x8x16x128xf32> to vector<8x16x128xf32>
    %10 = vector.shape_cast %2 : vector<1x128xf32> to vector<1x1x128xf32>
    %11 = vector.broadcast %10 : vector<1x1x128xf32> to vector<8x16x128xf32>
    %12 = arith.mulf %9, %11 : vector<8x16x128xf32>
    %13 = vector.shape_cast %3 : vector<1x128xf32> to vector<1x1x128xf32>
    %14 = vector.broadcast %13 : vector<1x1x128xf32> to vector<8x16x128xf32>
    %15 = arith.addf %12, %14 : vector<8x16x128xf32>
    %cst_10 = arith.constant 0.000000e+00 : f32
    %16 = vector.broadcast %cst_10 : f32 to vector<8x16x128xf32>
    %17 = arith.maximumf %15, %16 : vector<8x16x128xf32>
    %c1 = arith.constant 1 : index
    %c16 = arith.constant 16 : index
    %c0_11 = arith.constant 0 : index
    %18 = vector.load %arg9[%c1, %c16, %c0_11] : memref<10x48x128xf32, #tpu.memory_space<vmem>>, vector<8x16x128xf32>
    tpu.vector_store %arg9[%c1, %c16, %c0_11], %17 {strides = array<i32>} : memref<10x48x128xf32, #tpu.memory_space<vmem>>, vector<8x16x128xf32>,
    %cst_12 = arith.constant 0.000000e+00 : f32
    %19 = vector.broadcast %cst_12 : f32 to vector<1x16x128xf32>
    %c0_i32 = arith.constant 0 : i32
    %20 = arith.cmpi eq, %arg1, %c0_i32 : i32
    %21 = arith.extui %20 : i1 to i32
    %c0_i32_13 = arith.constant 0 : i32
    %22 = arith.cmpi ne, %21, %c0_i32_13 : i32
    scf.if %22 {
      %c0_89 = arith.constant 0 : index
      %c16_90 = arith.constant 16 : index
      %c0_91 = arith.constant 0 : index
      %102 = vector.load %arg9[%c0_89, %c16_90, %c0_91] : memref<10x48x128xf32, #tpu.memory_space<vmem>>, vector<1x16x128xf32>
      tpu.vector_store %arg9[%c0_89, %c16_90, %c0_91], %19 {strides = array<i32>} : memref<10x48x128xf32, #tpu.memory_space<vmem>>, vector<1x16x128xf32>,
    } else {
    }
    %c0_i32_14 = arith.constant 0 : i32
    %23 = arith.cmpi sgt, %arg1, %c0_i32_14 : i32
    %24 = arith.extui %23 : i1 to i32
    %c0_i32_15 = arith.constant 0 : i32
    %25 = arith.cmpi ne, %24, %c0_i32_15 : i32
    scf.if %25 {
      %c1_i32_89 = arith.constant 1 : i32
      %102 = arith.subi %1, %c1_i32_89 : i32
      %c0_90 = arith.constant 0 : index
      %103 = arith.index_cast %102 : i32 to index
      %c0_91 = arith.constant 0 : index
      %c0_92 = arith.constant 0 : index
      %104 = vector.load %arg2[%c0_90, %103, %c0_91, %c0_92] : memref<1x16x16x128xf32, #tpu.memory_space<vmem>>, vector<1x1x16x128xf32>
      %105 = vector.shape_cast %104 : vector<1x1x16x128xf32> to vector<1x16x128xf32>
      %106 = vector.shape_cast %2 : vector<1x128xf32> to vector<1x1x128xf32>
      %107 = vector.broadcast %106 : vector<1x1x128xf32> to vector<1x16x128xf32>
      %108 = arith.mulf %105, %107 : vector<1x16x128xf32>
      %109 = vector.shape_cast %3 : vector<1x128xf32> to vector<1x1x128xf32>
      %110 = vector.broadcast %109 : vector<1x1x128xf32> to vector<1x16x128xf32>
      %111 = arith.addf %108, %110 : vector<1x16x128xf32>
      %cst_93 = arith.constant 0.000000e+00 : f32
      %112 = vector.broadcast %cst_93 : f32 to vector<1x16x128xf32>
      %113 = arith.maximumf %111, %112 : vector<1x16x128xf32>
      %c0_94 = arith.constant 0 : index
      %c16_95 = arith.constant 16 : index
      %c0_96 = arith.constant 0 : index
      %114 = vector.load %arg9[%c0_94, %c16_95, %c0_96] : memref<10x48x128xf32, #tpu.memory_space<vmem>>, vector<1x16x128xf32>
      tpu.vector_store %arg9[%c0_94, %c16_95, %c0_96], %113 {strides = array<i32>} : memref<10x48x128xf32, #tpu.memory_space<vmem>>, vector<1x16x128xf32>,
    } else {
    }
    %c1_i32 = arith.constant 1 : i32
    %26 = arith.cmpi eq, %arg1, %c1_i32 : i32
    %27 = arith.extui %26 : i1 to i32
    %c0_i32_16 = arith.constant 0 : i32
    %28 = arith.cmpi ne, %27, %c0_i32_16 : i32
    scf.if %28 {
      %c9 = arith.constant 9 : index
      %c16_89 = arith.constant 16 : index
      %c0_90 = arith.constant 0 : index
      %102 = vector.load %arg9[%c9, %c16_89, %c0_90] : memref<10x48x128xf32, #tpu.memory_space<vmem>>, vector<1x16x128xf32>
      tpu.vector_store %arg9[%c9, %c16_89, %c0_90], %19 {strides = array<i32>} : memref<10x48x128xf32, #tpu.memory_space<vmem>>, vector<1x16x128xf32>,
    } else {
    }
    %c1_i32_17 = arith.constant 1 : i32
    %29 = arith.cmpi slt, %arg1, %c1_i32_17 : i32
    %30 = arith.extui %29 : i1 to i32
    %c0_i32_18 = arith.constant 0 : i32
    %31 = arith.cmpi ne, %30, %c0_i32_18 : i32
    scf.if %31 {
      %c8_i32_89 = arith.constant 8 : i32
      %102 = arith.addi %1, %c8_i32_89 : i32
      %c0_90 = arith.constant 0 : index
      %103 = arith.index_cast %102 : i32 to index
      %c0_91 = arith.constant 0 : index
      %c0_92 = arith.constant 0 : index
      %104 = vector.load %arg2[%c0_90, %103, %c0_91, %c0_92] : memref<1x16x16x128xf32, #tpu.memory_space<vmem>>, vector<1x1x16x128xf32>
      %105 = vector.shape_cast %104 : vector<1x1x16x128xf32> to vector<1x16x128xf32>
      %106 = vector.shape_cast %2 : vector<1x128xf32> to vector<1x1x128xf32>
      %107 = vector.broadcast %106 : vector<1x1x128xf32> to vector<1x16x128xf32>
      %108 = arith.mulf %105, %107 : vector<1x16x128xf32>
      %109 = vector.shape_cast %3 : vector<1x128xf32> to vector<1x1x128xf32>
      %110 = vector.broadcast %109 : vector<1x1x128xf32> to vector<1x16x128xf32>
      %111 = arith.addf %108, %110 : vector<1x16x128xf32>
      %cst_93 = arith.constant 0.000000e+00 : f32
      %112 = vector.broadcast %cst_93 : f32 to vector<1x16x128xf32>
      %113 = arith.maximumf %111, %112 : vector<1x16x128xf32>
      %c9 = arith.constant 9 : index
      %c16_94 = arith.constant 16 : index
      %c0_95 = arith.constant 0 : index
      %114 = vector.load %arg9[%c9, %c16_94, %c0_95] : memref<10x48x128xf32, #tpu.memory_space<vmem>>, vector<1x16x128xf32>
      tpu.vector_store %arg9[%c9, %c16_94, %c0_95], %113 {strides = array<i32>} : memref<10x48x128xf32, #tpu.memory_space<vmem>>, vector<1x16x128xf32>,
    } else {
    }
    %cst_19 = arith.constant 0.000000e+00 : f32
    %32 = vector.broadcast %cst_19 : f32 to vector<128x128xf32>
    %c0_20 = arith.constant 0 : index
    %c15_21 = arith.constant 15 : index
    %c0_22 = arith.constant 0 : index
    %33 = vector.load %arg9[%c0_20, %c15_21, %c0_22] : memref<10x48x128xf32, #tpu.memory_space<vmem>>, vector<8x16x128xf32>
    %34 = vector.shape_cast %33 : vector<8x16x128xf32> to vector<128x128xf32>
    %c0_23 = arith.constant 0 : index
    %c0_24 = arith.constant 0 : index
    %c0_25 = arith.constant 0 : index
    %35 = vector.load %arg5[%c0_23, %c0_24, %c0_25] : memref<9x128x128xf32, #tpu.memory_space<vmem>>, vector<1x128x128xf32>
    %36 = vector.shape_cast %35 : vector<1x128x128xf32> to vector<128x128xf32>
    %cst_26 = arith.constant dense<0.000000e+00> : vector<128x128xf32>
    %37 = tpu.matmul %34, %36, %cst_26 {dimension_numbers = #tpu.dot_dimension_numbers<[1], [0], [0], [1], [0, 0, 1, 1], [], []>} : vector<128x128xf32>, vector<128x128xf32>, vector<128x128xf32> -> vector<128x128xf32>
    %38 = arith.addf %32, %37 : vector<128x128xf32>
    %c0_27 = arith.constant 0 : index
    %c16_28 = arith.constant 16 : index
    %c0_29 = arith.constant 0 : index
    %39 = vector.load %arg9[%c0_27, %c16_28, %c0_29] : memref<10x48x128xf32, #tpu.memory_space<vmem>>, vector<8x16x128xf32>
    %40 = vector.shape_cast %39 : vector<8x16x128xf32> to vector<128x128xf32>
    %c1_30 = arith.constant 1 : index
    %c0_31 = arith.constant 0 : index
    %c0_32 = arith.constant 0 : index
    %41 = vector.load %arg5[%c1_30, %c0_31, %c0_32] : memref<9x128x128xf32, #tpu.memory_space<vmem>>, vector<1x128x128xf32>
    %42 = vector.shape_cast %41 : vector<1x128x128xf32> to vector<128x128xf32>
    %cst_33 = arith.constant dense<0.000000e+00> : vector<128x128xf32>
    %43 = tpu.matmul %40, %42, %cst_33 {dimension_numbers = #tpu.dot_dimension_numbers<[1], [0], [0], [1], [0, 0, 1, 1], [], []>} : vector<128x128xf32>, vector<128x128xf32>, vector<128x128xf32> -> vector<128x128xf32>
    %44 = arith.addf %38, %43 : vector<128x128xf32>
    %c0_34 = arith.constant 0 : index
    %c17 = arith.constant 17 : index
    %c0_35 = arith.constant 0 : index
    %45 = vector.load %arg9[%c0_34, %c17, %c0_35] : memref<10x48x128xf32, #tpu.memory_space<vmem>>, vector<8x16x128xf32>
    %46 = vector.shape_cast %45 : vector<8x16x128xf32> to vector<128x128xf32>
    %c2 = arith.constant 2 : index
    %c0_36 = arith.constant 0 : index
    %c0_37 = arith.constant 0 : index
    %47 = vector.load %arg5[%c2, %c0_36, %c0_37] : memref<9x128x128xf32, #tpu.memory_space<vmem>>, vector<1x128x128xf32>
    %48 = vector.shape_cast %47 : vector<1x128x128xf32> to vector<128x128xf32>
    %cst_38 = arith.constant dense<0.000000e+00> : vector<128x128xf32>
    %49 = tpu.matmul %46, %48, %cst_38 {dimension_numbers = #tpu.dot_dimension_numbers<[1], [0], [0], [1], [0, 0, 1, 1], [], []>} : vector<128x128xf32>, vector<128x128xf32>, vector<128x128xf32> -> vector<128x128xf32>
    %50 = arith.addf %44, %49 : vector<128x128xf32>
    %c1_39 = arith.constant 1 : index
    %c15_40 = arith.constant 15 : index
    %c0_41 = arith.constant 0 : index
    %51 = vector.load %arg9[%c1_39, %c15_40, %c0_41] : memref<10x48x128xf32, #tpu.memory_space<vmem>>, vector<8x16x128xf32>
    %52 = vector.shape_cast %51 : vector<8x16x128xf32> to vector<128x128xf32>
    %c3 = arith.constant 3 : index
    %c0_42 = arith.constant 0 : index
    %c0_43 = arith.constant 0 : index
    %53 = vector.load %arg5[%c3, %c0_42, %c0_43] : memref<9x128x128xf32, #tpu.memory_space<vmem>>, vector<1x128x128xf32>
    %54 = vector.shape_cast %53 : vector<1x128x128xf32> to vector<128x128xf32>
    %cst_44 = arith.constant dense<0.000000e+00> : vector<128x128xf32>
    %55 = tpu.matmul %52, %54, %cst_44 {dimension_numbers = #tpu.dot_dimension_numbers<[1], [0], [0], [1], [0, 0, 1, 1], [], []>} : vector<128x128xf32>, vector<128x128xf32>, vector<128x128xf32> -> vector<128x128xf32>
    %56 = arith.addf %50, %55 : vector<128x128xf32>
    %c1_45 = arith.constant 1 : index
    %c16_46 = arith.constant 16 : index
    %c0_47 = arith.constant 0 : index
    %57 = vector.load %arg9[%c1_45, %c16_46, %c0_47] : memref<10x48x128xf32, #tpu.memory_space<vmem>>, vector<8x16x128xf32>
    %58 = vector.shape_cast %57 : vector<8x16x128xf32> to vector<128x128xf32>
    %c4 = arith.constant 4 : index
    %c0_48 = arith.constant 0 : index
    %c0_49 = arith.constant 0 : index
    %59 = vector.load %arg5[%c4, %c0_48, %c0_49] : memref<9x128x128xf32, #tpu.memory_space<vmem>>, vector<1x128x128xf32>
    %60 = vector.shape_cast %59 : vector<1x128x128xf32> to vector<128x128xf32>
    %cst_50 = arith.constant dense<0.000000e+00> : vector<128x128xf32>
    %61 = tpu.matmul %58, %60, %cst_50 {dimension_numbers = #tpu.dot_dimension_numbers<[1], [0], [0], [1], [0, 0, 1, 1], [], []>} : vector<128x128xf32>, vector<128x128xf32>, vector<128x128xf32> -> vector<128x128xf32>
    %62 = arith.addf %56, %61 : vector<128x128xf32>
    %c1_51 = arith.constant 1 : index
    %c17_52 = arith.constant 17 : index
    %c0_53 = arith.constant 0 : index
    %63 = vector.load %arg9[%c1_51, %c17_52, %c0_53] : memref<10x48x128xf32, #tpu.memory_space<vmem>>, vector<8x16x128xf32>
    %64 = vector.shape_cast %63 : vector<8x16x128xf32> to vector<128x128xf32>
    %c5 = arith.constant 5 : index
    %c0_54 = arith.constant 0 : index
    %c0_55 = arith.constant 0 : index
    %65 = vector.load %arg5[%c5, %c0_54, %c0_55] : memref<9x128x128xf32, #tpu.memory_space<vmem>>, vector<1x128x128xf32>
    %66 = vector.shape_cast %65 : vector<1x128x128xf32> to vector<128x128xf32>
    %cst_56 = arith.constant dense<0.000000e+00> : vector<128x128xf32>
    %67 = tpu.matmul %64, %66, %cst_56 {dimension_numbers = #tpu.dot_dimension_numbers<[1], [0], [0], [1], [0, 0, 1, 1], [], []>} : vector<128x128xf32>, vector<128x128xf32>, vector<128x128xf32> -> vector<128x128xf32>
    %68 = arith.addf %62, %67 : vector<128x128xf32>
    %c2_57 = arith.constant 2 : index
    %c15_58 = arith.constant 15 : index
    %c0_59 = arith.constant 0 : index
    %69 = vector.load %arg9[%c2_57, %c15_58, %c0_59] : memref<10x48x128xf32, #tpu.memory_space<vmem>>, vector<8x16x128xf32>
    %70 = vector.shape_cast %69 : vector<8x16x128xf32> to vector<128x128xf32>
    %c6 = arith.constant 6 : index
    %c0_60 = arith.constant 0 : index
    %c0_61 = arith.constant 0 : index
    %71 = vector.load %arg5[%c6, %c0_60, %c0_61] : memref<9x128x128xf32, #tpu.memory_space<vmem>>, vector<1x128x128xf32>
    %72 = vector.shape_cast %71 : vector<1x128x128xf32> to vector<128x128xf32>
    %cst_62 = arith.constant dense<0.000000e+00> : vector<128x128xf32>
    %73 = tpu.matmul %70, %72, %cst_62 {dimension_numbers = #tpu.dot_dimension_numbers<[1], [0], [0], [1], [0, 0, 1, 1], [], []>} : vector<128x128xf32>, vector<128x128xf32>, vector<128x128xf32> -> vector<128x128xf32>
    %74 = arith.addf %68, %73 : vector<128x128xf32>
    %c2_63 = arith.constant 2 : index
    %c16_64 = arith.constant 16 : index
    %c0_65 = arith.constant 0 : index
    %75 = vector.load %arg9[%c2_63, %c16_64, %c0_65] : memref<10x48x128xf32, #tpu.memory_space<vmem>>, vector<8x16x128xf32>
    %76 = vector.shape_cast %75 : vector<8x16x128xf32> to vector<128x128xf32>
    %c7 = arith.constant 7 : index
    %c0_66 = arith.constant 0 : index
    %c0_67 = arith.constant 0 : index
    %77 = vector.load %arg5[%c7, %c0_66, %c0_67] : memref<9x128x128xf32, #tpu.memory_space<vmem>>, vector<1x128x128xf32>
    %78 = vector.shape_cast %77 : vector<1x128x128xf32> to vector<128x128xf32>
    %cst_68 = arith.constant dense<0.000000e+00> : vector<128x128xf32>
    %79 = tpu.matmul %76, %78, %cst_68 {dimension_numbers = #tpu.dot_dimension_numbers<[1], [0], [0], [1], [0, 0, 1, 1], [], []>} : vector<128x128xf32>, vector<128x128xf32>, vector<128x128xf32> -> vector<128x128xf32>
    %80 = arith.addf %74, %79 : vector<128x128xf32>
    %c2_69 = arith.constant 2 : index
    %c17_70 = arith.constant 17 : index
    %c0_71 = arith.constant 0 : index
    %81 = vector.load %arg9[%c2_69, %c17_70, %c0_71] : memref<10x48x128xf32, #tpu.memory_space<vmem>>, vector<8x16x128xf32>
    %82 = vector.shape_cast %81 : vector<8x16x128xf32> to vector<128x128xf32>
    %c8 = arith.constant 8 : index
    %c0_72 = arith.constant 0 : index
    %c0_73 = arith.constant 0 : index
    %83 = vector.load %arg5[%c8, %c0_72, %c0_73] : memref<9x128x128xf32, #tpu.memory_space<vmem>>, vector<1x128x128xf32>
    %84 = vector.shape_cast %83 : vector<1x128x128xf32> to vector<128x128xf32>
    %cst_74 = arith.constant dense<0.000000e+00> : vector<128x128xf32>
    %85 = tpu.matmul %82, %84, %cst_74 {dimension_numbers = #tpu.dot_dimension_numbers<[1], [0], [0], [1], [0, 0, 1, 1], [], []>} : vector<128x128xf32>, vector<128x128xf32>, vector<128x128xf32> -> vector<128x128xf32>
    %86 = arith.addf %80, %85 : vector<128x128xf32>
    %87 = vector.shape_cast %86 : vector<128x128xf32> to vector<8x16x128xf32>
    %c0_75 = arith.constant 0 : index
    %c0_76 = arith.constant 0 : index
    %c0_77 = arith.constant 0 : index
    %c0_78 = arith.constant 0 : index
    %88 = vector.load %arg6[%c0_75, %c0_76, %c0_77, %c0_78] : memref<1x8x16x128xf32, #tpu.memory_space<vmem>>, vector<1x8x16x128xf32>
    %89 = vector.shape_cast %88 : vector<1x8x16x128xf32> to vector<8x16x128xf32>
    %90 = vector.shape_cast %87 : vector<8x16x128xf32> to vector<1x8x16x128xf32>
    tpu.vector_store %arg6[%c0_75, %c0_76, %c0_77, %c0_78], %90 {strides = array<i32>} : memref<1x8x16x128xf32, #tpu.memory_space<vmem>>, vector<1x8x16x128xf32>,
    %91 = vector.shape_cast %86 : vector<128x128xf32> to vector<16x8x128xf32>
    %cst_79 = arith.constant dense<0.000000e+00> : vector<8x128xf32>
    %92 = vector.multi_reduction <add>, %91, %cst_79 [0] : vector<16x8x128xf32> to vector<8x128xf32>
    %c0_80 = arith.constant 0 : index
    %c0_81 = arith.constant 0 : index
    %c0_82 = arith.constant 0 : index
    %c0_83 = arith.constant 0 : index
    %93 = vector.load %arg7[%c0_80, %c0_81, %c0_82, %c0_83] : memref<1x1x8x128xf32, #tpu.memory_space<vmem>>, vector<1x1x8x128xf32>
    %94 = vector.shape_cast %93 : vector<1x1x8x128xf32> to vector<8x128xf32>
    %95 = vector.shape_cast %92 : vector<8x128xf32> to vector<1x1x8x128xf32>
    tpu.vector_store %arg7[%c0_80, %c0_81, %c0_82, %c0_83], %95 {strides = array<i32>} : memref<1x1x8x128xf32, #tpu.memory_space<vmem>>, vector<1x1x8x128xf32>,
    %96 = arith.mulf %86, %86 : vector<128x128xf32>
    %97 = vector.shape_cast %96 : vector<128x128xf32> to vector<16x8x128xf32>
    %cst_84 = arith.constant dense<0.000000e+00> : vector<8x128xf32>
    %98 = vector.multi_reduction <add>, %97, %cst_84 [0] : vector<16x8x128xf32> to vector<8x128xf32>
    %c0_85 = arith.constant 0 : index
    %c0_86 = arith.constant 0 : index
    %c0_87 = arith.constant 0 : index
    %c0_88 = arith.constant 0 : index
    %99 = vector.load %arg8[%c0_85, %c0_86, %c0_87, %c0_88] : memref<1x1x8x128xf32, #tpu.memory_space<vmem>>, vector<1x1x8x128xf32>
    %100 = vector.shape_cast %99 : vector<1x1x8x128xf32> to vector<8x128xf32>
    %101 = vector.shape_cast %98 : vector<8x128xf32> to vector<1x1x8x128xf32>
    tpu.vector_store %arg8[%c0_85, %c0_86, %c0_87, %c0_88], %101 {strides = array<i32>} : memref<1x1x8x128xf32, #tpu.memory_space<vmem>>, vector<1x1x8x128xf32>,
    return
  }
  func.func @transform_0(%arg0: i32, %arg1: i32) -> (i32, i32, i32, i32) {
    %c0_i32 = arith.constant 0 : i32
    %c0_i32_0 = arith.constant 0 : i32
    %c0_i32_1 = arith.constant 0 : i32
    %c0_i32_2 = arith.constant 0 : i32
    return %arg0, %c0_i32, %c0_i32_0, %c0_i32_1 : i32, i32, i32, i32
  }
  func.func @transform_1(%arg0: i32, %arg1: i32) -> (i32, i32) {
    %c0_i32 = arith.constant 0 : i32
    %c0_i32_0 = arith.constant 0 : i32
    %c0_i32_1 = arith.constant 0 : i32
    return %c0_i32, %c0_i32_0 : i32, i32
  }
  func.func @transform_2(%arg0: i32, %arg1: i32) -> (i32, i32) {
    %c0_i32 = arith.constant 0 : i32
    %c0_i32_0 = arith.constant 0 : i32
    %c0_i32_1 = arith.constant 0 : i32
    return %c0_i32, %c0_i32_0 : i32, i32
  }
  func.func @transform_3(%arg0: i32, %arg1: i32) -> (i32, i32, i32) {
    %c0_i32 = arith.constant 0 : i32
    %c0_i32_0 = arith.constant 0 : i32
    %c0_i32_1 = arith.constant 0 : i32
    %c0_i32_2 = arith.constant 0 : i32
    return %c0_i32, %c0_i32_0, %c0_i32_1 : i32, i32, i32
  }
  func.func @transform_4(%arg0: i32, %arg1: i32) -> (i32, i32, i32, i32) {
    %c0_i32 = arith.constant 0 : i32
    %c0_i32_0 = arith.constant 0 : i32
    %c0_i32_1 = arith.constant 0 : i32
    return %arg0, %arg1, %c0_i32, %c0_i32_0 : i32, i32, i32, i32
  }
  func.func @transform_5(%arg0: i32, %arg1: i32) -> (i32, i32, i32, i32) {
    %c0_i32 = arith.constant 0 : i32
    %c0_i32_0 = arith.constant 0 : i32
    %c0_i32_1 = arith.constant 0 : i32
    return %arg0, %arg1, %c0_i32, %c0_i32_0 : i32, i32, i32, i32
  }
  func.func @transform_6(%arg0: i32, %arg1: i32) -> (i32, i32, i32, i32) {
    %c0_i32 = arith.constant 0 : i32
    %c0_i32_0 = arith.constant 0 : i32
    %c0_i32_1 = arith.constant 0 : i32
    return %arg0, %arg1, %c0_i32, %c0_i32_0 : i32, i32, i32, i32
  }
}

</mosaic_0001>

<bundles_post_ra>
// kernel: unet_block_forward.5
= control target key start
LH: loop header
LB: loop body
LE: loop exit
PB: predicated region body
PF: predicated region fallthrough
CT: control target
= control target key end

     0   :  { %s525_s12 = smov 0   ;;  %s527_s13 = smov 0   ;;  %s654_s0 = inlined_call_operand.vmem [shape: f32[2,16,16,128], index: 0, kind: input, shape index: {}]   ;;  %s655_s1 = inlined_call_operand.vmem [shape: f32[1,128], index: 1, kind: input, shape index: {}]   ;;  %s656_s2 = inlined_call_operand.vmem [shape: f32[1,128], index: 2, kind: input, shape index: {}]   ;;  %s657_s3 = inlined_call_operand.vmem [shape: f32[2,16,16,128], index: 3, kind: output, shape index: {}]  }
   0x1   :  { %s529_s14 = smov 0   ;;  %s531_s15 = smov 0  }
   0x2   :  { %s533_s16 = smov 0  }
   0x3 LB: > { %s22_s17 = sadd.s32 1, %s495_s14  ;;  %s25_s18 = sadd.s32 1, %s499_s15  ;;  %s503_s16 = sphi %s533_s16, %s13_s16   ;;  %s499_s15 = sphi %s531_s15, %s661_s15   ;;  %s495_s14 = sphi %s529_s14, %s660_s14   ;;  %s491_s13 = sphi %s527_s13, %s659_s13   ;;  %s487_s12 = sphi %s525_s12, %s658_s12  }
   0x4   : > { %p23_p0 = scmp.ge.s32.totalorder %s22_s17, 2  ;;  %p412_p1 = scmp.ge.s32.totalorder %s503_s16, 1 }
   0x5   : > { %p159_p2 = scmp.lt.s32.totalorder %s503_s16, 5 }
   0x6   : > { %s663_s17 = smov (%p23_p0, %s22_s17), 0  ;;  %s665_s18 = smov (!%p23_p0, %s25_s18), %s499_s15 }
   0x7   : > { %p160_p3 = pnand %p412_p1, %p159_p2  ;;  %p27_p4 = scmp.ge.s32.totalorder %s665_s18, 2 }
   0x8   : > { %s413_s19 = sshll.u32 (!%p160_p3), %s487_s12, 3  ;;  %p194_p5 = scmp.lt.s32.totalorder (!%p160_p3), %s491_s13, 1  ;;  %v558_v0 = vld [vmem:[%s655_s1] ss:$0 sm:$0xff] (!%p160_p3) }
   0x9   : > { %s667_s18 = smov (%p27_p4, %s665_s18), 0  ;;  %163 = sbr.rel (%p160_p3) target bundleno = 39 (0x27), region = 32 }
   0xa   : > { %p196_p6 = scmp.lt.s32.totalorder (!%p160_p3), %s413_s19, 15  ;;  %v568_v1 = vld [vmem:[%s656_s2] ss:$0 sm:$0xff] (!%p160_p3) }
  0x10   : > { %s669_s13 = smov (!%p194_p5, %s491_s13), 1  ;;  %s671_s19 = smov (!%p196_p6, %s413_s19), 15 }
  0x11   : > { %s415_s20 = sshll.u32 %s669_s13, 5  ;;  %s414_s21 = sshll.u32 %s671_s19, 1 }
  0x12   : > { %s200_s22 = sadd.s32 %s415_s20, %s414_s21 }
  0x13   : > { %s416_s23 = sshll.u32 %s200_s22, 3 }
  0x14   : > { %s563_s28 = scalar_lea.vmem %s654_s0, %s416_s23  ;;  %s591_s6 = scalar_lea.vmem %s657_s3, %s416_s23 }
  0x15   : > { %v215_v2 = vld [vmem:[%s563_s28] sm:$0xff]  ;;  %v216_v3 = vld [vmem:[%s563_s28 + $0x8] sm:$0xff]  ;;  %v217_v4 = vld [vmem:[%s563_s28 + $0x10] sm:$0xff] }
  0x16   : > { %v238_v5 = vmul.f32 %v558_v0, %v215_v2  ;;  %v239_v6 = vmul.f32 %v558_v0, %v216_v3  ;;  %v240_v7 = vmul.f32 %v558_v0, %v217_v4  ;;  %v218_v8 = vld [vmem:[%s563_s28 + $0x18] sm:$0xff]  ;;  %v219_v9 = vld [vmem:[%s563_s28 + $0x20] sm:$0xff]  ;;  %v220_v10 = vld [vmem:[%s563_s28 + $0x28] sm:$0xff] }
  0x17   : > { %v241_v11 = vmul.f32 %v558_v0, %v218_v8  ;;  %v242_v12 = vmul.f32 %v558_v0, %v219_v9  ;;  %v243_v13 = vmul.f32 %v558_v0, %v220_v10  ;;  %v221_v14 = vld [vmem:[%s563_s28 + $0x30] sm:$0xff]  ;;  %v222_v15 = vld [vmem:[%s563_s28 + $0x38] sm:$0xff]  ;;  %v223_v24 = vld [vmem:[%s563_s28 + $0x40] sm:$0xff] }
  0x18   : > { %v261_v16 = vadd.f32 %v568_v1, %v238_v5  ;;  %v262_v17 = vadd.f32 %v568_v1, %v239_v6  ;;  %v263_v18 = vadd.f32 %v568_v1, %v240_v7  ;;  %v244_v19 = vmul.f32 %v558_v0, %v221_v14  ;;  %v224_v25 = vld [vmem:[%s563_s28 + $0x48] sm:$0xff]  ;;  %v225_v26 = vld [vmem:[%s563_s28 + $0x50] sm:$0xff]  ;;  %v226_v31 = vld [vmem:[%s563_s28 + $0x58] sm:$0xff] }
  0x19   : > { %v264_v20 = vadd.f32 %v568_v1, %v241_v11  ;;  %v265_v21 = vadd.f32 %v568_v1, %v242_v12  ;;  %v266_v22 = vadd.f32 %v568_v1, %v243_v13  ;;  %v245_v23 = vmul.f32 %v558_v0, %v222_v15  ;;  %v227_v32 = vld [vmem:[%s563_s28 + $0x60] sm:$0xff]  ;;  %v228_v33 = vld [vmem:[%s563_s28 + $0x68] sm:$0xff]  ;;  %v229_v38 = vld [vmem:[%s563_s28 + $0x70] sm:$0xff] }
  0x1a   : > { %v277_v27 = vmax.f32 %v261_v16, 0.0  ;;  %v278_v28 = vmax.f32 %v262_v17, 0.0  ;;  %v279_v29 = vmax.f32 %v263_v18, 0.0  ;;  %v267_v30 = vadd.f32 %v568_v1, %v244_v19  ;;  %v230_v43 = vld [vmem:[%s563_s28 + $0x78] sm:$0xff] }
  0x1b   : > { %v280_v34 = vmax.f32 %v264_v20, 0.0  ;;  %v281_v35 = vmax.f32 %v265_v21, 0.0  ;;  %v282_v36 = vmax.f32 %v266_v22, 0.0  ;;  %v268_v37 = vadd.f32 %v568_v1, %v245_v23 }
  0x1c   : > { %293 = vst [vmem:[%s591_s6] sm:$0xff] %v277_v27  ;;  %294 = vst [vmem:[%s591_s6 + $0x8] sm:$0xff] %v278_v28  ;;  %v283_v39 = vmax.f32 %v267_v30, 0.0  ;;  %v246_v40 = vmul.f32 %v558_v0, %v223_v24  ;;  %v247_v41 = vmul.f32 %v558_v0, %v224_v25  ;;  %v248_v42 = vmul.f32 %v558_v0, %v225_v26 }
  0x1d   : > { %295 = vst [vmem:[%s591_s6 + $0x10] sm:$0xff] %v279_v29  ;;  %296 = vst [vmem:[%s591_s6 + $0x18] sm:$0xff] %v280_v34  ;;  %v284_v44 = vmax.f32 %v268_v37, 0.0  ;;  %v249_v45 = vmul.f32 %v558_v0, %v226_v31  ;;  %v250_v46 = vmul.f32 %v558_v0, %v227_v32  ;;  %v251_v47 = vmul.f32 %v558_v0, %v228_v33 }
  0x1e   : > { %297 = vst [vmem:[%s591_s6 + $0x20] sm:$0xff] %v281_v35  ;;  %298 = vst [vmem:[%s591_s6 + $0x28] sm:$0xff] %v282_v36  ;;  %v269_v48 = vadd.f32 %v568_v1, %v246_v40  ;;  %v270_v49 = vadd.f32 %v568_v1, %v247_v41  ;;  %v271_v50 = vadd.f32 %v568_v1, %v248_v42 }
  0x1f   : > { %299 = vst [vmem:[%s591_s6 + $0x30] sm:$0xff] %v283_v39  ;;  %v252_v51 = vmul.f32 %v558_v0, %v229_v38  ;;  %300 = vst [vmem:[%s591_s6 + $0x38] sm:$0xff] %v284_v44  ;;  %v272_v52 = vadd.f32 %v568_v1, %v249_v45  ;;  %v273_v53 = vadd.f32 %v568_v1, %v250_v46 }
  0x20   : > { %v274_v54 = vadd.f32 %v568_v1, %v251_v47  ;;  %v253_v55 = vmul.f32 %v558_v0, %v230_v43  ;;  %v285_v56 = vmax.f32 %v269_v48, 0.0  ;;  %v286_v57 = vmax.f32 %v270_v49, 0.0 }
  0x21   : > { %v287_v58 = vmax.f32 %v271_v50, 0.0  ;;  %v275_v59 = vadd.f32 %v568_v1, %v252_v51  ;;  %v288_v60 = vmax.f32 %v272_v52, 0.0  ;;  %v289_v61 = vmax.f32 %v273_v53, 0.0 }
  0x22   : > { %v290_v62 = vmax.f32 %v274_v54, 0.0  ;;  %v276_v63 = vadd.f32 %v568_v1, %v253_v55  ;;  %301 = vst [vmem:[%s591_s6 + $0x40] sm:$0xff] %v285_v56  ;;  %302 = vst [vmem:[%s591_s6 + $0x48] sm:$0xff] %v286_v57 }
  0x23   : > { %303 = vst [vmem:[%s591_s6 + $0x50] sm:$0xff] %v287_v58  ;;  %v291_v2 = vmax.f32 %v275_v59, 0.0  ;;  %304 = vst [vmem:[%s591_s6 + $0x58] sm:$0xff] %v288_v60 }
  0x24   : > { %305 = vst [vmem:[%s591_s6 + $0x60] sm:$0xff] %v289_v61  ;;  %306 = vst [vmem:[%s591_s6 + $0x68] sm:$0xff] %v290_v62  ;;  %v292_v0 = vmax.f32 %v276_v63, 0.0 }
  0x25   : > { %307 = vst [vmem:[%s591_s6 + $0x70] sm:$0xff] %v291_v2 }
  0x26   : > { %308 = vst [vmem:[%s591_s6 + $0x78] sm:$0xff] %v292_v0 }
  0x27 PF: > { %s13_s16 = sadd.s32 1, %s503_s16   ;;  %s658_s12 = smov %s495_s14 }
  0x28   : > { %p10_p7 = scmp.ge.s32.totalorder %s13_s16, 6   ;;  %s659_s13 = smov %s499_s15 }
  0x29   : > { %s660_s14 = smov %s663_s17  ;;  %s661_s15 = smov %s667_s18 }
  0x2a   :  { %12 = sbr.rel (!%p10_p7) target bundleno = 3 (0x3), region = 62 }

// kernel: unet_block_forward.3
= control target key start
LH: loop header
LB: loop body
LE: loop exit
PB: predicated region body
PF: predicated region fallthrough
CT: control target
= control target key end

     0   :  { %s1628_s15 = smov 0   ;;  %s1630_s16 = smov 0   ;;  %s2269_s0 = inlined_call_operand.vmem [shape: f32[2,18,18,4], index: 0, kind: input, shape index: {}]   ;;  %s2270_s1 = inlined_call_operand.vmem [shape: f32[36,128], index: 1, kind: input, shape index: {}]   ;;  %s2271_s2 = inlined_call_operand.vmem [shape: f32[2,16,16,128], index: 2, kind: output, shape index: {0}]   ;;  %s2272_s3 = inlined_call_operand.vmem [shape: f32[2,2,8,128], index: 3, kind: output, shape index: {1}]   ;;  %s2273_s4 = inlined_call_operand.vmem [shape: f32[2,2,8,128], index: 4, kind: output, shape index: {2}]  }
   0x1   :  { %s1632_s17 = smov 0   ;;  %s1634_s18 = smov 0  }
   0x2   :  { %s1636_s19 = smov 0  }
   0x3 LB: > { %s24_s20 = sadd.s32 1, %s1585_s17  ;;  %s27_s21 = sadd.s32 1, %s1589_s18  ;;  %s1593_s19 = sphi %s1636_s19, %s15_s19   ;;  %s1589_s18 = sphi %s1634_s18, %s2277_s18   ;;  %s1585_s17 = sphi %s1632_s17, %s2276_s17   ;;  %s1581_s16 = sphi %s1630_s16, %s2275_s16   ;;  %s1577_s15 = sphi %s1628_s15, %s2274_s15  }
   0x4   : > { %p25_p0 = scmp.ge.s32.totalorder %s24_s20, 2  ;;  %p1406_p1 = scmp.ge.s32.totalorder %s1593_s19, 1 }
   0x5   : > { %p185_p2 = scmp.lt.s32.totalorder %s1593_s19, 5 }
   0x6   : > { %s2279_s20 = smov (%p25_p0, %s24_s20), 0  ;;  %s2281_s21 = smov (!%p25_p0, %s27_s21), %s1589_s18 }
   0x7   : > { %p186_p3 = pnand %p1406_p1, %p185_p2  ;;  %p29_p4 = scmp.ge.s32.totalorder %s2281_s21, 2 }
   0x8   : > { %p232_p5 = scmp.lt.s32.totalorder (!%p186_p3), %s1581_s16, 1  ;;  %s1417_s22 = smul.u32 (!%p186_p3), 192, %s1577_s15  ;;  %vm362_vm0 = vcmask (!%p186_p3), 1045504   ;;  %vm321_vm1 = vcmask (!%p186_p3), 1046528   ;;  %v949_v28 = vld [vmem:[%s2270_s1] sm:$0xff] (!%p186_p3)  ;;  %v950_v29 = vld [vmem:[%s2270_s1 + $0x8] sm:$0xff] (!%p186_p3) }
   0x9   : > { %s2283_s21 = smov (%p29_p4, %s2281_s21), 0  ;;  %189 = sbr.rel (%p186_p3) target bundleno = 611 (0x263), region = 28 }
   0xa   : > { %s1595_s28 = smov (!%p186_p3), 12   ;;  %s1596_s29 = smov (!%p186_p3), 8   ;;  %v1492_v30 = vpack.c.bf16 (!%p186_p3), %v950_v29, %v949_v28  ;;  %v951_v33 = vld [vmem:[%s2270_s1 + $0x10] sm:$0xff] (!%p186_p3)  ;;  %v952_v34 = vld [vmem:[%s2270_s1 + $0x18] sm:$0xff] (!%p186_p3)  ;;  %v953_v38 = vld [vmem:[%s2270_s1 + $0x20] sm:$0xf] (!%p186_p3) }
   0xb   : > { %s1597_s30 = smov (!%p186_p3), 4   ;;  %s1598_s5 = smov (!%p186_p3), 16   ;;  %v1496_v36 = vpack.c.bf16 (!%p186_p3), %v952_v34, %v951_v33  ;;  %vm1003_vm2 = vcmask (!%p186_p3), 1043456   ;;  %vm813_vm3 = vcmask (!%p186_p3), 31744   ;;  %vm830_vm4 = vcmask (!%p186_p3), 64512  }
   0xc   : > { %s1599_s6 = smov (!%p186_p3), 20   ;;  %s1600_s11 = smov (!%p186_p3), 24   ;;  %1493 = vmatprep.subr.bf16.mxu0 (!%p186_p3), %v1492_v30  ;;  %1500 = vmatprep.subr.bf16.mxu1 (!%p186_p3), %v1492_v30  ;;  %vm847_vm5 = vcmask (!%p186_p3), 97280   ;;  %vm864_vm6 = vcmask (!%p186_p3), 130048   ;;  %vm881_vm7 = vcmask (!%p186_p3), 162816   ;;  %vm898_vm8 = vcmask (!%p186_p3), 195584  }
   0xd   : > { %1495 = vmatpush3.bf16.msra.mxu0 (!%p186_p3), %v1492_v30  ;;  %1503 = vmatpush3.bf16.msra.mxu1 (!%p186_p3), %v1492_v30  ;;  %vm915_vm9 = vcmask (!%p186_p3), 228352   ;;  %vm932_vm10 = vcmask (!%p186_p3), 261120   ;;  %vm954_vm11 = vcmask (!%p186_p3), 293888   ;;  %p250_p7 = scmp.lt.s32.totalorder (!%p186_p3), %s1577_s15, 1 }
   0xe   : > { %1497 = vmatprep.subr.bf16.mxu0 (!%p186_p3), %v1496_v36  ;;  %1501 = vmatprep.subr.bf16.mxu1 (!%p186_p3), %v1496_v36 }
  0x10   : > { %s2285_s16 = smov (!%p232_p5, %s1581_s16), 1 }
  0x11   : > { %s1506_s23 = smul.u32 432, %s2285_s16  ;;  %1499 = vmatpush3.bf16.msra.mxu0 %v1496_v36  ;;  %1504 = vmatpush3.bf16.msra.mxu1 %v1496_v36  ;;  %s1412_s9 = sshll.u32 %s2285_s16, 1 }
  0x12   : > { %1466 = vmatprep.subr.msk.mxu0 %vm1003_vm2, %v953_v38  ;;  %1502 = vmatprep.subr.msk.mxu1 %vm1003_vm2, %v953_v38 }
  0x13   : > { %s236_s26 = scalar_lea.vmem %s2269_s0, %s1506_s23  ;;  %s1601_s23 = smov 28  }
  0x14   : > { %s1667_s27 = scalar_lea.vmem %s236_s26, %s1417_s22  ;;  %s1602_s26 = smov 32  }
  0x15   : > { %v1670_v0 = vld [vmem:[%s1667_s27 + $0x20] sm:$0xff]  ;;  %v1673_v1 = vld [vmem:[%s1667_s27 + $0x18] sm:$0xff]  ;;  %v1683_v3 = vld [vmem:[%s1667_s27 + $0x8] sm:$0xff]  ;;  %1467 = vmatpush3.msk.msra.mxu0 %vm1003_vm2, %v953_v38  ;;  %1505 = vmatpush3.msk.msra.mxu1 %vm1003_vm2, %v953_v38 }
  0x16   : > { %v1676_v2 = vld [vmem:[%s1667_s27] sm:$0xff]  ;;  %527 = vrot.lane.b32.xlu1 %v1670_v0, %s1595_s28  ;;  %525 = vrot.lane.b32.xlu0 %v1673_v1, %s1595_s28  ;;  %v269_v6 = vld [vmem:[%s1667_s27 + $0x10] sm:$0x3]  ;;  %v364_v7 = vrot.slane %v1683_v3, 2  ;;  %v323_v8 = vrot.slane %v1683_v3, 1  ;;  %v327_v15 = vrot.slane %v1673_v1, 1 }
  0x17   : > { %v363_v4 = vrot.slane %v1676_v2, 2  ;;  %v322_v5 = vrot.slane %v1676_v2, 1  ;;  %v366_v9 = vrot.slane %v269_v6, 2  ;;  %v325_v10 = vrot.slane %v269_v6, 1  ;;  %v272_v17 = vld [vmem:[%s1667_s27 + $0x28] sm:$0x3] }
  0x18   : > { %v328_v16 = vrot.slane %v1670_v0, 1  ;;  %v368_v19 = vrot.slane %v1673_v1, 2  ;;  %v369_v20 = vrot.slane %v1670_v0, 2  ;;  %v330_v21 = vrot.slane %v272_v17, 1  ;;  %v1713_v25 = vld [vmem:[%s1667_s27 + $0x30] sm:$0xff]  ;;  %v1717_v27 = vld [vmem:[%s1667_s27 + $0x38] sm:$0xff] }
  0x19   : > { %v365_v11 = vsel %vm362_vm0, %v363_v4, %v364_v7  ;;  %v324_v12 = vsel %vm321_vm1, %v322_v5, %v323_v8  ;;  %v367_v13 = vsel %vm362_vm0, %v364_v7, %v366_v9  ;;  %v326_v14 = vsel %vm321_vm1, %v323_v8, %v325_v10  ;;  %v275_v37 = vld [vmem:[%s1667_s27 + $0x40] sm:$0x3]  ;;  %v1764_v46 = vld [vmem:[%s1667_s27 + $0x48] sm:$0xff]  ;;  %v1767_v47 = vld [vmem:[%s1667_s27 + $0x50] sm:$0xff] }
  0x1a   : > { %477 = vrot.lane.b32.xlu1 %v365_v11, %s1596_s29  ;;  %429 = vrot.lane.b32.xlu0 %v324_v12, %s1597_s30  ;;  %v329_v18 = vsel %vm321_vm1, %v327_v15, %v328_v16  ;;  %v370_v22 = vsel %vm362_vm0, %v368_v19, %v369_v20  ;;  %v331_v23 = vsel %vm321_vm1, %v328_v16, %v330_v21  ;;  %v371_v24 = vrot.slane %v272_v17, 2  ;;  %v278_v51 = vld [vmem:[%s1667_s27 + $0x58] sm:$0x3]  ;;  %v1799_v59 = vld [vmem:[%s1667_s27 + $0x60] sm:$0xff] }
  0x1b   : > { %v332_v31 = vrot.slane %v1713_v25, 1  ;;  %v333_v32 = vrot.slane %v1717_v27, 1  ;;  %v373_v39 = vrot.slane %v1713_v25, 2  ;;  %v374_v40 = vrot.slane %v1717_v27, 2  ;;  %v1802_v60 = vld [vmem:[%s1667_s27 + $0x68] sm:$0xff]  ;;  %v1839_v17 = vld [vmem:[%s1667_s27 + $0x80] sm:$0xff] }
  0x1c   : > { %v372_v26 = vsel %vm362_vm0, %v369_v20, %v371_v24  ;;  %v335_v41 = vrot.slane %v275_v37, 1  ;;  %v376_v44 = vrot.slane %v275_v37, 2  ;;  %v337_v48 = vrot.slane %v1764_v46, 1  ;;  %v281_v4 = vld [vmem:[%s1667_s27 + $0x70] sm:$0x3] }
  0x1d   : > { %v334_v35 = vsel %vm321_vm1, %v332_v31, %v333_v32  ;;  %v375_v42 = vsel %vm362_vm0, %v373_v39, %v374_v40  ;;  %v338_v49 = vrot.slane %v1767_v47, 1  ;;  %v378_v52 = vrot.slane %v1764_v46, 2 }
  0x1e   : > { %479 = vrot.lane.b32.xlu1 %v367_v13, %s1596_s29  ;;  %431 = vrot.lane.b32.xlu0 %v326_v14, %s1597_s30  ;;  %v336_v43 = vsel %vm321_vm1, %v333_v32, %v335_v41  ;;  %v377_v45 = vsel %vm362_vm0, %v374_v40, %v376_v44  ;;  %v379_v53 = vrot.slane %v1767_v47, 2  ;;  %v340_v54 = vrot.slane %v278_v51, 1  ;;  %v1836_v14 = vld [vmem:[%s1667_s27 + $0x78] sm:$0xff] }
  0x1f   : > { %v339_v50 = vsel %vm321_vm1, %v337_v48, %v338_v49  ;;  %v381_v57 = vrot.slane %v278_v51, 2  ;;  %v342_v61 = vrot.slane %v1799_v59, 1  ;;  %v343_v62 = vrot.slane %v1802_v60, 1 }
  0x20   : > { %v380_v55 = vsel %vm362_vm0, %v378_v52, %v379_v53  ;;  %v341_v56 = vsel %vm321_vm1, %v338_v49, %v340_v54  ;;  %v383_v5 = vrot.slane %v1799_v59, 2  ;;  %v384_v6 = vrot.slane %v1802_v60, 2  ;;  %v1886_v49 = vld [vmem:[%s1667_s27 + $0x90] sm:$0xff]  ;;  %v1894_v52 = vld [vmem:[%s1667_s27 + $0x98] sm:$0xff] }
  0x21   : > { %v382_v58 = vsel %vm362_vm0, %v379_v53, %v381_v57  ;;  %v344_v63 = vsel %vm321_vm1, %v342_v61, %v343_v62  ;;  %v345_v7 = vrot.slane %v281_v4, 1  ;;  %v386_v10 = vrot.slane %v281_v4, 2 }
  0x22   : > { %433 = vrot.lane.b32.xlu1 %v329_v18, %s1597_s30  ;;  %573 = vrot.lane.b32.xlu0 %v329_v18, %s1598_s5  ;;  %v385_v8 = vsel %vm362_vm0, %v383_v5, %v384_v6  ;;  %v347_v18 = vrot.slane %v1836_v14, 1  ;;  %v348_v19 = vrot.slane %v1839_v17, 1  ;;  %v388_v28 = vrot.slane %v1836_v14, 2 }
  0x23   : > { %v346_v9 = vsel %vm321_vm1, %v343_v62, %v345_v7  ;;  %v387_v11 = vsel %vm362_vm0, %v384_v6, %v386_v10  ;;  %v389_v29 = vrot.slane %v1839_v17, 2  ;;  %v352_v57 = vrot.slane %v1886_v49, 1 }
  0x25   : > { %v390_v33 = vsel %vm362_vm0, %v388_v28, %v389_v29 }
  0x26   : > { %621 = vrot.lane.b32.xlu1 %v370_v22, %s1599_s6  ;;  %575 = vrot.lane.b32.xlu0 %v331_v23, %s1598_s5 }
  0x2a   : > { %481 = vrot.lane.b32.xlu1 %v370_v22, %s1596_s29  ;;  %435 = vrot.lane.b32.xlu0 %v331_v23, %s1597_s30  ;;  %v349_v22 = vsel %vm321_vm1, %v347_v18, %v348_v19 }
  0x2e   : > { %669 = vrot.lane.b32.xlu1 %v1713_v25, %s1600_s11  ;;  %623 = vrot.lane.b32.xlu0 %v372_v26, %s1599_s6 }
  0x32   : > { %529 = vrot.lane.b32.xlu1 %v1713_v25, %s1595_s28  ;;  %483 = vrot.lane.b32.xlu0 %v372_v26, %s1596_s29  ;;  %v284_v26 = vld [vmem:[%s1667_s27 + $0x88] sm:$0x3] }
  0x33   : > { %v350_v30 = vrot.slane %v284_v26, 1  ;;  %v391_v37 = vrot.slane %v284_v26, 2 }
  0x35   : > { %v351_v34 = vsel %vm321_vm1, %v348_v19, %v350_v30  ;;  %v392_v40 = vsel %vm362_vm0, %v389_v29, %v391_v37 }
  0x36   : > { %717 = vrot.lane.b32.xlu1 %v334_v35, %s1601_s23  ;;  %671 = vrot.lane.b32.xlu0 %v1717_v27, %s1600_s11 }
  0x3a   : > { %577 = vrot.lane.b32.xlu1 %v334_v35, %s1598_s5  ;;  %531 = vrot.lane.b32.xlu0 %v1717_v27, %s1595_s28 }
  0x3e   : > { %765 = vrot.lane.b32.xlu1 %v375_v42, %s1602_s26  ;;  %719 = vrot.lane.b32.xlu0 %v336_v43, %s1601_s23 }
  0x42   : > { %579 = vrot.lane.b32.xlu1 %v336_v43, %s1598_s5  ;;  %437 = vrot.lane.b32.xlu0 %v334_v35, %s1597_s30 }
  0x46   : > { %767 = vrot.lane.b32.xlu1 %v377_v45, %s1602_s26  ;;  %625 = vrot.lane.b32.xlu0 %v375_v42, %s1599_s6 }
  0x4a   : > { %485 = vrot.lane.b32.xlu1 %v375_v42, %s1596_s29  ;;  %439 = vrot.lane.b32.xlu0 %v336_v43, %s1597_s30 }
  0x4e   : > { %673 = vrot.lane.b32.xlu1 %v1764_v46, %s1600_s11  ;;  %627 = vrot.lane.b32.xlu0 %v377_v45, %s1599_s6 }
  0x52   : > { %533 = vrot.lane.b32.xlu1 %v1764_v46, %s1595_s28  ;;  %487 = vrot.lane.b32.xlu0 %v377_v45, %s1596_s29 }
  0x56   : > { %721 = vrot.lane.b32.xlu1 %v339_v50, %s1601_s23  ;;  %675 = vrot.lane.b32.xlu0 %v1767_v47, %s1600_s11 }
  0x5a   : > { %581 = vrot.lane.b32.xlu1 %v339_v50, %s1598_s5  ;;  %535 = vrot.lane.b32.xlu0 %v1767_v47, %s1595_s28 }
  0x5e   : > { %769 = vrot.lane.b32.xlu1 %v380_v55, %s1602_s26  ;;  %723 = vrot.lane.b32.xlu0 %v341_v56, %s1601_s23 }
  0x62   : > { %583 = vrot.lane.b32.xlu1 %v341_v56, %s1598_s5  ;;  %441 = vrot.lane.b32.xlu0 %v339_v50, %s1597_s30 }
  0x66   : > { %771 = vrot.lane.b32.xlu1 %v382_v58, %s1602_s26  ;;  %629 = vrot.lane.b32.xlu0 %v380_v55, %s1599_s6 }
  0x6a   : > { %489 = vrot.lane.b32.xlu1 %v380_v55, %s1596_s29  ;;  %443 = vrot.lane.b32.xlu0 %v341_v56, %s1597_s30 }
  0x6e   : > { %677 = vrot.lane.b32.xlu1 %v1799_v59, %s1600_s11  ;;  %631 = vrot.lane.b32.xlu0 %v382_v58, %s1599_s6 }
  0x72   : > { %537 = vrot.lane.b32.xlu1 %v1799_v59, %s1595_s28  ;;  %491 = vrot.lane.b32.xlu0 %v382_v58, %s1596_s29  ;;  %v353_v58 = vrot.slane %v1894_v52, 1 }
  0x74   : > { %v354_v5 = vsel %vm321_vm1, %v352_v57, %v353_v58 }
  0x76   : > { %725 = vrot.lane.b32.xlu1 %v344_v63, %s1601_s23  ;;  %679 = vrot.lane.b32.xlu0 %v1802_v60, %s1600_s11 }
  0x7a   : > { %585 = vrot.lane.b32.xlu1 %v344_v63, %s1598_s5  ;;  %539 = vrot.lane.b32.xlu0 %v1802_v60, %s1595_s28 }
  0x7e   : > { %773 = vrot.lane.b32.xlu1 %v385_v8, %s1602_s26  ;;  %727 = vrot.lane.b32.xlu0 %v346_v9, %s1601_s23 }
  0x82   : > { %587 = vrot.lane.b32.xlu1 %v346_v9, %s1598_s5  ;;  %445 = vrot.lane.b32.xlu0 %v344_v63, %s1597_s30 }
  0x86   : > { %775 = vrot.lane.b32.xlu1 %v387_v11, %s1602_s26  ;;  %633 = vrot.lane.b32.xlu0 %v385_v8, %s1599_s6 }
  0x88   : > { %v1831_v12 = vpop.permute.xlu1 %527  ;;  %v526_v13 = vpop.permute.xlu0 %525 }
  0x8a   : > { %493 = vrot.lane.b32.xlu1 %v385_v8, %s1596_s29  ;;  %447 = vrot.lane.b32.xlu0 %v346_v9, %s1597_s30  ;;  %v287_v9 = vld [vmem:[%s1667_s27 + $0xa0] sm:$0x3] }
  0x8b   : > { %v396_v29 = vrot.slane %v287_v9, 2 }
  0x8c   : > { %v478_v15 = vpop.permute.xlu1 %477  ;;  %v430_v16 = vpop.permute.xlu0 %429 }
  0x8d   : > { %v814_v43 = vsel %vm813_vm3, %v1676_v2, %v430_v16  ;;  %v355_v16 = vrot.slane %v287_v9, 1 }
  0x8e   : > { %681 = vrot.lane.b32.xlu1 %v1836_v14, %s1600_s11  ;;  %635 = vrot.lane.b32.xlu0 %v387_v11, %s1599_s6  ;;  %v831_v48 = vsel %vm830_vm4, %v814_v43, %v478_v15  ;;  %v393_v15 = vrot.slane %v1886_v49, 2  ;;  %v1961_v43 = vld [vmem:[%s1667_s27 + $0xa8] sm:$0xff] }
  0x8f   : > { %v848_v2 = vsel %vm847_vm5, %v831_v48, %v526_v13 }
  0x90   : > { %v1846_v20 = vpop.permute.xlu1 %479  ;;  %v432_v21 = vpop.permute.xlu0 %431 }
  0x91   : > { %v815_v54 = vsel %vm813_vm3, %v1683_v3, %v432_v21 }
  0x92   : > { %541 = vrot.lane.b32.xlu1 %v1836_v14, %s1595_s28  ;;  %495 = vrot.lane.b32.xlu0 %v387_v11, %s1596_s29  ;;  %v832_v3 = vsel %vm830_vm4, %v815_v54, %v1846_v20 }
  0x93   : > { %v849_v6 = vsel %vm847_vm5, %v832_v3, %v1831_v12  ;;  %v394_v12 = vrot.slane %v1894_v52, 2 }
  0x94   : > { %v1852_v23 = vpop.permute.xlu1 %433  ;;  %v574_v24 = vpop.permute.xlu0 %573 }
  0x95   : > { %v865_v53 = vsel %vm864_vm6, %v848_v2, %v574_v24  ;;  %v356_v24 = vsel %vm321_vm1, %v353_v58, %v355_v16  ;;  %v1970_v2 = vld [vmem:[%s1667_s27 + $0xb0] sm:$0xff] }
  0x96   : > { %729 = vrot.lane.b32.xlu1 %v349_v22, %s1601_s23  ;;  %683 = vrot.lane.b32.xlu0 %v1839_v17, %s1600_s11 }
  0x98   : > { %v622_v31 = vpop.permute.xlu1 %621  ;;  %v576_v32 = vpop.permute.xlu0 %575 }
  0x99   : > { %v882_v55 = vsel %vm881_vm7, %v865_v53, %v622_v31  ;;  %v866_v10 = vsel %vm864_vm6, %v849_v6, %v576_v32  ;;  %v397_v32 = vsel %vm362_vm0, %v394_v12, %v396_v29  ;;  %v358_v53 = vrot.slane %v1970_v2, 1 }
  0x9a   : > { %589 = vrot.lane.b32.xlu1 %v349_v22, %s1598_s5  ;;  %543 = vrot.lane.b32.xlu0 %v1839_v17, %s1595_s28 }
  0x9c   : > { %v1865_v35 = vpop.permute.xlu1 %481  ;;  %v1867_v36 = vpop.permute.xlu0 %435 }
  0x9d   : > { %v817_v57 = vsel %vm813_vm3, %v1670_v0, %v1867_v36  ;;  %v290_v0 = vld [vmem:[%s1667_s27 + $0xb8] sm:$0x3] }
  0x9e   : > { %777 = vrot.lane.b32.xlu1 %v390_v33, %s1602_s26  ;;  %731 = vrot.lane.b32.xlu0 %v351_v34, %s1601_s23  ;;  %v360_v6 = vrot.slane %v290_v0, 1 }
  0xa0   : > { %v670_v38 = vpop.permute.xlu1 %669  ;;  %v624_v39 = vpop.permute.xlu0 %623 }
  0xa1   : > { %v899_v56 = vsel %vm898_vm8, %v882_v55, %v670_v38  ;;  %v883_v11 = vsel %vm881_vm7, %v866_v10, %v624_v39  ;;  %v816_v39 = vsel %vm813_vm3, %v1673_v1, %v1852_v23 }
  0xa2   : > { %591 = vrot.lane.b32.xlu1 %v351_v34, %s1598_s5  ;;  %449 = vrot.lane.b32.xlu0 %v349_v22, %s1597_s30  ;;  %v395_v22 = vsel %vm362_vm0, %v393_v15, %v394_v12  ;;  %v361_v15 = vsel %vm321_vm1, %v358_v53, %v360_v6 }
  0xa4   : > { %v1874_v41 = vpop.permute.xlu1 %529  ;;  %v1876_v42 = vpop.permute.xlu0 %483 }
  0xa5   : > { %v834_v58 = vsel %vm830_vm4, %v817_v57, %v1876_v42 }
  0xa6   : > { %779 = vrot.lane.b32.xlu1 %v392_v40, %s1602_s26  ;;  %637 = vrot.lane.b32.xlu0 %v390_v33, %s1599_s6 }
  0xa8   : > { %v718_v44 = vpop.permute.xlu1 %717  ;;  %v672_v45 = vpop.permute.xlu0 %671 }
  0xa9   : > { %v916_v61 = vsel %vm915_vm9, %v899_v56, %v718_v44  ;;  %v900_v13 = vsel %vm898_vm8, %v883_v11, %v672_v45 }
  0xaa   : > { %497 = vrot.lane.b32.xlu1 %v390_v33, %s1596_s29  ;;  %451 = vrot.lane.b32.xlu0 %v351_v34, %s1597_s30 }
  0xac   : > { %v1889_v50 = vpop.permute.xlu1 %577  ;;  %v1891_v51 = vpop.permute.xlu0 %531 }
  0xae   : > { %685 = vrot.lane.b32.xlu1 %v1886_v49, %s1600_s11  ;;  %639 = vrot.lane.b32.xlu0 %v392_v40, %s1599_s6 }
  0xb0   : > { %v766_v62 = vpop.permute.xlu1 %765  ;;  %v720_v63 = vpop.permute.xlu0 %719 }
  0xb1   : > { %v933_v4 = vsel %vm932_vm10, %v916_v61, %v766_v62  ;;  %v917_v18 = vsel %vm915_vm9, %v900_v13, %v720_v63  ;;  %v851_v62 = vsel %vm847_vm5, %v834_v58, %v1891_v51  ;;  %v399_v51 = vrot.slane %v1970_v2, 2  ;;  %v293_v58 = vld [vmem:[%s1667_s27 + $0xd0] sm:$0x3] }
  0xb2   : > { %545 = vrot.lane.b32.xlu1 %v1886_v49, %s1595_s28  ;;  %499 = vrot.lane.b32.xlu0 %v392_v40, %s1596_s29  ;;  %v833_v40 = vsel %vm830_vm4, %v816_v39, %v1865_v35 }
  0xb3   : > { %1468 = vmatprep.mubr.msk.f32.mxu0 %vm954_vm11, %v933_v4  ;;  %v850_v44 = vsel %vm847_vm5, %v833_v40, %v1874_v41  ;;  %v357_v41 = vrot.slane %v1961_v43, 1 }
  0xb4   : > { %v1917_v7 = vpop.permute.xlu1 %579  ;;  %v1919_v8 = vpop.permute.xlu0 %437  ;;  %v867_v1 = vsel %vm864_vm6, %v850_v44, %v1889_v50  ;;  %v292_v44 = vld [vmem:[%s1667_s27 + $0xc8] sm:$0xff] }
  0xb5   : > { %v359_v61 = vsel %vm321_vm1, %v357_v41, %v358_v53  ;;  %v868_v36 = vsel %vm864_vm6, %v851_v62, %v1917_v7  ;;  %v412_v62 = vrot.slane %v292_v44, 2 }
  0xb6   : > { %733 = vrot.lane.b32.xlu1 %v354_v5, %s1601_s23  ;;  %687 = vrot.lane.b32.xlu0 %v1894_v52, %s1600_s11 }
  0xb8   : > { %v768_v19 = vpop.permute.xlu1 %767  ;;  %v626_v20 = vpop.permute.xlu0 %625 }
  0xb9   : > { %v934_v21 = vsel %vm932_vm10, %v917_v18, %v768_v19  ;;  %v884_v23 = vsel %vm881_vm7, %v867_v1, %v626_v20  ;;  %v401_v18 = vrot.slane %v290_v0, 2  ;;  %v409_v0 = vrot.slane %v293_v58, 1 }
  0xba   : > { %593 = vrot.lane.b32.xlu1 %v354_v5, %s1598_s5  ;;  %547 = vrot.lane.b32.xlu0 %v1894_v52, %s1595_s28 }
  0xbb   : > { %1469 = vmatmul.mubr.msk.f32.vlgmr.msra.gmra.mrb[0].mxu0 %vm954_vm11, %v934_v21  ;;  %v402_v21 = vsel %vm362_vm0, %v399_v51, %v401_v18  ;;  %v295_v18 = vld [vmem:[%s1667_s27 + $0xe0] sm:$0xff] }
  0xbc   : > { %v1938_v26 = vpop.permute.xlu1 %485  ;;  %v1940_v28 = vpop.permute.xlu0 %439 }
  0xbe   : > { %781 = vrot.lane.b32.xlu1 %v395_v22, %s1602_s26  ;;  %735 = vrot.lane.b32.xlu0 %v356_v24, %s1601_s23 }
  0xc0   : > { %v674_v30 = vpop.permute.xlu1 %673  ;;  %v628_v31 = vpop.permute.xlu0 %627 }
  0xc1   : > { %v901_v35 = vsel %vm898_vm8, %v884_v23, %v674_v30  ;;  %v885_v4 = vsel %vm881_vm7, %v868_v36, %v628_v31  ;;  %v818_v31 = vsel %vm813_vm3, %v1713_v25, %v1919_v8  ;;  %v407_v23 = vrot.slane %v292_v44, 1 }
  0xc2   : > { %595 = vrot.lane.b32.xlu1 %v356_v24, %s1598_s5  ;;  %453 = vrot.lane.b32.xlu0 %v354_v5, %s1597_s30  ;;  %v398_v5 = vrot.slane %v1961_v43, 2 }
  0xc4   : > { %v1947_v33 = vpop.permute.xlu1 %533  ;;  %v1949_v34 = vpop.permute.xlu0 %487  ;;  %v400_v13 = vsel %vm362_vm0, %v398_v5, %v399_v51  ;;  %v410_v5 = vsel %vm321_vm1, %v407_v23, %v409_v0 }
  0xc6   : > { %783 = vrot.lane.b32.xlu1 %v397_v32, %s1602_s26  ;;  %641 = vrot.lane.b32.xlu0 %v395_v22, %s1599_s6 }
  0xc8   : > { %v722_v37 = vpop.permute.xlu1 %721  ;;  %v676_v38 = vpop.permute.xlu0 %675 }
  0xc9   : > { %v918_v54 = vsel %vm915_vm9, %v901_v35, %v722_v37  ;;  %v902_v42 = vsel %vm898_vm8, %v885_v4, %v676_v38  ;;  %v291_v37 = vld [vmem:[%s1667_s27 + $0xc0] sm:$0xff] }
  0xca   : > { %501 = vrot.lane.b32.xlu1 %v395_v22, %s1596_s29  ;;  %455 = vrot.lane.b32.xlu0 %v356_v24, %s1597_s30 }
  0xcc   : > { %v1965_v45 = vpop.permute.xlu1 %581  ;;  %v1967_v48 = vpop.permute.xlu0 %535 }
  0xce   : > { %689 = vrot.lane.b32.xlu1 %v1961_v43, %s1600_s11  ;;  %643 = vrot.lane.b32.xlu0 %v397_v32, %s1599_s6 }
  0xd0   : > { %v770_v55 = vpop.permute.xlu1 %769  ;;  %v724_v56 = vpop.permute.xlu0 %723 }
  0xd1   : > { %v935_v50 = vsel %vm932_vm10, %v918_v54, %v770_v55  ;;  %v919_v9 = vsel %vm915_vm9, %v902_v42, %v724_v56 }
  0xd2   : > { %549 = vrot.lane.b32.xlu1 %v1961_v43, %s1595_s28  ;;  %503 = vrot.lane.b32.xlu0 %v397_v32, %s1596_s29  ;;  %v835_v32 = vsel %vm830_vm4, %v818_v31, %v1938_v26  ;;  %v406_v26 = vrot.slane %v291_v37, 1 }
  0xd3   : > { %1471 = vmatprep.mubr.msk.f32.mxu0 %vm954_vm11, %v935_v50  ;;  %v852_v38 = vsel %vm847_vm5, %v835_v32, %v1947_v33 }
  0xd4   : > { %v1995_v63 = vpop.permute.xlu1 %583  ;;  %v1997_v3 = vpop.permute.xlu0 %441  ;;  %v869_v1 = vsel %vm864_vm6, %v852_v38, %v1965_v45  ;;  %v819_v45 = vsel %vm813_vm3, %v1717_v27, %v1940_v28  ;;  %v408_v55 = vsel %vm321_vm1, %v406_v26, %v407_v23  ;;  %v425_v38 = vrot.slane %v295_v18, 2 }
  0xd5   : > { %v836_v54 = vsel %vm830_vm4, %v819_v45, %v1949_v34 }
  0xd6   : > { %737 = vrot.lane.b32.xlu1 %v359_v61, %s1601_s23  ;;  %691 = vrot.lane.b32.xlu0 %v1970_v2, %s1600_s11  ;;  %v853_v56 = vsel %vm847_vm5, %v836_v54, %v1967_v48 }
  0xd7   : > { %v870_v27 = vsel %vm864_vm6, %v853_v56, %v1995_v63 }
  0xd8   : > { %v772_v10 = vpop.permute.xlu1 %771  ;;  %v630_v11 = vpop.permute.xlu0 %629 }
  0xd9   : > { %v936_v7 = vsel %vm932_vm10, %v919_v9, %v772_v10  ;;  %v886_v25 = vsel %vm881_vm7, %v869_v1, %v630_v11  ;;  %v414_v9 = vrot.slane %v293_v58, 2 }
  0xda   : > { %597 = vrot.lane.b32.xlu1 %v359_v61, %s1598_s5  ;;  %551 = vrot.lane.b32.xlu0 %v1970_v2, %s1595_s28 }
  0xdb   : > { %1472 = vmatmul.mubr.msk.f32.gmra.mrb[2].mxu0 %vm954_vm11, %v936_v7  ;;  %v415_v7 = vsel %vm362_vm0, %v412_v62, %v414_v9 }
  0xdc   : > { %v2017_v12 = vpop.permute.xlu1 %489  ;;  %v2019_v16 = vpop.permute.xlu0 %443 }
  0xde   : > { %785 = vrot.lane.b32.xlu1 %v400_v13, %s1602_s26  ;;  %739 = vrot.lane.b32.xlu0 %v361_v15, %s1601_s23 }
  0xe0   : > { %v678_v19 = vpop.permute.xlu1 %677  ;;  %v632_v20 = vpop.permute.xlu0 %631 }
  0xe1   : > { %v903_v8 = vsel %vm898_vm8, %v886_v25, %v678_v19  ;;  %v887_v28 = vsel %vm881_vm7, %v870_v27, %v632_v20  ;;  %v294_v19 = vld [vmem:[%s1667_s27 + $0xd8] sm:$0xff]  ;;  %v296_v20 = vld [vmem:[%s1667_s27 + $0xe8] sm:$0x3]  ;;  %s1408_s27 = sshll.u32 %s1577_s15, 3  ;;  %s2289_s15 = smov (!%p250_p7, %s1577_s15), 1 }
  0xe2   : > { %599 = vrot.lane.b32.xlu1 %v361_v15, %s1598_s5  ;;  %457 = vrot.lane.b32.xlu0 %v359_v61, %s1597_s30  ;;  %v411_v61 = vrot.slane %v291_v37, 2  ;;  %v427_v26 = vrot.slane %v296_v20, 2  ;;  %p240_p6 = scmp.lt.s32.totalorder %s1408_s27, 15  ;;  %s253_s10 = sadd.s32 %s1412_s9, %s2289_s15 }
  0xe4   : > { %v2026_v22 = vpop.permute.xlu1 %537  ;;  %v2028_v24 = vpop.permute.xlu0 %491  ;;  %v413_v63 = vsel %vm362_vm0, %v411_v61, %v412_v62  ;;  %s2287_s27 = smov (!%p240_p6, %s1408_s27), 15 }
  0xe6   : > { %787 = vrot.lane.b32.xlu1 %v402_v21, %s1602_s26  ;;  %645 = vrot.lane.b32.xlu0 %v400_v13, %s1599_s6 }
  0xe8   : > { %v726_v29 = vpop.permute.xlu1 %725  ;;  %v680_v30 = vpop.permute.xlu0 %679 }
  0xe9   : > { %v920_v33 = vsel %vm915_vm9, %v903_v8, %v726_v29  ;;  %v904_v34 = vsel %vm898_vm8, %v887_v28, %v680_v30  ;;  %v419_v29 = vrot.slane %v294_v19, 1  ;;  %v422_v30 = vrot.slane %v296_v20, 1 }
  0xea   : > { %505 = vrot.lane.b32.xlu1 %v400_v13, %s1596_s29  ;;  %459 = vrot.lane.b32.xlu0 %v361_v15, %s1597_s30 }
  0xec   : > { %v2042_v39 = vpop.permute.xlu1 %585  ;;  %v2044_v40 = vpop.permute.xlu0 %539 }
  0xee   : > { %693 = vrot.lane.b32.xlu1 %v291_v37, %s1600_s11  ;;  %647 = vrot.lane.b32.xlu0 %v402_v21, %s1599_s6 }
  0xf0   : > { %v774_v35 = vpop.permute.xlu1 %773  ;;  %v728_v41 = vpop.permute.xlu0 %727 }
  0xf1   : > { %v937_v53 = vsel %vm932_vm10, %v920_v33, %v774_v35  ;;  %v921_v48 = vsel %vm915_vm9, %v904_v34, %v728_v41  ;;  %v428_v41 = vsel %vm362_vm0, %v425_v38, %v427_v26 }
  0xf2   : > { %553 = vrot.lane.b32.xlu1 %v291_v37, %s1595_s28  ;;  %507 = vrot.lane.b32.xlu0 %v402_v21, %s1596_s29  ;;  %v420_v21 = vrot.slane %v295_v18, 1  ;;  %v820_v37 = vsel %vm813_vm3, %v1764_v46, %v1997_v3  ;;  %s1410_s29 = sshll.u32 %s2285_s16, 5 }
  0xf3   : > { %1474 = vmatprep.mubr.msk.f32.mxu0 %vm954_vm11, %v937_v53  ;;  %v837_v1 = vsel %vm830_vm4, %v820_v37, %v2017_v12 }
  0xf4   : > { %v2066_v50 = vpop.permute.xlu1 %587  ;;  %v2068_v57 = vpop.permute.xlu0 %445  ;;  %v423_v25 = vsel %vm321_vm1, %v420_v21, %v422_v30  ;;  %v421_v8 = vsel %vm321_vm1, %v419_v29, %v420_v21  ;;  %v854_v23 = vsel %vm847_vm5, %v837_v1, %v2026_v22 }
  0xf5   : > { %v871_v46 = vsel %vm864_vm6, %v854_v23, %v2042_v39  ;;  %v821_v39 = vsel %vm813_vm3, %v1767_v47, %v2019_v16  ;;  %v822_v9 = vsel %vm813_vm3, %v1799_v59, %v2068_v57 }
  0xf6   : > { %741 = vrot.lane.b32.xlu1 %v408_v55, %s1601_s23  ;;  %695 = vrot.lane.b32.xlu0 %v292_v44, %s1600_s11  ;;  %v838_v56 = vsel %vm830_vm4, %v821_v39, %v2028_v24 }
  0xf7   : > { %v855_v58 = vsel %vm847_vm5, %v838_v56, %v2044_v40 }
  0xf8   : > { %v776_v36 = vpop.permute.xlu1 %775  ;;  %v634_v4 = vpop.permute.xlu0 %633  ;;  %v872_v34 = vsel %vm864_vm6, %v855_v58, %v2066_v50 }
  0xf9   : > { %v938_v42 = vsel %vm932_vm10, %v921_v48, %v776_v36  ;;  %v888_v3 = vsel %vm881_vm7, %v871_v46, %v634_v4 }
  0xfa   : > { %601 = vrot.lane.b32.xlu1 %v408_v55, %s1598_s5  ;;  %555 = vrot.lane.b32.xlu0 %v292_v44, %s1595_s28  ;;  %v424_v44 = vrot.slane %v294_v19, 2  ;;  %s1409_s28 = sshll.u32 %s2287_s27, 1 }
  0xfb   : > { %1475 = vmatmul.mubr.msk.f32.gmra.mrb[4].mxu0 %vm954_vm11, %v938_v42  ;;  %s244_s30 = sadd.s32 %s1410_s29, %s1409_s28 }
  0xfc   : > { %v2084_v51 = vpop.permute.xlu1 %493  ;;  %v2086_v6 = vpop.permute.xlu0 %447  ;;  %v426_v53 = vsel %vm362_vm0, %v424_v44, %v425_v38 }
  0xfd   : > { %v823_v59 = vsel %vm813_vm3, %v1802_v60, %v2086_v6 }
  0xfe   : > { %789 = vrot.lane.b32.xlu1 %v413_v63, %s1602_s26  ;;  %743 = vrot.lane.b32.xlu0 %v410_v5, %s1601_s23 }
 0x100   : > { %v682_v10 = vpop.permute.xlu1 %681  ;;  %v636_v11 = vpop.permute.xlu0 %635 }
 0x101   : > { %v905_v12 = vsel %vm898_vm8, %v888_v3, %v682_v10  ;;  %v889_v61 = vsel %vm881_vm7, %v872_v34, %v636_v11  ;;  %v839_v10 = vsel %vm830_vm4, %v822_v9, %v2084_v51 }
 0x102   : > { %649 = vrot.lane.b32.xlu1 %v413_v63, %s1599_s6  ;;  %603 = vrot.lane.b32.xlu0 %v410_v5, %s1598_s5  ;;  %s1411_s5 = sshll.u32 %s244_s30, 3 }
 0x103   : > { %s2227_s8 = scalar_lea.vmem %s2271_s2, %s1411_s5 }
 0x104   : > { %v542_v13 = vpop.permute.xlu1 %541  ;;  %v2093_v15 = vpop.permute.xlu0 %495 }
 0x105   : > { %v856_v11 = vsel %vm847_vm5, %v839_v10, %v542_v13  ;;  %v840_v57 = vsel %vm830_vm4, %v823_v59, %v2093_v15 }
 0x106   : > { %651 = vrot.lane.b32.xlu1 %v415_v7, %s1599_s6  ;;  %791 = vrot.lane.b32.xlu0 %v415_v7, %s1602_s26 }
 0x108   : > { %v730_v31 = vpop.permute.xlu1 %729  ;;  %v684_v32 = vpop.permute.xlu0 %683 }
 0x109   : > { %v922_v45 = vsel %vm915_vm9, %v905_v12, %v730_v31  ;;  %v906_v47 = vsel %vm898_vm8, %v889_v61, %v684_v32 }
 0x10a   : > { %699 = vrot.lane.b32.xlu1 %v295_v18, %s1600_s11  ;;  %697 = vrot.lane.b32.xlu0 %v294_v19, %s1600_s11  ;;  %s1413_s11 = sshll.u32 %s253_s10, 3 }
 0x10b   : > { %s255_s14 = scalar_lea.vmem %s2272_s3, %s1413_s11  ;;  %s263_s24 = scalar_lea.vmem %s2273_s4, %s1413_s11 }
 0x10c   : > { %v590_v33 = vpop.permute.xlu1 %589  ;;  %v544_v35 = vpop.permute.xlu0 %543 }
 0x10d   : > { %v873_v19 = vsel %vm864_vm6, %v856_v11, %v590_v33  ;;  %v857_v51 = vsel %vm847_vm5, %v840_v57, %v544_v35 }
 0x10e   : > { %747 = vrot.lane.b32.xlu1 %v423_v25, %s1601_s23  ;;  %745 = vrot.lane.b32.xlu0 %v421_v8, %s1601_s23 }
 0x110   : > { %v778_v22 = vpop.permute.xlu1 %777  ;;  %v732_v54 = vpop.permute.xlu0 %731 }
 0x111   : > { %v939_v55 = vsel %vm932_vm10, %v922_v45, %v778_v22  ;;  %v923_v16 = vsel %vm915_vm9, %v906_v47, %v732_v54 }
 0x112   : > { %795 = vrot.lane.b32.xlu1 %v428_v41, %s1602_s26  ;;  %793 = vrot.lane.b32.xlu0 %v426_v53, %s1602_s26 }
 0x113   : > { %1477 = vmatprep.mubr.msk.f32.mxu0 %vm954_vm11, %v939_v55 }
 0x114   : > { %v592_v27 = vpop.permute.xlu1 %591  ;;  %v450_v28 = vpop.permute.xlu0 %449 }
 0x115   : > { %v874_v38 = vsel %vm864_vm6, %v857_v51, %v592_v27  ;;  %v824_v41 = vsel %vm813_vm3, %v1836_v14, %v450_v28 }
 0x118   : > { %v780_v62 = vpop.permute.xlu1 %779  ;;  %v638_v0 = vpop.permute.xlu0 %637 }
 0x119   : > { %v940_v24 = vsel %vm932_vm10, %v923_v16, %v780_v62  ;;  %v890_v20 = vsel %vm881_vm7, %v873_v19, %v638_v0 }
 0x11a   : > { %1478 = vmatmul.mubr.msk.f32.gmra.mrb[6].mxu0 %vm954_vm11, %v940_v24 }
 0x11c   : > { %v498_v48 = vpop.permute.xlu1 %497  ;;  %v452_v36 = vpop.permute.xlu0 %451 }
 0x11d   : > { %v841_v53 = vsel %vm830_vm4, %v824_v41, %v498_v48  ;;  %v825_v14 = vsel %vm813_vm3, %v1839_v17, %v452_v36 }
 0x120   : > { %v686_v40 = vpop.permute.xlu1 %685  ;;  %v640_v4 = vpop.permute.xlu0 %639 }
 0x121   : > { %v907_v21 = vsel %vm898_vm8, %v890_v20, %v686_v40  ;;  %v891_v44 = vsel %vm881_vm7, %v874_v38, %v640_v4 }
 0x124   : > { %v546_v42 = vpop.permute.xlu1 %545  ;;  %v500_v63 = vpop.permute.xlu0 %499 }
 0x125   : > { %v858_v45 = vsel %vm847_vm5, %v841_v53, %v546_v42  ;;  %v842_v28 = vsel %vm830_vm4, %v825_v14, %v500_v63 }
 0x128   : > { %v734_v5 = vpop.permute.xlu1 %733  ;;  %v688_v50 = vpop.permute.xlu0 %687 }
 0x129   : > { %v924_v29 = vsel %vm915_vm9, %v907_v21, %v734_v5  ;;  %v908_v1 = vsel %vm898_vm8, %v891_v44, %v688_v50 }
 0x12c   : > { %v594_v7 = vpop.permute.xlu1 %593  ;;  %v548_v18 = vpop.permute.xlu0 %547 }
 0x12d   : > { %v875_v55 = vsel %vm864_vm6, %v858_v45, %v594_v7  ;;  %v859_v47 = vsel %vm847_vm5, %v842_v28, %v548_v18 }
 0x130   : > { %v782_v30 = vpop.permute.xlu1 %781  ;;  %v736_v31 = vpop.permute.xlu0 %735 }
 0x131   : > { %v941_v32 = vsel %vm932_vm10, %v924_v29, %v782_v30  ;;  %v925_v25 = vsel %vm915_vm9, %v908_v1, %v736_v31 }
 0x132   : > { %1480 = vmatprep.mubr.msk.f32.mxu1 %vm954_vm11, %v941_v32 }
 0x134   : > { %v596_v13 = vpop.permute.xlu1 %595  ;;  %v454_v37 = vpop.permute.xlu0 %453 }
 0x135   : > { %v876_v0 = vsel %vm864_vm6, %v859_v47, %v596_v13  ;;  %v826_v18 = vsel %vm813_vm3, %v1886_v49, %v454_v37 }
 0x138   : > { %v784_v8 = vpop.permute.xlu1 %783  ;;  %v642_v26 = vpop.permute.xlu0 %641 }
 0x139   : > { %v942_v60 = vsel %vm932_vm10, %v925_v25, %v784_v8  ;;  %v892_v39 = vsel %vm881_vm7, %v875_v55, %v642_v26 }
 0x13a   : > { %1481 = vmatmul.mubr.msk.f32.vlgmr.msra.gmra.mrb[0].mxu1 %vm954_vm11, %v942_v60 }
 0x13c   : > { %v502_v6 = vpop.permute.xlu1 %501  ;;  %v456_v15 = vpop.permute.xlu0 %455 }
 0x13d   : > { %v843_v19 = vsel %vm830_vm4, %v826_v18, %v502_v6  ;;  %v827_v49 = vsel %vm813_vm3, %v1894_v52, %v456_v15 }
 0x140   : > { %v690_v23 = vpop.permute.xlu1 %689  ;;  %v644_v33 = vpop.permute.xlu0 %643 }
 0x141   : > { %v909_v56 = vsel %vm898_vm8, %v892_v39, %v690_v23  ;;  %v893_v24 = vsel %vm881_vm7, %v876_v0, %v644_v33 }
 0x144   : > { %v550_v35 = vpop.permute.xlu1 %549  ;;  %v504_v46 = vpop.permute.xlu0 %503 }
 0x145   : > { %v860_v20 = vsel %vm847_vm5, %v843_v19, %v550_v35  ;;  %v844_v37 = vsel %vm830_vm4, %v827_v49, %v504_v46 }
 0x148   : > { %v738_v3 = vpop.permute.xlu1 %737  ;;  %v692_v12 = vpop.permute.xlu0 %691 }
 0x149   : > { %v926_v58 = vsel %vm915_vm9, %v909_v56, %v738_v3  ;;  %v910_v48 = vsel %vm898_vm8, %v893_v24, %v692_v12 }
 0x14c   : > { %v598_v22 = vpop.permute.xlu1 %597  ;;  %v552_v54 = vpop.permute.xlu0 %551 }
 0x14d   : > { %v877_v30 = vsel %vm864_vm6, %v860_v20, %v598_v22  ;;  %v861_v38 = vsel %vm847_vm5, %v844_v37, %v552_v54 }
 0x150   : > { %v786_v27 = vpop.permute.xlu1 %785  ;;  %v740_v34 = vpop.permute.xlu0 %739 }
 0x151   : > { %v943_v61 = vsel %vm932_vm10, %v926_v58, %v786_v27  ;;  %v927_v40 = vsel %vm915_vm9, %v910_v48, %v740_v34 }
 0x152   : > { %1483 = vmatprep.mubr.msk.f32.mxu1 %vm954_vm11, %v943_v61 }
 0x154   : > { %v600_v16 = vpop.permute.xlu1 %599  ;;  %v458_v62 = vpop.permute.xlu0 %457 }
 0x155   : > { %v878_v25 = vsel %vm864_vm6, %v861_v38, %v600_v16  ;;  %v828_v35 = vsel %vm813_vm3, %v1961_v43, %v458_v62 }
 0x158   : > { %v788_v4 = vpop.permute.xlu1 %787  ;;  %v646_v42 = vpop.permute.xlu0 %645 }
 0x159   : > { %v944_v17 = vsel %vm932_vm10, %v927_v40, %v788_v4  ;;  %v894_v31 = vsel %vm881_vm7, %v877_v30, %v646_v42 }
 0x15a   : > { %1484 = vmatmul.mubr.msk.f32.gmra.mrb[2].mxu1 %vm954_vm11, %v944_v17 }
 0x15c   : > { %v506_v36 = vpop.permute.xlu1 %505  ;;  %v460_v63 = vpop.permute.xlu0 %459 }
 0x15d   : > { %v829_v46 = vsel %vm813_vm3, %v1970_v2, %v460_v63  ;;  %v845_v3 = vsel %vm830_vm4, %v828_v35, %v506_v36 }
 0x160   : > { %v694_v5 = vpop.permute.xlu1 %693  ;;  %v648_v50 = vpop.permute.xlu0 %647 }
 0x161   : > { %v911_v32 = vsel %vm898_vm8, %v894_v31, %v694_v5  ;;  %v895_v8 = vsel %vm881_vm7, %v878_v25, %v648_v50 }
 0x164   : > { %v554_v9 = vpop.permute.xlu1 %553  ;;  %v508_v10 = vpop.permute.xlu0 %507 }
 0x165   : > { %v846_v12 = vsel %vm830_vm4, %v829_v46, %v508_v10  ;;  %v862_v41 = vsel %vm847_vm5, %v845_v3, %v554_v9 }
 0x168   : > { %v742_v11 = vpop.permute.xlu1 %741  ;;  %v696_v7 = vpop.permute.xlu0 %695 }
 0x169   : > { %v928_v59 = vsel %vm915_vm9, %v911_v32, %v742_v11  ;;  %v912_v26 = vsel %vm898_vm8, %v895_v8, %v696_v7 }
 0x16c   : > { %v602_v21 = vpop.permute.xlu1 %601  ;;  %v556_v29 = vpop.permute.xlu0 %555 }
 0x16d   : > { %v863_v53 = vsel %vm847_vm5, %v846_v12, %v556_v29  ;;  %v879_v54 = vsel %vm864_vm6, %v862_v41, %v602_v21 }
 0x170   : > { %v790_v57 = vpop.permute.xlu1 %789  ;;  %v744_v51 = vpop.permute.xlu0 %743 }
 0x171   : > { %v945_v13 = vsel %vm932_vm10, %v928_v59, %v790_v57  ;;  %v929_v60 = vsel %vm915_vm9, %v912_v26, %v744_v51 }
 0x172   : > { %1486 = vmatprep.mubr.msk.f32.mxu1 %vm954_vm11, %v945_v13 }
 0x174   : > { %v650_v44 = vpop.permute.xlu1 %649  ;;  %v604_v1 = vpop.permute.xlu0 %603 }
 0x175   : > { %v880_v55 = vsel %vm864_vm6, %v863_v53, %v604_v1  ;;  %v896_v43 = vsel %vm881_vm7, %v879_v54, %v650_v44 }
 0x178   : > { %v652_v6 = vpop.permute.xlu1 %651  ;;  %v792_v23 = vpop.permute.xlu0 %791 }
 0x179   : > { %v946_v52 = vsel %vm932_vm10, %v929_v60, %v792_v23  ;;  %v897_v39 = vsel %vm881_vm7, %v880_v55, %v652_v6 }
 0x17a   : > { %1487 = vmatmul.mubr.msk.f32.gmra.mrb[4].mxu1 %vm954_vm11, %v946_v52 }
 0x17c   : > { %v700_v15 = vpop.permute.xlu1 %699  ;;  %v698_v33 = vpop.permute.xlu0 %697 }
 0x17d   : > { %v914_v2 = vsel %vm898_vm8, %v897_v39, %v700_v15  ;;  %v913_v56 = vsel %vm898_vm8, %v896_v43, %v698_v33 }
 0x180   : > { %v748_v45 = vpop.permute.xlu1 %747  ;;  %v746_v22 = vpop.permute.xlu0 %745 }
 0x181   : > { %v931_v58 = vsel %vm915_vm9, %v914_v2, %v748_v45  ;;  %v930_v27 = vsel %vm915_vm9, %v913_v56, %v746_v22 }
 0x184   : > { %v796_v34 = vpop.permute.xlu1 %795  ;;  %v794_v61 = vpop.permute.xlu0 %793 }
 0x185   : > { %v948_v14 = vsel %vm932_vm10, %v931_v58, %v796_v34  ;;  %v947_v28 = vsel %vm932_vm10, %v930_v27, %v794_v61 }
 0x186   : > { %1489 = vmatprep.mubr.msk.f32.mxu1 %vm954_vm11, %v947_v28 }
 0x187   : > { %1490 = vmatmul.mubr.msk.f32.gmra.mrb[6].mxu1 %vm954_vm11, %v948_v14 }
 0x18e   : > { %v1470_v47 = vpop.f32.mrb[0].mxu0 }
 0x18f   : > { %1153 = vst [vmem:[%s2227_s8 + $0x8] sm:$0xff] %v1470_v47  ;;  %v1185_v16 = vmul.f32 %v1470_v47, %v1470_v47  ;;  %v1073_v62 = vpop.f32.mrb[1].mxu0 }
 0x190   : > { %1152 = vst [vmem:[%s2227_s8] sm:$0xff] %v1073_v62  ;;  %v1168_v0 = vadd.f32 %v1470_v47, %v1073_v62  ;;  %v1184_v24 = vmul.f32 %v1073_v62, %v1073_v62 }
 0x192   : > { %v1200_v48 = vadd.f32 %v1185_v16, %v1184_v24 }
 0x1ae   : > { %v1473_v40 = vpop.f32.mrb[2].mxu0 }
 0x1af   : > { %1155 = vst [vmem:[%s2227_s8 + $0x18] sm:$0xff] %v1473_v40  ;;  %v1083_v4 = vpop.f32.mrb[3].mxu0  ;;  %v1187_v36 = vmul.f32 %v1473_v40, %v1473_v40 }
 0x1b0   : > { %1154 = vst [vmem:[%s2227_s8 + $0x10] sm:$0xff] %v1083_v4  ;;  %v1169_v42 = vadd.f32 %v1168_v0, %v1083_v4  ;;  %v1186_v17 = vmul.f32 %v1083_v4, %v1083_v4 }
 0x1b2   : > { %v1201_v63 = vadd.f32 %v1200_v48, %v1186_v17  ;;  %v1170_v5 = vadd.f32 %v1473_v40, %v1169_v42 }
 0x1b4   : > { %v1202_v50 = vadd.f32 %v1201_v63, %v1187_v36 }
 0x1ce   : > { %v1476_v9 = vpop.f32.mrb[4].mxu0 }
 0x1cf   : > { %1157 = vst [vmem:[%s2227_s8 + $0x28] sm:$0xff] %v1476_v9  ;;  %v1093_v10 = vpop.f32.mrb[5].mxu0  ;;  %v1189_v18 = vmul.f32 %v1476_v9, %v1476_v9 }
 0x1d0   : > { %1156 = vst [vmem:[%s2227_s8 + $0x20] sm:$0xff] %v1093_v10  ;;  %v1171_v11 = vadd.f32 %v1170_v5, %v1093_v10  ;;  %v1188_v7 = vmul.f32 %v1093_v10, %v1093_v10 }
 0x1d2   : > { %v1203_v19 = vadd.f32 %v1202_v50, %v1188_v7  ;;  %v1172_v20 = vadd.f32 %v1476_v9, %v1171_v11 }
 0x1d4   : > { %v1204_v21 = vadd.f32 %v1203_v19, %v1189_v18 }
 0x1ed   : > { %v1479_v29 = vpop.f32.mrb[6].mxu0 }
 0x1ee   : > { %1159 = vst [vmem:[%s2227_s8 + $0x38] sm:$0xff] %v1479_v29  ;;  %v1103_v30 = vpop.f32.mrb[7].mxu0  ;;  %v1191_v59 = vmul.f32 %v1479_v29, %v1479_v29 }
 0x1ef   : > { %1158 = vst [vmem:[%s2227_s8 + $0x30] sm:$0xff] %v1103_v30  ;;  %v1173_v31 = vadd.f32 %v1172_v20, %v1103_v30  ;;  %v1190_v32 = vmul.f32 %v1103_v30, %v1103_v30 }
 0x1f1   : > { %v1174_v57 = vadd.f32 %v1479_v29, %v1173_v31  ;;  %v1205_v51 = vadd.f32 %v1204_v21, %v1190_v32 }
 0x1f3   : > { %v1206_v13 = vadd.f32 %v1205_v51, %v1191_v59 }
 0x20d   : > { %v1482_v49 = vpop.f32.mrb[0].mxu1 }
 0x20e   : > { %1161 = vst [vmem:[%s2227_s8 + $0x48] sm:$0xff] %v1482_v49  ;;  %v1113_v37 = vpop.f32.mrb[1].mxu1  ;;  %v1193_v1 = vmul.f32 %v1482_v49, %v1482_v49 }
 0x20f   : > { %1160 = vst [vmem:[%s2227_s8 + $0x40] sm:$0xff] %v1113_v37  ;;  %v1175_v38 = vadd.f32 %v1174_v57, %v1113_v37  ;;  %v1192_v44 = vmul.f32 %v1113_v37, %v1113_v37 }
 0x211   : > { %v1207_v25 = vadd.f32 %v1206_v13, %v1192_v44  ;;  %v1176_v8 = vadd.f32 %v1482_v49, %v1175_v38 }
 0x213   : > { %v1208_v26 = vadd.f32 %v1207_v25, %v1193_v1 }
 0x22d   : > { %v1485_v60 = vpop.f32.mrb[2].mxu1 }
 0x22e   : > { %1163 = vst [vmem:[%s2227_s8 + $0x58] sm:$0xff] %v1485_v60  ;;  %v1123_v6 = vpop.f32.mrb[3].mxu1  ;;  %v1195_v15 = vmul.f32 %v1485_v60, %v1485_v60 }
 0x22f   : > { %1162 = vst [vmem:[%s2227_s8 + $0x50] sm:$0xff] %v1123_v6  ;;  %v1177_v23 = vadd.f32 %v1176_v8, %v1123_v6  ;;  %v1194_v52 = vmul.f32 %v1123_v6, %v1123_v6 }
 0x231   : > { %v1209_v33 = vadd.f32 %v1208_v26, %v1194_v52  ;;  %v1178_v35 = vadd.f32 %v1485_v60, %v1177_v23 }
 0x233   : > { %v1210_v46 = vadd.f32 %v1209_v33, %v1195_v15 }
 0x24d   : > { %v1488_v3 = vpop.f32.mrb[4].mxu1 }
 0x24e   : > { %1165 = vst [vmem:[%s2227_s8 + $0x68] sm:$0xff] %v1488_v3  ;;  %v1133_v12 = vpop.f32.mrb[5].mxu1  ;;  %v1197_v45 = vmul.f32 %v1488_v3, %v1488_v3 }
 0x24f   : > { %1164 = vst [vmem:[%s2227_s8 + $0x60] sm:$0xff] %v1133_v12  ;;  %v1179_v41 = vadd.f32 %v1178_v35, %v1133_v12  ;;  %v1196_v53 = vmul.f32 %v1133_v12, %v1133_v12 }
 0x251   : > { %v1211_v22 = vadd.f32 %v1210_v46, %v1196_v53  ;;  %v1180_v54 = vadd.f32 %v1488_v3, %v1179_v41 }
 0x253   : > { %v1212_v55 = vadd.f32 %v1211_v22, %v1197_v45 }
 0x25a   : > { %v1491_v43 = vpop.f32.mrb[6].mxu1 }
 0x25b   : > { %1167 = vst [vmem:[%s2227_s8 + $0x78] sm:$0xff] %v1491_v43  ;;  %v1143_v39 = vpop.f32.mrb[7].mxu1  ;;  %v1199_v58 = vmul.f32 %v1491_v43, %v1491_v43 }
 0x25c   : > { %1166 = vst [vmem:[%s2227_s8 + $0x70] sm:$0xff] %v1143_v39  ;;  %v1181_v2 = vadd.f32 %v1180_v54, %v1143_v39  ;;  %v1198_v56 = vmul.f32 %v1143_v39, %v1143_v39 }
 0x25e   : > { %v1182_v27 = vadd.f32 %v1491_v43, %v1181_v2  ;;  %v1213_v34 = vadd.f32 %v1212_v55, %v1198_v56 }
 0x260   : > { %1183 = vst [vmem:[%s255_s14] sm:$0xff] %v1182_v27  ;;  %v1214_v61 = vadd.f32 %v1213_v34, %v1199_v58 }
 0x262   : > { %1215 = vst [vmem:[%s263_s24] sm:$0xff] %v1214_v61 }
 0x263 PF: > { %s15_s19 = sadd.s32 1, %s1593_s19   ;;  %s2274_s15 = smov %s1585_s17 }
 0x264   : > { %p12_p8 = scmp.ge.s32.totalorder %s15_s19, 6   ;;  %s2275_s16 = smov %s1589_s18 }
 0x265   : > { %s2276_s17 = smov %s2279_s20  ;;  %s2277_s18 = smov %s2283_s21 }
 0x266   :  { %14 = sbr.rel (!%p12_p8) target bundleno = 3 (0x3), region = 83 }

// kernel: unet_block_forward.4
= control target key start
LH: loop header
LB: loop body
LE: loop exit
PB: predicated region body
PF: predicated region fallthrough
CT: control target
= control target key end

     0   :  { %s3961_s21 = smov 0   ;;  %s3963_s22 = smov 0   ;;  %s4816_s0 = inlined_call_operand.vmem [shape: f32[2,16,16,128], index: 0, kind: input, shape index: {}]   ;;  %s4817_s1 = inlined_call_operand.vmem [shape: f32[1,128], index: 1, kind: input, shape index: {}]   ;;  %s4818_s2 = inlined_call_operand.vmem [shape: f32[1,128], index: 2, kind: input, shape index: {}]   ;;  %s4819_s3 = inlined_call_operand.vmem [shape: f32[9,128,128], index: 3, kind: input, shape index: {}]   ;;  %s4820_s4 = inlined_call_operand.vmem [shape: f32[2,16,16,128], index: 4, kind: output, shape index: {0}]   ;;  %s4821_s5 = inlined_call_operand.vmem [shape: f32[2,2,8,128], index: 5, kind: output, shape index: {1}]   ;;  %s4822_s6 = inlined_call_operand.vmem [shape: f32[2,2,8,128], index: 6, kind: output, shape index: {2}]  }
   0x1   :  { %s3965_s23 = smov 0   ;;  %s3967_s24 = smov 0  }
   0x2   :  { %s3969_s25 = smov 0  }
   0x3 LB: > { %s26_s26 = sadd.s32 1, %s3913_s23  ;;  %s29_s27 = sadd.s32 1, %s3917_s24  ;;  %s3921_s25 = sphi %s3969_s25, %s17_s25   ;;  %s3917_s24 = sphi %s3967_s24, %s4828_s24   ;;  %s3913_s23 = sphi %s3965_s23, %s4827_s23   ;;  %s3909_s22 = sphi %s3963_s22, %s4826_s22   ;;  %s3905_s21 = sphi %s3961_s21, %s4825_s21  }
   0x4   : > { %p27_p0 = scmp.ge.s32.totalorder %s26_s26, 2  ;;  %p2458_p1 = scmp.ge.s32.totalorder %s3921_s25, 1 }
   0x5   : > { %p235_p2 = scmp.lt.s32.totalorder %s3921_s25, 5 }
   0x6   : > { %s4830_s26 = smov (%p27_p0, %s26_s26), 0  ;;  %s4832_s27 = smov (!%p27_p0, %s29_s27), %s3917_s24 }
   0x7   : > { %p236_p3 = pnand %p2458_p1, %p235_p2  ;;  %p31_p4 = scmp.ge.s32.totalorder %s4832_s27, 2 }
   0x8   : > { %p286_p5 = scmp.lt.s32.totalorder (!%p236_p3), %s3909_s22, 1  ;;  %s3997_s28 = sshll.u32 (!%p236_p3), %s3905_s21, 3  ;;  %v3923_v0 = vmov (!%p236_p3), 0.0   ;;  %v4013_v1 = vld [vmem:[%s4817_s1] ss:$0 sm:$0xff] (!%p236_p3) }
   0x9   : > { %s4834_s27 = smov (%p31_p4, %s4832_s27), 0  ;;  %239 = sbr.rel (%p236_p3) target bundleno = 484 (0x1e4), region = 36 }
   0xa   : > { %4823 = sst [smem:[#allocation3_spill]] %s4834_s27  ;;  %321 = vst [vmem:[#allocation2 + $0xf] sm:$0x1] (!%p236_p3), %v3923_v0  ;;  %322 = vst [vmem:[#allocation2 + $0x3f] sm:$0x1] (!%p236_p3), %v3923_v0  ;;  %p294_p6 = scmp.lt.s32.totalorder (!%p236_p3), %s3997_s28, 15 }
   0xb   : > { %323 = vst [vmem:[#allocation2 + $0x6f] sm:$0x1] (!%p236_p3), %v3923_v0  ;;  %324 = vst [vmem:[#allocation2 + $0x9f] sm:$0x1] (!%p236_p3), %v3923_v0  ;;  %p304_p7 = scmp.lt.s32.totalorder (!%p236_p3), %s3905_s21, 1  ;;  %s2614_s17 = sshll.u32 (!%p236_p3), %s3905_s21, 7 }
   0xc   : > { %325 = vst [vmem:[#allocation2 + $0xcf] sm:$0x1] (!%p236_p3), %v3923_v0  ;;  %326 = vst [vmem:[#allocation2 + $0xff] sm:$0x1] (!%p236_p3), %v3923_v0  ;;  %v4024_v2 = vld [vmem:[%s4818_s2] ss:$0 sm:$0xff] (!%p236_p3) }
   0xd   : > { %327 = vst [vmem:[#allocation2 + $0x12f] sm:$0x1] (!%p236_p3), %v3923_v0  ;;  %328 = vst [vmem:[#allocation2 + $0x15f] sm:$0x1] (!%p236_p3), %v3923_v0  ;;  %p2473_p8 = scmp.ne.s32.totalorder (!%p236_p3), %s3905_s21, 0 }
   0xe   : > { %329 = vst [vmem:[#allocation2 + $0x18f] sm:$0x1] (!%p236_p3), %v3923_v0  ;;  %330 = vst [vmem:[#allocation2 + $0x1bf] sm:$0x1] (!%p236_p3), %v3923_v0 }
   0xf   : > { %331 = vst [vmem:[#allocation2 + $0x20] sm:$0x1] (!%p236_p3), %v3923_v0  ;;  %332 = vst [vmem:[#allocation2 + $0x50] sm:$0x1] (!%p236_p3), %v3923_v0 }
  0x10   : > { %333 = vst [vmem:[#allocation2 + $0x80] sm:$0x1] %v3923_v0  ;;  %334 = vst [vmem:[#allocation2 + $0xb0] sm:$0x1] %v3923_v0  ;;  %s4836_s22 = smov (!%p286_p5, %s3909_s22), 1 }
  0x11   : > { %335 = vst [vmem:[#allocation2 + $0xe0] sm:$0x1] %v3923_v0  ;;  %336 = vst [vmem:[#allocation2 + $0x110] sm:$0x1] %v3923_v0  ;;  %s295_s29 = scalar_select %p294_p6, %s3997_s28, 15 }
  0x12   : > { %337 = vst [vmem:[#allocation2 + $0x140] sm:$0x1] %v3923_v0  ;;  %338 = vst [vmem:[#allocation2 + $0x170] sm:$0x1] %v3923_v0  ;;  %s2613_s30 = sshll.u32 %s4836_s22, 8  ;;  %s2463_s7 = sshll.u32 %s4836_s22, 5 }
  0x13   : > { %339 = vst [vmem:[#allocation2 + $0x1a0] sm:$0x1] %v3923_v0  ;;  %340 = vst [vmem:[#allocation2 + $0x1d0] sm:$0x1] %v3923_v0  ;;  %s4008_s10 = scalar_lea.vmem %s4816_s0, %s2613_s30  ;;  %s2462_s11 = sshll.u32 %s295_s29, 1 }
  0x14   : > { %s298_s12 = sadd.s32 %s2463_s7, %s2462_s11  ;;  %s2465_s13 = sshll.u32 %s4836_s22, 1 }
  0x15   : > { %s2464_s14 = sshll.u32 %s298_s12, 3  ;;  %s4027_s29 = scalar_lea.vmem %s4008_s10, %s2614_s17 }
  0x16   : > { %s4019_s20 = scalar_lea.vmem %s4820_s4, %s2464_s14  ;;  %v343_v3 = vld [vmem:[%s4027_s29] sm:$0xff]  ;;  %v344_v4 = vld [vmem:[%s4027_s29 + $0x8] sm:$0xff]  ;;  %v345_v5 = vld [vmem:[%s4027_s29 + $0x10] sm:$0xff] }
  0x17   : > { %s305_s22 = scalar_select %p304_p7, %s3905_s21, 1  ;;  %v365_v6 = vmul.f32 %v4013_v1, %v343_v3  ;;  %v366_v7 = vmul.f32 %v4013_v1, %v344_v4  ;;  %v367_v8 = vmul.f32 %v4013_v1, %v345_v5  ;;  %v346_v9 = vld [vmem:[%s4027_s29 + $0x18] sm:$0xff]  ;;  %v347_v10 = vld [vmem:[%s4027_s29 + $0x20] sm:$0xff]  ;;  %v348_v11 = vld [vmem:[%s4027_s29 + $0x28] sm:$0xff] }
  0x18   : > { %v368_v12 = vmul.f32 %v4013_v1, %v346_v9  ;;  %v369_v13 = vmul.f32 %v4013_v1, %v347_v10  ;;  %v370_v14 = vmul.f32 %v4013_v1, %v348_v11  ;;  %v349_v15 = vld [vmem:[%s4027_s29 + $0x30] sm:$0xff]  ;;  %v350_v16 = vld [vmem:[%s4027_s29 + $0x38] sm:$0xff]  ;;  %v351_v25 = vld [vmem:[%s4027_s29 + $0x40] sm:$0xff]  ;;  %v3924_v5 = vmov (!%p2473_p8), 0.0  }
  0x19   : > { %s307_s27 = sadd.s32 %s2465_s13, %s305_s22  ;;  %v387_v17 = vadd.f32 %v4024_v2, %v365_v6  ;;  %v388_v18 = vadd.f32 %v4024_v2, %v366_v7  ;;  %v389_v19 = vadd.f32 %v4024_v2, %v367_v8  ;;  %v371_v20 = vmul.f32 %v4013_v1, %v349_v15  ;;  %v352_v26 = vld [vmem:[%s4027_s29 + $0x48] sm:$0xff]  ;;  %v353_v27 = vld [vmem:[%s4027_s29 + $0x50] sm:$0xff]  ;;  %v354_v32 = vld [vmem:[%s4027_s29 + $0x58] sm:$0xff]  ;;  %440 = vst [vmem:[#allocation2 + $0x10] sm:$0xff] (!%p2473_p8), %v3924_v5 }
  0x1a   : > { %s2466_s30 = sshll.u32 %s307_s27, 3  ;;  %v390_v21 = vadd.f32 %v4024_v2, %v368_v12  ;;  %v391_v22 = vadd.f32 %v4024_v2, %v369_v13  ;;  %v392_v23 = vadd.f32 %v4024_v2, %v370_v14  ;;  %v372_v24 = vmul.f32 %v4013_v1, %v350_v16  ;;  %v355_v33 = vld [vmem:[%s4027_s29 + $0x60] sm:$0xff]  ;;  %v356_v34 = vld [vmem:[%s4027_s29 + $0x68] sm:$0xff]  ;;  %v357_v39 = vld [vmem:[%s4027_s29 + $0x70] sm:$0xff]  ;;  %441 = vst [vmem:[#allocation2 + $0x18] sm:$0xff] (!%p2473_p8), %v3924_v5 }
  0x1b   : > { %s4053_s11 = scalar_lea.vmem %s4821_s5, %s2466_s30  ;;  %s4058_s14 = scalar_lea.vmem %s4822_s6, %s2466_s30  ;;  %v403_v28 = vmax.f32 %v387_v17, 0.0  ;;  %v404_v29 = vmax.f32 %v388_v18, 0.0  ;;  %v405_v30 = vmax.f32 %v389_v19, 0.0  ;;  %v393_v31 = vadd.f32 %v4024_v2, %v371_v20  ;;  %v358_v44 = vld [vmem:[%s4027_s29 + $0x78] sm:$0xff] }
  0x1c   : > { %v406_v35 = vmax.f32 %v390_v21, 0.0  ;;  %v407_v36 = vmax.f32 %v391_v22, 0.0  ;;  %v408_v37 = vmax.f32 %v392_v23, 0.0  ;;  %v394_v38 = vadd.f32 %v4024_v2, %v372_v24 }
  0x1d   : > { %420 = vst [vmem:[#allocation2 + $0x40] sm:$0xff] %v403_v28  ;;  %421 = vst [vmem:[#allocation2 + $0x48] sm:$0xff] %v404_v29  ;;  %v409_v40 = vmax.f32 %v393_v31, 0.0  ;;  %v373_v41 = vmul.f32 %v4013_v1, %v351_v25  ;;  %v374_v42 = vmul.f32 %v4013_v1, %v352_v26  ;;  %v375_v43 = vmul.f32 %v4013_v1, %v353_v27 }
  0x1e   : > { %422 = vst [vmem:[#allocation2 + $0x70] sm:$0xff] %v405_v30  ;;  %423 = vst [vmem:[#allocation2 + $0x78] sm:$0xff] %v406_v35  ;;  %v410_v45 = vmax.f32 %v394_v38, 0.0  ;;  %v376_v46 = vmul.f32 %v4013_v1, %v354_v32  ;;  %v377_v47 = vmul.f32 %v4013_v1, %v355_v33  ;;  %v378_v48 = vmul.f32 %v4013_v1, %v356_v34 }
  0x1f   : > { %424 = vst [vmem:[#allocation2 + $0xa0] sm:$0xff] %v407_v36  ;;  %425 = vst [vmem:[#allocation2 + $0xa8] sm:$0xff] %v408_v37  ;;  %v395_v49 = vadd.f32 %v4024_v2, %v373_v41  ;;  %v396_v50 = vadd.f32 %v4024_v2, %v374_v42  ;;  %v397_v51 = vadd.f32 %v4024_v2, %v375_v43 }
  0x20   : > { %426 = vst [vmem:[#allocation2 + $0xd0] sm:$0xff] %v409_v40  ;;  %v379_v52 = vmul.f32 %v4013_v1, %v357_v39  ;;  %427 = vst [vmem:[#allocation2 + $0xd8] sm:$0xff] %v410_v45  ;;  %v398_v53 = vadd.f32 %v4024_v2, %v376_v46  ;;  %v399_v54 = vadd.f32 %v4024_v2, %v377_v47 }
  0x21   : > { %v400_v55 = vadd.f32 %v4024_v2, %v378_v48  ;;  %v380_v56 = vmul.f32 %v4013_v1, %v358_v44  ;;  %v411_v57 = vmax.f32 %v395_v49, 0.0  ;;  %v412_v58 = vmax.f32 %v396_v50, 0.0  ;;  %439 = sbr.rel (%p2473_p8) target bundleno = 40 (0x28), region = 40 }
  0x22   : > { %v413_v59 = vmax.f32 %v397_v51, 0.0  ;;  %v401_v60 = vadd.f32 %v4024_v2, %v379_v52  ;;  %v414_v61 = vmax.f32 %v398_v53, 0.0  ;;  %v415_v62 = vmax.f32 %v399_v54, 0.0 }
  0x23   : > { %v416_v63 = vmax.f32 %v400_v55, 0.0  ;;  %v402_v0 = vadd.f32 %v4024_v2, %v380_v56  ;;  %428 = vst [vmem:[#allocation2 + $0x100] sm:$0xff] %v411_v57  ;;  %429 = vst [vmem:[#allocation2 + $0x108] sm:$0xff] %v412_v58 }
  0x24   : > { %430 = vst [vmem:[#allocation2 + $0x130] sm:$0xff] %v413_v59  ;;  %v417_v3 = vmax.f32 %v401_v60, 0.0  ;;  %431 = vst [vmem:[#allocation2 + $0x138] sm:$0xff] %v414_v61 }
  0x25   : > { %432 = vst [vmem:[#allocation2 + $0x160] sm:$0xff] %v415_v62  ;;  %433 = vst [vmem:[#allocation2 + $0x168] sm:$0xff] %v416_v63  ;;  %v418_v4 = vmax.f32 %v402_v0, 0.0 }
  0x26   : > { %434 = vst [vmem:[#allocation2 + $0x190] sm:$0xff] %v417_v3 }
  0x27   : > { %435 = vst [vmem:[#allocation2 + $0x198] sm:$0xff] %v418_v4 }
  0x28 PF: > { %p2474_p9 = scmp.le.s32.totalorder %s3905_s21, 0 }
  0x29   : > { %s2475_s15 = sadd.s32 (!%p2474_p9), 4294967295, %s3997_s28 }
  0x2a   : > { %445 = sbr.rel (%p2474_p9) target bundleno = 52 (0x34), region = 44  ;;  %s2476_s16 = sshll.u32 (!%p2474_p9), %s2475_s15, 4 }
  0x2b   : > { %s448_s17 = scalar_lea.vmem (!%p2474_p9), %s4008_s10, %s2476_s16 }
  0x2c   : > { %v449_v6 = vld [vmem:[%s448_s17] sm:$0xff] (!%p2474_p9)  ;;  %v450_v7 = vld [vmem:[%s448_s17 + $0x8] sm:$0xff] (!%p2474_p9) }
  0x2d   : > { %v451_v8 = vmul.f32 (!%p2474_p9), %v4013_v1, %v449_v6  ;;  %v452_v9 = vmul.f32 (!%p2474_p9), %v4013_v1, %v450_v7 }
  0x2f   : > { %v453_v10 = vadd.f32 (!%p2474_p9), %v4024_v2, %v451_v8  ;;  %v454_v11 = vadd.f32 (!%p2474_p9), %v4024_v2, %v452_v9 }
  0x31   : > { %v455_v12 = vmax.f32 %v453_v10, 0.0  ;;  %v456_v13 = vmax.f32 %v454_v11, 0.0 }
  0x33   : > { %457 = vst [vmem:[#allocation2 + $0x10] sm:$0xff] %v455_v12  ;;  %458 = vst [vmem:[#allocation2 + $0x18] sm:$0xff] %v456_v13 }
  0x34 PF: > { %p2477_p10 = scmp.ne.s32.totalorder %s3905_s21, 1 }
  0x35   : > { %v3925_v14 = vmov (!%p2477_p10), 0.0  }
  0x36   : > { %462 = sbr.rel (%p2477_p10) target bundleno = 61 (0x3d), region = 48  ;;  %464 = vst [vmem:[#allocation2 + $0x1c0] sm:$0xff] (!%p2477_p10), %v3925_v14  ;;  %465 = vst [vmem:[#allocation2 + $0x1c8] sm:$0xff] (!%p2477_p10), %v3925_v14 }
  0x3d PF: > { %p2478_p11 = scmp.ge.s32.totalorder %s3905_s21, 1 }
  0x3e   : > { %v2481_v15 = vld [vmem:[%s4027_s29 + $0x80] sm:$0xff] (!%p2478_p11)  ;;  %v2482_v16 = vld [vmem:[%s4027_s29 + $0x88] sm:$0xff] (!%p2478_p11) }
  0x3f   : > { %469 = sbr.rel (%p2478_p11) target bundleno = 70 (0x46), region = 52  ;;  %v475_v17 = vmul.f32 (!%p2478_p11), %v2481_v15, %v4013_v1  ;;  %v476_v18 = vmul.f32 (!%p2478_p11), %v2482_v16, %v4013_v1 }
  0x41   : > { %v477_v19 = vadd.f32 (!%p2478_p11), %v4024_v2, %v475_v17  ;;  %v478_v20 = vadd.f32 (!%p2478_p11), %v4024_v2, %v476_v18 }
  0x43   : > { %v479_v21 = vmax.f32 (!%p2478_p11), %v477_v19, 0.0  ;;  %v480_v22 = vmax.f32 (!%p2478_p11), %v478_v20, 0.0 }
  0x45   : > { %482 = vst [vmem:[#allocation2 + $0x1c0] sm:$0xff] (!%p2478_p11), %v479_v21  ;;  %483 = vst [vmem:[#allocation2 + $0x1c8] sm:$0xff] (!%p2478_p11), %v480_v22 }
  0x46 PF: > { %v2483_v23 = vld [vmem:[%s4819_s3 + $0x80] sm:$0xff]  ;;  %v2484_v24 = vld [vmem:[%s4819_s3 + $0x88] sm:$0xff]  ;;  %v2485_v26 = vld [vmem:[%s4819_s3 + $0x90] sm:$0xff] }
  0x47   : > { %v2531_v1 = vld [vmem:[%s4819_s3 + $0x200] sm:$0xff]  ;;  %v3408_v25 = vpack.c.bf16 %v2484_v24, %v2483_v23  ;;  %v2532_v2 = vld [vmem:[%s4819_s3 + $0x208] sm:$0xff]  ;;  %v2486_v27 = vld [vmem:[%s4819_s3 + $0x98] sm:$0xff] }
  0x48   : > { %v3536_v28 = vpack.c.bf16 %v2532_v2, %v2531_v1  ;;  %v3412_v29 = vpack.c.bf16 %v2486_v27, %v2485_v26  ;;  %v2533_v30 = vld [vmem:[%s4819_s3 + $0x210] sm:$0xff]  ;;  %v2534_v31 = vld [vmem:[%s4819_s3 + $0x218] sm:$0xff]  ;;  %v2487_v32 = vld [vmem:[%s4819_s3 + $0xa0] sm:$0xff] }
  0x49   : > { %3409 = vmatprep.subr.bf16.mxu1 %v3408_v25  ;;  %v3540_v33 = vpack.c.bf16 %v2534_v31, %v2533_v30  ;;  %v2488_v34 = vld [vmem:[%s4819_s3 + $0xa8] sm:$0xff]  ;;  %v2535_v35 = vld [vmem:[%s4819_s3 + $0x220] sm:$0xff]  ;;  %v2489_v39 = vld [vmem:[%s4819_s3 + $0xb0] sm:$0xff] }
  0x4a   : > { %v2536_v36 = vld [vmem:[%s4819_s3 + $0x228] sm:$0xff]  ;;  %3537 = vmatprep.subr.bf16.mxu0 %v3536_v28  ;;  %3411 = vmatpush3.bf16.msra.mxu1 %v3408_v25  ;;  %v3416_v37 = vpack.c.bf16 %v2488_v34, %v2487_v32  ;;  %v2490_v40 = vld [vmem:[%s4819_s3 + $0xb8] sm:$0xff]  ;;  %v2537_v41 = vld [vmem:[%s4819_s3 + $0x230] sm:$0xff] }
  0x4b   : > { %3539 = vmatpush3.bf16.msra.mxu0 %v3536_v28  ;;  %3413 = vmatprep.subr.bf16.mxu1 %v3412_v29  ;;  %v3544_v38 = vpack.c.bf16 %v2536_v36, %v2535_v35  ;;  %v2538_v42 = vld [vmem:[%s4819_s3 + $0x238] sm:$0xff]  ;;  %v3420_v43 = vpack.c.bf16 %v2490_v40, %v2489_v39  ;;  %v2491_v45 = vld [vmem:[%s4819_s3 + $0xc0] sm:$0xff]  ;;  %v2492_v46 = vld [vmem:[%s4819_s3 + $0xc8] sm:$0xff] }
  0x4c   : > { %3541 = vmatprep.subr.bf16.mxu0 %v3540_v33  ;;  %v3548_v44 = vpack.c.bf16 %v2538_v42, %v2537_v41  ;;  %v516_v47 = vld [vmem:[#allocation2 + $0x10] sm:$0xff]  ;;  %v2539_v48 = vld [vmem:[%s4819_s3 + $0x240] sm:$0xff]  ;;  %v2540_v49 = vld [vmem:[%s4819_s3 + $0x248] sm:$0xff]  ;;  %v3424_v51 = vpack.c.bf16 %v2492_v46, %v2491_v45 }
  0x4d   : > { %2936 = vmatprep.mubr.f32.mxu1 %v516_v47  ;;  %v4166_v50 = vld [vmem:[#allocation2 + $0x40] sm:$0xff]  ;;  %v3552_v52 = vpack.c.bf16 %v2540_v49, %v2539_v48  ;;  %v2493_v53 = vld [vmem:[%s4819_s3 + $0xd0] sm:$0xff]  ;;  %v2494_v54 = vld [vmem:[%s4819_s3 + $0xd8] sm:$0xff] }
  0x4e   : > { %3415 = vmatpush3.bf16.msra.mxu1 %v3412_v29  ;;  %3160 = vmatprep.mubr.f32.mxu0 %v4166_v50  ;;  %v2541_v55 = vld [vmem:[%s4819_s3 + $0x250] sm:$0xff]  ;;  %v2542_v56 = vld [vmem:[%s4819_s3 + $0x258] sm:$0xff]  ;;  %v3428_v57 = vpack.c.bf16 %v2494_v54, %v2493_v53  ;;  %v2495_v59 = vld [vmem:[%s4819_s3 + $0xe0] sm:$0xff] }
  0x4f   : > { %3543 = vmatpush3.bf16.msra.mxu0 %v3540_v33  ;;  %3417 = vmatprep.subr.bf16.mxu1 %v3416_v37  ;;  %v3556_v58 = vpack.c.bf16 %v2542_v56, %v2541_v55  ;;  %v2496_v60 = vld [vmem:[%s4819_s3 + $0xe8] sm:$0xff]  ;;  %v2543_v61 = vld [vmem:[%s4819_s3 + $0x260] sm:$0xff]  ;;  %v2497_v3 = vld [vmem:[%s4819_s3 + $0xf0] sm:$0xff] }
  0x50   : > { %3545 = vmatprep.subr.bf16.mxu0 %v3544_v38  ;;  %v2544_v62 = vld [vmem:[%s4819_s3 + $0x268] sm:$0xff]  ;;  %v3432_v63 = vpack.c.bf16 %v2496_v60, %v2495_v59  ;;  %v2498_v4 = vld [vmem:[%s4819_s3 + $0xf8] sm:$0xff]  ;;  %v2545_v5 = vld [vmem:[%s4819_s3 + $0x270] sm:$0xff] }
  0x51   : > { %v3560_v0 = vpack.c.bf16 %v2544_v62, %v2543_v61  ;;  %v2546_v6 = vld [vmem:[%s4819_s3 + $0x278] sm:$0xff]  ;;  %v3436_v7 = vpack.c.bf16 %v2498_v4, %v2497_v3  ;;  %v500_v9 = vld [vmem:[%s4819_s3] sm:$0xff]  ;;  %v501_v10 = vld [vmem:[%s4819_s3 + $0x8] sm:$0xff] }
  0x52   : > { %3419 = vmatpush3.bf16.msra.mxu1 %v3416_v37  ;;  %v3564_v8 = vpack.c.bf16 %v2546_v6, %v2545_v5  ;;  %v2547_v11 = vld [vmem:[%s4819_s3 + $0x280] sm:$0xff]  ;;  %v2548_v12 = vld [vmem:[%s4819_s3 + $0x288] sm:$0xff]  ;;  %v3440_v13 = vpack.c.bf16 %v501_v10, %v500_v9  ;;  %v502_v15 = vld [vmem:[%s4819_s3 + $0x10] sm:$0xff] }
  0x53   : > { %3547 = vmatpush3.bf16.msra.mxu0 %v3544_v38  ;;  %3421 = vmatprep.subr.bf16.mxu1 %v3420_v43  ;;  %v3568_v14 = vpack.c.bf16 %v2548_v12, %v2547_v11  ;;  %v503_v16 = vld [vmem:[%s4819_s3 + $0x18] sm:$0xff]  ;;  %v2549_v18 = vld [vmem:[%s4819_s3 + $0x290] sm:$0xff]  ;;  %v1228_v20 = vld [vmem:[#allocation2 + $0x48] sm:$0xff] }
  0x54   : > { %3549 = vmatprep.subr.bf16.mxu0 %v3548_v44  ;;  %v517_v17 = vld [vmem:[#allocation2 + $0x18] sm:$0xff]  ;;  %v3444_v21 = vpack.c.bf16 %v503_v16, %v502_v15  ;;  %v4229_v22 = vld [vmem:[#allocation2 + $0x70] sm:$0xff]  ;;  %v504_v24 = vld [vmem:[%s4819_s3 + $0x20] sm:$0xff] }
  0x55   : > { %v2550_v19 = vld [vmem:[%s4819_s3 + $0x298] sm:$0xff]  ;;  %v505_v1 = vld [vmem:[%s4819_s3 + $0x28] sm:$0xff]  ;;  %v2551_v25 = vld [vmem:[%s4819_s3 + $0x2a0] sm:$0xff] }
  0x56   : > { %3423 = vmatpush3.bf16.msra.mxu1 %v3420_v43  ;;  %v3572_v23 = vpack.c.bf16 %v2550_v19, %v2549_v18  ;;  %v2552_v2 = vld [vmem:[%s4819_s3 + $0x2a8] sm:$0xff]  ;;  %v4244_v26 = vld [vmem:[#allocation2 + $0x78] sm:$0xff]  ;;  %v3448_v27 = vpack.c.bf16 %v505_v1, %v504_v24  ;;  %v4247_v28 = vld [vmem:[#allocation2 + $0xa0] sm:$0xff] }
  0x57   : > { %3551 = vmatpush3.bf16.msra.mxu0 %v3548_v44  ;;  %3425 = vmatprep.subr.bf16.mxu1 %v3424_v51  ;;  %v3576_v29 = vpack.c.bf16 %v2552_v2, %v2551_v25  ;;  %v506_v30 = vld [vmem:[%s4819_s3 + $0x30] sm:$0xff]  ;;  %v507_v31 = vld [vmem:[%s4819_s3 + $0x38] sm:$0xff]  ;;  %v4263_v34 = vld [vmem:[#allocation2 + $0xa8] sm:$0xff] }
  0x58   : > { %3553 = vmatprep.subr.bf16.mxu0 %v3552_v52  ;;  %v2553_v32 = vld [vmem:[%s4819_s3 + $0x2b0] sm:$0xff]  ;;  %v2554_v33 = vld [vmem:[%s4819_s3 + $0x2b8] sm:$0xff]  ;;  %v3452_v35 = vpack.c.bf16 %v507_v31, %v506_v30  ;;  %v508_v38 = vld [vmem:[%s4819_s3 + $0x40] sm:$0xff] }
  0x59   : > { %v4267_v36 = vld [vmem:[#allocation2 + $0xd0] sm:$0xff]  ;;  %v3580_v37 = vpack.c.bf16 %v2554_v33, %v2553_v32  ;;  %v509_v39 = vld [vmem:[%s4819_s3 + $0x48] sm:$0xff]  ;;  %v2555_v40 = vld [vmem:[%s4819_s3 + $0x2c0] sm:$0xff] }
  0x5a   : > { %3427 = vmatpush3.bf16.msra.mxu1 %v3424_v51  ;;  %v2556_v41 = vld [vmem:[%s4819_s3 + $0x2c8] sm:$0xff]  ;;  %v4283_v42 = vld [vmem:[#allocation2 + $0xd8] sm:$0xff]  ;;  %v3456_v43 = vpack.c.bf16 %v509_v39, %v508_v38  ;;  %v4287_v44 = vld [vmem:[#allocation2 + $0x100] sm:$0xff] }
  0x5b   : > { %3555 = vmatpush3.bf16.msra.mxu0 %v3552_v52  ;;  %3429 = vmatprep.subr.bf16.mxu1 %v3428_v57  ;;  %v3584_v45 = vpack.c.bf16 %v2556_v41, %v2555_v40  ;;  %v510_v46 = vld [vmem:[%s4819_s3 + $0x50] sm:$0xff]  ;;  %v511_v47 = vld [vmem:[%s4819_s3 + $0x58] sm:$0xff]  ;;  %v512_v54 = vld [vmem:[%s4819_s3 + $0x60] sm:$0xff] }
  0x5c   : > { %3557 = vmatprep.subr.bf16.mxu0 %v3556_v58  ;;  %v2557_v48 = vld [vmem:[%s4819_s3 + $0x2d0] sm:$0xff]  ;;  %v2558_v49 = vld [vmem:[%s4819_s3 + $0x2d8] sm:$0xff]  ;;  %v3460_v51 = vpack.c.bf16 %v511_v47, %v510_v46  ;;  %v513_v55 = vld [vmem:[%s4819_s3 + $0x68] sm:$0xff] }
  0x5d   : > { %v4307_v52 = vld [vmem:[#allocation2 + $0x130] sm:$0xff]  ;;  %v3588_v53 = vpack.c.bf16 %v2558_v49, %v2557_v48  ;;  %v2559_v56 = vld [vmem:[%s4819_s3 + $0x2e0] sm:$0xff]  ;;  %v3464_v59 = vpack.c.bf16 %v513_v55, %v512_v54  ;;  %v2562_v3 = vld [vmem:[%s4819_s3 + $0x2f8] sm:$0xff] }
  0x5e   : > { %3431 = vmatpush3.bf16.msra.mxu1 %v3428_v57  ;;  %v2560_v57 = vld [vmem:[%s4819_s3 + $0x2e8] sm:$0xff]  ;;  %v4327_v60 = vld [vmem:[#allocation2 + $0x160] sm:$0xff]  ;;  %v514_v62 = vld [vmem:[%s4819_s3 + $0x70] sm:$0xff] }
  0x5f   : > { %3559 = vmatpush3.bf16.msra.mxu0 %v3556_v58  ;;  %3433 = vmatprep.subr.bf16.mxu1 %v3432_v63  ;;  %v4323_v58 = vld [vmem:[#allocation2 + $0x138] sm:$0xff]  ;;  %v3592_v61 = vpack.c.bf16 %v2560_v57, %v2559_v56  ;;  %v4343_v4 = vld [vmem:[#allocation2 + $0x168] sm:$0xff]  ;;  %v4347_v6 = vld [vmem:[#allocation2 + $0x190] sm:$0xff] }
  0x60   : > { %3561 = vmatprep.subr.bf16.mxu0 %v3560_v0  ;;  %v2500_v9 = vld [vmem:[%s4819_s3 + $0x108] sm:$0xff]  ;;  %v2563_v10 = vld [vmem:[%s4819_s3 + $0x300] sm:$0xff]  ;;  %v4363_v12 = vld [vmem:[#allocation2 + $0x198] sm:$0xff] }
  0x61   : > { %v2564_v11 = vld [vmem:[%s4819_s3 + $0x308] sm:$0xff]  ;;  %v2502_v18 = vld [vmem:[%s4819_s3 + $0x118] sm:$0xff]  ;;  %v2567_v31 = vld [vmem:[%s4819_s3 + $0x320] sm:$0xff] }
  0x62   : > { %3435 = vmatpush3.bf16.msra.mxu1 %v3432_v63  ;;  %v515_v63 = vld [vmem:[%s4819_s3 + $0x78] sm:$0xff]  ;;  %v4367_v15 = vld [vmem:[#allocation2 + $0x41] sm:$0xff]  ;;  %v3600_v16 = vpack.c.bf16 %v2564_v11, %v2563_v10  ;;  %v2505_v40 = vld [vmem:[%s4819_s3 + $0x130] sm:$0xff] }
  0x63   : > { %3563 = vmatpush3.bf16.msra.mxu0 %v3560_v0  ;;  %3437 = vmatprep.subr.bf16.mxu1 %v3436_v7  ;;  %v2561_v0 = vld [vmem:[%s4819_s3 + $0x2f0] sm:$0xff]  ;;  %v3468_v5 = vpack.c.bf16 %v515_v63, %v514_v62  ;;  %v4385_v24 = vld [vmem:[#allocation2 + $0x3f] sm:$0xff]  ;;  %v4396_v30 = vld [vmem:[#allocation2 + $0x47] sm:$0xff] }
  0x64   : > { %3565 = vmatprep.subr.bf16.mxu0 %v3564_v8  ;;  %v485_v19 = vld [vmem:[#allocation2 + $0x17] sm:$0xff]  ;;  %v2568_v32 = vld [vmem:[%s4819_s3 + $0x328] sm:$0xff]  ;;  %v4432_v48 = vld [vmem:[#allocation2 + $0x9f] sm:$0xff] }
  0x65   : > { %v4387_v25 = vld [vmem:[#allocation2 + $0x71] sm:$0xff]  ;;  %v4405_v33 = vld [vmem:[#allocation2 + $0x79] sm:$0xff]  ;;  %v4411_v38 = vld [vmem:[#allocation2 + $0xa1] sm:$0xff]  ;;  %v3608_v39 = vpack.c.bf16 %v2568_v32, %v2567_v31 }
  0x66   : > { %3439 = vmatpush3.bf16.msra.mxu1 %v3436_v7  ;;  %v3596_v7 = vpack.c.bf16 %v2562_v3, %v2561_v0  ;;  %v2506_v41 = vld [vmem:[%s4819_s3 + $0x138] sm:$0xff]  ;;  %v4429_v47 = vld [vmem:[#allocation2 + $0xa9] sm:$0xff]  ;;  %v2507_v54 = vld [vmem:[%s4819_s3 + $0x140] sm:$0xff] }
  0x67   : > { %3567 = vmatpush3.bf16.msra.mxu0 %v3564_v8  ;;  %3441 = vmatprep.subr.bf16.mxu1 %v3440_v13  ;;  %v2499_v8 = vld [vmem:[%s4819_s3 + $0x100] sm:$0xff]  ;;  %v2570_v46 = vld [vmem:[%s4819_s3 + $0x338] sm:$0xff]  ;;  %v3484_v49 = vpack.c.bf16 %v2506_v41, %v2505_v40  ;;  %v2508_v55 = vld [vmem:[%s4819_s3 + $0x148] sm:$0xff] }
  0x68   : > { %3569 = vmatprep.subr.bf16.mxu0 %v3568_v14  ;;  %v4444_v56 = vld [vmem:[#allocation2 + $0xa7] sm:$0xff]  ;;  %v4456_v62 = vld [vmem:[#allocation2 + $0xcf] sm:$0xff]  ;;  %v3488_v63 = vpack.c.bf16 %v2508_v55, %v2507_v54  ;;  %v2574_v10 = vld [vmem:[%s4819_s3 + $0x358] sm:$0xff] }
  0x69   : > { %2937 = vmatmul.mubr.f32.vlgmr.msra.gmra.mrb[0].mxu1 %v517_v17  ;;  %v2501_v17 = vld [vmem:[%s4819_s3 + $0x110] sm:$0xff]  ;;  %v2571_v57 = vld [vmem:[%s4819_s3 + $0x340] sm:$0xff] }
  0x6a   : > { %3161 = vmatmul.mubr.f32.vlgmr.msra.gmra.mrb[0].mxu0 %v1228_v20  ;;  %3443 = vmatpush3.bf16.msra.mxu1 %v3440_v13  ;;  %v484_v13 = vld [vmem:[#allocation2 + $0xf] sm:$0xff]  ;;  %v3476_v1 = vpack.c.bf16 %v2502_v18, %v2501_v17  ;;  %v4459_v0 = vld [vmem:[#allocation2 + $0x101] sm:$0xff]  ;;  %v4516_v40 = vld [vmem:[#allocation2 + $0x137] sm:$0xff] }
  0x6b   : > { %3571 = vmatpush3.bf16.msra.mxu0 %v3568_v14  ;;  %2939 = vmatprep.mubr.f32.mxu1 %v4166_v50  ;;  %v4303_v50 = vld [vmem:[#allocation2 + $0x108] sm:$0xff]  ;;  %v3472_v14 = vpack.c.bf16 %v2500_v9, %v2499_v8  ;;  %v4468_v8 = vld [vmem:[#allocation2 + $0xd7] sm:$0xff]  ;;  %v2511_v18 = vld [vmem:[%s4819_s3 + $0x160] sm:$0xff] }
  0x6c   : > { %3163 = vmatprep.mubr.f32.mxu0 %v4229_v22  ;;  %3445 = vmatprep.subr.bf16.mxu1 %v3444_v21  ;;  %v2573_v9 = vld [vmem:[%s4819_s3 + $0x350] sm:$0xff]  ;;  %v4507_v31 = vld [vmem:[#allocation2 + $0x161] sm:$0xff] }
  0x6d   : > { %2940 = vmatmul.mubr.f32.gmra.mrb[2].mxu1 %v1228_v20  ;;  %3573 = vmatprep.subr.bf16.mxu0 %v3572_v23  ;;  %v2565_v20 = vld [vmem:[%s4819_s3 + $0x310] sm:$0xff]  ;;  %v3620_v17 = vpack.c.bf16 %v2574_v10, %v2573_v9 }
  0x6e   : > { %3164 = vmatmul.mubr.f32.gmra.mrb[2].mxu0 %v4244_v26  ;;  %3447 = vmatpush3.bf16.msra.mxu1 %v3444_v21  ;;  %v2566_v21 = vld [vmem:[%s4819_s3 + $0x318] sm:$0xff]  ;;  %v4477_v11 = vld [vmem:[#allocation2 + $0x109] sm:$0xff] }
  0x6f   : > { %3575 = vmatpush3.bf16.msra.mxu0 %v3572_v23  ;;  %2942 = vmatprep.mubr.f32.mxu1 %v4229_v22  ;;  %v4382_v23 = vld [vmem:[#allocation2 + $0x49] sm:$0xff]  ;;  %v3604_v2 = vpack.c.bf16 %v2566_v21, %v2565_v20  ;;  %v2575_v21 = vld [vmem:[%s4819_s3 + $0x360] sm:$0xff]  ;;  %v4531_v54 = vld [vmem:[#allocation2 + $0x191] sm:$0xff] }
  0x70   : > { %3166 = vmatprep.mubr.f32.mxu0 %v4247_v28  ;;  %3449 = vmatprep.subr.bf16.mxu1 %v3448_v27  ;;  %v4492_v20 = vld [vmem:[#allocation2 + $0x107] sm:$0xff]  ;;  %v2577_v41 = vld [vmem:[%s4819_s3 + $0x370] sm:$0xff] }
  0x71   : > { %2943 = vmatmul.mubr.f32.gmra.mrb[4].mxu1 %v4244_v26  ;;  %3577 = vmatprep.subr.bf16.mxu0 %v3576_v29  ;;  %v839_v9 = vld [vmem:[#allocation2 + $0x11] sm:$0xff] }
  0x72   : > { %3167 = vmatmul.mubr.f32.gmra.mrb[4].mxu0 %v4263_v34  ;;  %3451 = vmatpush3.bf16.msra.mxu1 %v3448_v27  ;;  %v2503_v27 = vld [vmem:[%s4819_s3 + $0x120] sm:$0xff] }
  0x73   : > { %3579 = vmatpush3.bf16.msra.mxu0 %v3576_v29  ;;  %2945 = vmatprep.mubr.f32.mxu1 %v4247_v28  ;;  %v2504_v29 = vld [vmem:[%s4819_s3 + $0x128] sm:$0xff] }
  0x74   : > { %3169 = vmatprep.mubr.f32.mxu0 %v4267_v36  ;;  %3453 = vmatprep.subr.bf16.mxu1 %v3452_v35 }
  0x75   : > { %2946 = vmatmul.mubr.f32.gmra.mrb[6].mxu1 %v4263_v34  ;;  %3581 = vmatprep.subr.bf16.mxu0 %v3580_v37 }
  0x76   : > { %3170 = vmatmul.mubr.f32.gmra.mrb[6].mxu0 %v4283_v42  ;;  %3455 = vmatpush3.bf16.msra.mxu1 %v3452_v35  ;;  %v4408_v35 = vld [vmem:[#allocation2 + $0x6f] sm:$0xff] }
  0x77   : > { %3583 = vmatpush3.bf16.msra.mxu0 %v3580_v37  ;;  %2948 = vmatprep.mubr.f32.mxu1 %v4267_v36  ;;  %v3480_v37 = vpack.c.bf16 %v2504_v29, %v2503_v27  ;;  %v4504_v27 = vld [vmem:[#allocation2 + $0x12f] sm:$0xff] }
  0x78   : > { %3172 = vmatprep.mubr.f32.mxu0 %v4287_v44  ;;  %3457 = vmatprep.subr.bf16.mxu1 %v3456_v43 }
  0x79   : > { %2949 = vmatmul.mubr.f32.gmra.mrb[8].mxu1 %v4283_v42  ;;  %3585 = vmatprep.subr.bf16.mxu0 %v3584_v45 }
  0x7a   : > { %3173 = vmatmul.mubr.f32.gmra.mrb[8].mxu0 %v4303_v50  ;;  %3459 = vmatpush3.bf16.msra.mxu1 %v3456_v43  ;;  %v4420_v43 = vld [vmem:[#allocation2 + $0x77] sm:$0xff] }
  0x7b   : > { %3587 = vmatpush3.bf16.msra.mxu0 %v3584_v45  ;;  %2951 = vmatprep.mubr.f32.mxu1 %v4287_v44  ;;  %v2569_v45 = vld [vmem:[%s4819_s3 + $0x330] sm:$0xff] }
  0x7c   : > { %3175 = vmatprep.mubr.f32.mxu0 %v4307_v52  ;;  %3461 = vmatprep.subr.bf16.mxu1 %v3460_v51 }
  0x7d   : > { %2952 = vmatmul.mubr.f32.gmra.mrb[10].mxu1 %v4303_v50  ;;  %3589 = vmatprep.subr.bf16.mxu0 %v3588_v53 }
  0x7e   : > { %3176 = vmatmul.mubr.f32.gmra.mrb[10].mxu0 %v4323_v58  ;;  %3463 = vmatpush3.bf16.msra.mxu1 %v3460_v51  ;;  %v4435_v51 = vld [vmem:[#allocation2 + $0xd1] sm:$0xff] }
  0x7f   : > { %3591 = vmatpush3.bf16.msra.mxu0 %v3588_v53  ;;  %2954 = vmatprep.mubr.f32.mxu1 %v4307_v52  ;;  %v3612_v53 = vpack.c.bf16 %v2570_v46, %v2569_v45  ;;  %v2578_v45 = vld [vmem:[%s4819_s3 + $0x378] sm:$0xff]  ;;  %v4525_v46 = vld [vmem:[#allocation2 + $0x169] sm:$0xff] }
  0x80   : > { %3178 = vmatprep.mubr.f32.mxu0 %v4327_v60  ;;  %3465 = vmatprep.subr.bf16.mxu1 %v3464_v59  ;;  %v3628_v55 = vpack.c.bf16 %v2578_v45, %v2577_v41  ;;  %v2583_v41 = vld [vmem:[%s4819_s3 + $0x3a0] sm:$0xff]  ;;  %v2584_v45 = vld [vmem:[%s4819_s3 + $0x3a8] sm:$0xff] }
  0x81   : > { %2955 = vmatmul.mubr.f32.gmra.mrb[12].mxu1 %v4323_v58  ;;  %3593 = vmatprep.subr.bf16.mxu0 %v3592_v61 }
  0x82   : > { %3179 = vmatmul.mubr.f32.gmra.mrb[12].mxu0 %v4343_v4  ;;  %3467 = vmatpush3.bf16.msra.mxu1 %v3464_v59  ;;  %v2572_v59 = vld [vmem:[%s4819_s3 + $0x348] sm:$0xff] }
  0x83   : > { %3595 = vmatpush3.bf16.msra.mxu0 %v3592_v61  ;;  %2957 = vmatprep.mubr.f32.mxu1 %v4327_v60  ;;  %v4453_v61 = vld [vmem:[#allocation2 + $0xd9] sm:$0xff]  ;;  %v3616_v3 = vpack.c.bf16 %v2572_v59, %v2571_v57  ;;  %v2516_v59 = vld [vmem:[%s4819_s3 + $0x188] sm:$0xff] }
  0x84   : > { %3181 = vmatprep.mubr.f32.mxu0 %v4347_v6  ;;  %3469 = vmatprep.subr.bf16.mxu1 %v3468_v5  ;;  %v2515_v57 = vld [vmem:[%s4819_s3 + $0x180] sm:$0xff] }
  0x85   : > { %2958 = vmatmul.mubr.f32.gmra.mrb[14].mxu1 %v4343_v4  ;;  %3597 = vmatprep.subr.bf16.mxu0 %v3596_v7  ;;  %v3504_v10 = vpack.c.bf16 %v2516_v59, %v2515_v57  ;;  %v2521_v57 = vld [vmem:[%s4819_s3 + $0x1b0] sm:$0xff]  ;;  %v2522_v59 = vld [vmem:[%s4819_s3 + $0x1b8] sm:$0xff] }
  0x86   : > { %3182 = vmatmul.mubr.f32.gmra.mrb[14].mxu0 %v4363_v12  ;;  %3471 = vmatpush3.bf16.msra.mxu1 %v3468_v5  ;;  %v2509_v5 = vld [vmem:[%s4819_s3 + $0x150] sm:$0xff] }
  0x87   : > { %3599 = vmatpush3.bf16.msra.mxu0 %v3596_v7  ;;  %2992 = vmatprep.mubr.f32.mxu1 %v484_v13  ;;  %v2510_v7 = vld [vmem:[%s4819_s3 + $0x158] sm:$0xff] }
  0x88   : > { %3216 = vmatprep.mubr.f32.mxu0 %v4367_v15  ;;  %3473 = vmatprep.subr.bf16.mxu1 %v3472_v14  ;;  %v4480_v13 = vld [vmem:[#allocation2 + $0xff] sm:$0xff] }
  0x89   : > { %2993 = vmatmul.mubr.f32.vlgmr.msra.gmra.mrb[0].mxu1 %v485_v19  ;;  %3601 = vmatprep.subr.bf16.mxu0 %v3600_v16  ;;  %v2512_v19 = vld [vmem:[%s4819_s3 + $0x168] sm:$0xff] }
  0x8a   : > { %3217 = vmatmul.mubr.f32.vlgmr.msra.gmra.mrb[0].mxu0 %v4382_v23  ;;  %3475 = vmatpush3.bf16.msra.mxu1 %v3472_v14  ;;  %v3492_v14 = vpack.c.bf16 %v2510_v7, %v2509_v5  ;;  %v3496_v29 = vpack.c.bf16 %v2512_v19, %v2511_v18  ;;  %v2580_v5 = vld [vmem:[%s4819_s3 + $0x388] sm:$0xff]  ;;  %v4549_v7 = vld [vmem:[#allocation2 + $0x199] sm:$0xff] }
  0x8b   : > { %3603 = vmatpush3.bf16.msra.mxu0 %v3600_v16  ;;  %2995 = vmatprep.mubr.f32.mxu1 %v4385_v24  ;;  %v4483_v16 = vld [vmem:[#allocation2 + $0x131] sm:$0xff]  ;;  %v840_v19 = vld [vmem:[#allocation2 + $0x19] sm:$0xff] }
  0x8c   : > { %3219 = vmatprep.mubr.f32.mxu0 %v4387_v25  ;;  %3477 = vmatprep.subr.bf16.mxu1 %v3476_v1  ;;  %v2518_v18 = vld [vmem:[%s4819_s3 + $0x198] sm:$0xff] }
  0x8d   : > { %2996 = vmatmul.mubr.f32.gmra.mrb[2].mxu1 %v4396_v30  ;;  %3605 = vmatprep.subr.bf16.mxu0 %v3604_v2 }
  0x8e   : > { %3220 = vmatmul.mubr.f32.gmra.mrb[2].mxu0 %v4405_v33  ;;  %3479 = vmatpush3.bf16.msra.mxu1 %v3476_v1  ;;  %v2576_v1 = vld [vmem:[%s4819_s3 + $0x368] sm:$0xff] }
  0x8f   : > { %3607 = vmatpush3.bf16.msra.mxu0 %v3604_v2  ;;  %2998 = vmatprep.mubr.f32.mxu1 %v4408_v35  ;;  %v4501_v2 = vld [vmem:[#allocation2 + $0x139] sm:$0xff]  ;;  %v3624_v32 = vpack.c.bf16 %v2576_v1, %v2575_v21  ;;  %v2581_v21 = vld [vmem:[%s4819_s3 + $0x390] sm:$0xff] }
  0x90   : > { %3222 = vmatprep.mubr.f32.mxu0 %v4411_v38  ;;  %3481 = vmatprep.subr.bf16.mxu1 %v3480_v37  ;;  %v2582_v1 = vld [vmem:[%s4819_s3 + $0x398] sm:$0xff] }
  0x91   : > { %2999 = vmatmul.mubr.f32.gmra.mrb[4].mxu1 %v4420_v43  ;;  %3609 = vmatprep.subr.bf16.mxu0 %v3608_v39 }
  0x92   : > { %3223 = vmatmul.mubr.f32.gmra.mrb[4].mxu0 %v4429_v47  ;;  %3483 = vmatpush3.bf16.msra.mxu1 %v3480_v37  ;;  %v2513_v37 = vld [vmem:[%s4819_s3 + $0x170] sm:$0xff] }
  0x93   : > { %3611 = vmatpush3.bf16.msra.mxu0 %v3608_v39  ;;  %3001 = vmatprep.mubr.f32.mxu1 %v4432_v48  ;;  %v2514_v39 = vld [vmem:[%s4819_s3 + $0x178] sm:$0xff] }
  0x94   : > { %3225 = vmatprep.mubr.f32.mxu0 %v4435_v51  ;;  %3485 = vmatprep.subr.bf16.mxu1 %v3484_v49 }
  0x95   : > { %3002 = vmatmul.mubr.f32.gmra.mrb[6].mxu1 %v4444_v56  ;;  %3613 = vmatprep.subr.bf16.mxu0 %v3612_v53 }
  0x96   : > { %3226 = vmatmul.mubr.f32.gmra.mrb[6].mxu0 %v4453_v61  ;;  %3487 = vmatpush3.bf16.msra.mxu1 %v3484_v49  ;;  %v4528_v49 = vld [vmem:[#allocation2 + $0x15f] sm:$0xff] }
  0x97   : > { %3615 = vmatpush3.bf16.msra.mxu0 %v3612_v53  ;;  %3004 = vmatprep.mubr.f32.mxu1 %v4456_v62  ;;  %v3500_v53 = vpack.c.bf16 %v2514_v39, %v2513_v37  ;;  %v2519_v37 = vld [vmem:[%s4819_s3 + $0x1a0] sm:$0xff]  ;;  %v2520_v39 = vld [vmem:[%s4819_s3 + $0x1a8] sm:$0xff] }
  0x98   : > { %3228 = vmatprep.mubr.f32.mxu0 %v4459_v0  ;;  %3489 = vmatprep.subr.bf16.mxu1 %v3488_v63 }
  0x99   : > { %3005 = vmatmul.mubr.f32.gmra.mrb[8].mxu1 %v4468_v8  ;;  %3617 = vmatprep.subr.bf16.mxu0 %v3616_v3 }
  0x9a   : > { %3229 = vmatmul.mubr.f32.gmra.mrb[8].mxu0 %v4477_v11  ;;  %3491 = vmatpush3.bf16.msra.mxu1 %v3488_v63  ;;  %v4540_v63 = vld [vmem:[#allocation2 + $0x167] sm:$0xff] }
  0x9b   : > { %3619 = vmatpush3.bf16.msra.mxu0 %v3616_v3  ;;  %3007 = vmatprep.mubr.f32.mxu1 %v4480_v13  ;;  %v2579_v3 = vld [vmem:[%s4819_s3 + $0x380] sm:$0xff] }
  0x9c   : > { %3231 = vmatprep.mubr.f32.mxu0 %v4483_v16  ;;  %3493 = vmatprep.subr.bf16.mxu1 %v3492_v14 }
  0x9d   : > { %3008 = vmatmul.mubr.f32.gmra.mrb[10].mxu1 %v4492_v20  ;;  %3621 = vmatprep.subr.bf16.mxu0 %v3620_v17 }
  0x9e   : > { %3232 = vmatmul.mubr.f32.gmra.mrb[10].mxu0 %v4501_v2  ;;  %3495 = vmatpush3.bf16.msra.mxu1 %v3492_v14  ;;  %v3632_v14 = vpack.c.bf16 %v2580_v5, %v2579_v3  ;;  %v3516_v3 = vpack.c.bf16 %v2522_v59, %v2521_v57  ;;  %v4647_v59 = vld [vmem:[#allocation2 + $0x18f] sm:$0xff] }
  0x9f   : > { %3623 = vmatpush3.bf16.msra.mxu0 %v3620_v17  ;;  %3010 = vmatprep.mubr.f32.mxu1 %v4504_v27  ;;  %v2517_v17 = vld [vmem:[%s4819_s3 + $0x190] sm:$0xff] }
  0xa0   : > { %3234 = vmatprep.mubr.f32.mxu0 %v4507_v31  ;;  %3497 = vmatprep.subr.bf16.mxu1 %v3496_v29 }
  0xa1   : > { %3011 = vmatmul.mubr.f32.gmra.mrb[12].mxu1 %v4516_v40  ;;  %3625 = vmatprep.subr.bf16.mxu0 %v3624_v32 }
  0xa2   : > { %3235 = vmatmul.mubr.f32.gmra.mrb[12].mxu0 %v4525_v46  ;;  %3499 = vmatpush3.bf16.msra.mxu1 %v3496_v29  ;;  %v3508_v29 = vpack.c.bf16 %v2518_v18, %v2517_v17  ;;  %v2588_v17 = vld [vmem:[%s4819_s3 + $0x3c8] sm:$0xff] }
  0xa3   : > { %3627 = vmatpush3.bf16.msra.mxu0 %v3624_v32  ;;  %3013 = vmatprep.mubr.f32.mxu1 %v4528_v49  ;;  %v3636_v32 = vpack.c.bf16 %v2582_v1, %v2581_v21  ;;  %v2525_v21 = vld [vmem:[%s4819_s3 + $0x1d0] sm:$0xff]  ;;  %v2526_v1 = vld [vmem:[%s4819_s3 + $0x1d8] sm:$0xff] }
  0xa4   : > { %3237 = vmatprep.mubr.f32.mxu0 %v4531_v54  ;;  %3501 = vmatprep.subr.bf16.mxu1 %v3500_v53 }
  0xa5   : > { %3014 = vmatmul.mubr.f32.gmra.mrb[14].mxu1 %v4540_v63  ;;  %3629 = vmatprep.subr.bf16.mxu0 %v3628_v55 }
  0xa6   : > { %3238 = vmatmul.mubr.f32.gmra.mrb[14].mxu0 %v4549_v7  ;;  %3503 = vmatpush3.bf16.msra.mxu1 %v3500_v53  ;;  %v3512_v53 = vpack.c.bf16 %v2520_v39, %v2519_v37  ;;  %v3524_v37 = vpack.c.bf16 %v2526_v1, %v2525_v21  ;;  %v2596_v21 = vld [vmem:[%s4819_s3 + $0x408] sm:$0xff] }
  0xa7   : > { %3631 = vmatpush3.bf16.msra.mxu0 %v3628_v55  ;;  %3048 = vmatprep.mubr.f32.mxu1 %v839_v9  ;;  %v3640_v55 = vpack.c.bf16 %v2584_v45, %v2583_v41  ;;  %v2523_v9 = vld [vmem:[%s4819_s3 + $0x1c0] sm:$0xff]  ;;  %v2528_v45 = vld [vmem:[%s4819_s3 + $0x1e8] sm:$0xff] }
  0xa8   : > { %3272 = vmatprep.mubr.f32.mxu0 %v4408_v35  ;;  %3505 = vmatprep.subr.bf16.mxu1 %v3504_v10  ;;  %v2527_v41 = vld [vmem:[%s4819_s3 + $0x1e0] sm:$0xff] }
  0xa9   : > { %3049 = vmatmul.mubr.f32.vlgmr.msra.gmra.mrb[0].mxu1 %v840_v19  ;;  %3633 = vmatprep.subr.bf16.mxu0 %v3632_v14  ;;  %v3528_v57 = vpack.c.bf16 %v2528_v45, %v2527_v41  ;;  %v1631_v1 = vld [vmem:[#allocation2 + $0x1c7] sm:$0xff] }
  0xaa   : > { %3273 = vmatmul.mubr.f32.vlgmr.msra.gmra.mrb[0].mxu0 %v4420_v43  ;;  %3507 = vmatpush3.bf16.msra.mxu1 %v3504_v10  ;;  %v2524_v10 = vld [vmem:[%s4819_s3 + $0x1c8] sm:$0xff]  ;;  %v2599_v41 = vld [vmem:[%s4819_s3 + $0x420] sm:$0xff] }
  0xab   : > { %3635 = vmatpush3.bf16.msra.mxu0 %v3632_v14  ;;  %3051 = vmatprep.mubr.f32.mxu1 %v4367_v15  ;;  %v2585_v15 = vld [vmem:[%s4819_s3 + $0x3b0] sm:$0xff]  ;;  %v2587_v14 = vld [vmem:[%s4819_s3 + $0x3c0] sm:$0xff]  ;;  %v3520_v18 = vpack.c.bf16 %v2524_v10, %v2523_v9  ;;  %v2594_v9 = vld [vmem:[%s4819_s3 + $0x3f8] sm:$0xff] }
  0xac   : > { %3275 = vmatprep.mubr.f32.mxu0 %v4432_v48  ;;  %3509 = vmatprep.subr.bf16.mxu1 %v3508_v29  ;;  %v3648_v19 = vpack.c.bf16 %v2588_v17, %v2587_v14  ;;  %v4663_v10 = vld [vmem:[#allocation2 + $0x197] sm:$0xff]  ;;  %v1630_v17 = vld [vmem:[#allocation2 + $0x1bf] sm:$0xff]  ;;  %v2600_v45 = vld [vmem:[%s4819_s3 + $0x428] sm:$0xff] }
  0xad   : > { %3052 = vmatmul.mubr.f32.gmra.mrb[2].mxu1 %v4382_v23  ;;  %3637 = vmatprep.subr.bf16.mxu0 %v3636_v32  ;;  %v2586_v23 = vld [vmem:[%s4819_s3 + $0x3b8] sm:$0xff] }
  0xae   : > { %3276 = vmatmul.mubr.f32.gmra.mrb[2].mxu0 %v4444_v56  ;;  %3511 = vmatpush3.bf16.msra.mxu1 %v3508_v29  ;;  %v3644_v5 = vpack.c.bf16 %v2586_v23, %v2585_v15  ;;  %v2589_v29 = vld [vmem:[%s4819_s3 + $0x3d0] sm:$0xff] }
  0xaf   : > { %3639 = vmatpush3.bf16.msra.mxu0 %v3636_v32  ;;  %3054 = vmatprep.mubr.f32.mxu1 %v4387_v25  ;;  %v2590_v32 = vld [vmem:[%s4819_s3 + $0x3d8] sm:$0xff]  ;;  %v2529_v23 = vld [vmem:[%s4819_s3 + $0x1f0] sm:$0xff] }
  0xb0   : > { %3278 = vmatprep.mubr.f32.mxu0 %v4456_v62  ;;  %3513 = vmatprep.subr.bf16.mxu1 %v3512_v53  ;;  %v3652_v39 = vpack.c.bf16 %v2590_v32, %v2589_v29  ;;  %v2597_v32 = vld [vmem:[%s4819_s3 + $0x410] sm:$0xff] }
  0xb1   : > { %3055 = vmatmul.mubr.f32.gmra.mrb[4].mxu1 %v4405_v33  ;;  %3641 = vmatprep.subr.bf16.mxu0 %v3640_v55 }
  0xb2   : > { %3279 = vmatmul.mubr.f32.gmra.mrb[4].mxu0 %v4468_v8  ;;  %3515 = vmatpush3.bf16.msra.mxu1 %v3512_v53  ;;  %v2591_v53 = vld [vmem:[%s4819_s3 + $0x3e0] sm:$0xff] }
  0xb3   : > { %3643 = vmatpush3.bf16.msra.mxu0 %v3640_v55  ;;  %3057 = vmatprep.mubr.f32.mxu1 %v4411_v38  ;;  %v2592_v55 = vld [vmem:[%s4819_s3 + $0x3e8] sm:$0xff] }
  0xb4   : > { %3281 = vmatprep.mubr.f32.mxu0 %v4480_v13  ;;  %3517 = vmatprep.subr.bf16.mxu1 %v3516_v3  ;;  %v3656_v15 = vpack.c.bf16 %v2592_v55, %v2591_v53 }
  0xb5   : > { %3058 = vmatmul.mubr.f32.gmra.mrb[6].mxu1 %v4429_v47  ;;  %3645 = vmatprep.subr.bf16.mxu0 %v3644_v5 }
  0xb6   : > { %3282 = vmatmul.mubr.f32.gmra.mrb[6].mxu0 %v4492_v20  ;;  %3519 = vmatpush3.bf16.msra.mxu1 %v3516_v3  ;;  %v2530_v3 = vld [vmem:[%s4819_s3 + $0x1f8] sm:$0xff] }
  0xb7   : > { %3647 = vmatpush3.bf16.msra.mxu0 %v3644_v5  ;;  %3060 = vmatprep.mubr.f32.mxu1 %v4435_v51  ;;  %v2593_v5 = vld [vmem:[%s4819_s3 + $0x3f0] sm:$0xff]  ;;  %v3532_v14 = vpack.c.bf16 %v2530_v3, %v2529_v23 }
  0xb8   : > { %3284 = vmatprep.mubr.f32.mxu0 %v4504_v27  ;;  %3521 = vmatprep.subr.bf16.mxu1 %v3520_v18 }
  0xb9   : > { %3061 = vmatmul.mubr.f32.gmra.mrb[8].mxu1 %v4453_v61  ;;  %3649 = vmatprep.subr.bf16.mxu0 %v3648_v19 }
  0xba   : > { %3285 = vmatmul.mubr.f32.gmra.mrb[8].mxu0 %v4516_v40  ;;  %3523 = vmatpush3.bf16.msra.mxu1 %v3520_v18  ;;  %v3660_v18 = vpack.c.bf16 %v2594_v9, %v2593_v5 }
  0xbb   : > { %3651 = vmatpush3.bf16.msra.mxu0 %v3648_v19  ;;  %3063 = vmatprep.mubr.f32.mxu1 %v4459_v0  ;;  %v2595_v19 = vld [vmem:[%s4819_s3 + $0x400] sm:$0xff] }
  0xbc   : > { %3287 = vmatprep.mubr.f32.mxu0 %v4528_v49  ;;  %3525 = vmatprep.subr.bf16.mxu1 %v3524_v37  ;;  %v3664_v29 = vpack.c.bf16 %v2596_v21, %v2595_v19 }
  0xbd   : > { %3064 = vmatmul.mubr.f32.gmra.mrb[10].mxu1 %v4477_v11  ;;  %3653 = vmatprep.subr.bf16.mxu0 %v3652_v39 }
  0xbe   : > { %3288 = vmatmul.mubr.f32.gmra.mrb[10].mxu0 %v4540_v63  ;;  %3527 = vmatpush3.bf16.msra.mxu1 %v3524_v37  ;;  %v2598_v37 = vld [vmem:[%s4819_s3 + $0x418] sm:$0xff] }
  0xbf   : > { %3655 = vmatpush3.bf16.msra.mxu0 %v3652_v39  ;;  %3066 = vmatprep.mubr.f32.mxu1 %v4483_v16  ;;  %v3668_v39 = vpack.c.bf16 %v2598_v37, %v2597_v32 }
  0xc0   : > { %3290 = vmatprep.mubr.f32.mxu0 %v4647_v59  ;;  %3529 = vmatprep.subr.bf16.mxu1 %v3528_v57 }
  0xc1   : > { %3067 = vmatmul.mubr.f32.gmra.mrb[12].mxu1 %v4501_v2  ;;  %3657 = vmatprep.subr.bf16.mxu0 %v3656_v15 }
  0xc2   : > { %3291 = vmatmul.mubr.f32.gmra.mrb[12].mxu0 %v4663_v10  ;;  %3531 = vmatpush3.bf16.msra.mxu1 %v3528_v57 }
  0xc3   : > { %3659 = vmatpush3.bf16.msra.mxu0 %v3656_v15  ;;  %3069 = vmatprep.mubr.f32.mxu1 %v4507_v31 }
  0xc4   : > { %3293 = vmatprep.mubr.f32.mxu0 %v1630_v17  ;;  %3533 = vmatprep.subr.bf16.mxu1 %v3532_v14 }
  0xc5   : > { %3070 = vmatmul.mubr.f32.gmra.mrb[14].mxu1 %v4525_v46  ;;  %3661 = vmatprep.subr.bf16.mxu0 %v3660_v18 }
  0xc6   : > { %3294 = vmatmul.mubr.f32.gmra.mrb[14].mxu0 %v1631_v1  ;;  %3535 = vmatpush3.bf16.msra.mxu1 %v3532_v14 }
  0xc7   : > { %3663 = vmatpush3.bf16.msra.mxu0 %v3660_v18  ;;  %3104 = vmatprep.mubr.f32.mxu1 %v4385_v24  ;;  %v2601_v24 = vld [vmem:[%s4819_s3 + $0x430] sm:$0xff] }
  0xc8   : > { %3328 = vmatprep.mubr.f32.mxu0 %v4229_v22  ;;  %3665 = vmatprep.subr.bf16.mxu0 %v3664_v29  ;;  %v3672_v22 = vpack.c.bf16 %v2600_v45, %v2599_v41 }
  0xc9   : > { %3105 = vmatmul.mubr.f32.vlgmr.msra.gmra.mrb[0].mxu1 %v4396_v30  ;;  %3696 = vmatprep.subr.bf16.mxu1 %v3664_v29  ;;  %v2602_v30 = vld [vmem:[%s4819_s3 + $0x438] sm:$0xff] }
  0xca   : > { %3329 = vmatmul.mubr.f32.vlgmr.msra.gmra.mrb[0].mxu0 %v4244_v26  ;;  %3704 = vmatpush3.bf16.msra.mxu1 %v3664_v29  ;;  %v3676_v26 = vpack.c.bf16 %v2602_v30, %v2601_v24 }
  0xcb   : > { %3667 = vmatpush3.bf16.msra.mxu0 %v3664_v29  ;;  %3107 = vmatprep.mubr.f32.mxu1 %v4408_v35  ;;  %v2604_v35 = vld [vmem:[%s4819_s3 + $0x448] sm:$0xff] }
  0xcc   : > { %3331 = vmatprep.mubr.f32.mxu0 %v4247_v28  ;;  %3669 = vmatprep.subr.bf16.mxu0 %v3668_v39  ;;  %v2603_v28 = vld [vmem:[%s4819_s3 + $0x440] sm:$0xff] }
  0xcd   : > { %3108 = vmatmul.mubr.f32.gmra.mrb[2].mxu1 %v4420_v43  ;;  %3697 = vmatprep.subr.bf16.mxu1 %v3668_v39  ;;  %v2606_v43 = vld [vmem:[%s4819_s3 + $0x458] sm:$0xff] }
  0xce   : > { %3332 = vmatmul.mubr.f32.gmra.mrb[2].mxu0 %v4263_v34  ;;  %3705 = vmatpush3.bf16.msra.mxu1 %v3668_v39  ;;  %v3680_v34 = vpack.c.bf16 %v2604_v35, %v2603_v28 }
  0xcf   : > { %3671 = vmatpush3.bf16.msra.mxu0 %v3668_v39  ;;  %3110 = vmatprep.mubr.f32.mxu1 %v4432_v48  ;;  %v2608_v48 = vld [vmem:[%s4819_s3 + $0x468] sm:$0xff] }
  0xd0   : > { %3334 = vmatprep.mubr.f32.mxu0 %v4267_v36  ;;  %3673 = vmatprep.subr.bf16.mxu0 %v3672_v22  ;;  %v2605_v36 = vld [vmem:[%s4819_s3 + $0x450] sm:$0xff] }
  0xd1   : > { %3111 = vmatmul.mubr.f32.gmra.mrb[4].mxu1 %v4444_v56  ;;  %3698 = vmatprep.subr.bf16.mxu1 %v3672_v22  ;;  %v2610_v56 = vld [vmem:[%s4819_s3 + $0x478] sm:$0xff] }
  0xd2   : > { %3335 = vmatmul.mubr.f32.gmra.mrb[4].mxu0 %v4283_v42  ;;  %3706 = vmatpush3.bf16.msra.mxu1 %v3672_v22  ;;  %v3684_v42 = vpack.c.bf16 %v2606_v43, %v2605_v36 }
  0xd3   : > { %3675 = vmatpush3.bf16.msra.mxu0 %v3672_v22  ;;  %3113 = vmatprep.mubr.f32.mxu1 %v4456_v62  ;;  %v1825_v62 = vld [vmem:[#allocation2 + $0x1c8] sm:$0xff] }
  0xd4   : > { %3337 = vmatprep.mubr.f32.mxu0 %v4287_v44  ;;  %3677 = vmatprep.subr.bf16.mxu0 %v3676_v26  ;;  %v2607_v44 = vld [vmem:[%s4819_s3 + $0x460] sm:$0xff] }
  0xd5   : > { %3114 = vmatmul.mubr.f32.gmra.mrb[6].mxu1 %v4468_v8  ;;  %3699 = vmatprep.subr.bf16.mxu1 %v3676_v26 }
  0xd6   : > { %3338 = vmatmul.mubr.f32.gmra.mrb[6].mxu0 %v4303_v50  ;;  %3707 = vmatpush3.bf16.msra.mxu1 %v3676_v26  ;;  %v3688_v50 = vpack.c.bf16 %v2608_v48, %v2607_v44 }
  0xd7   : > { %3679 = vmatpush3.bf16.msra.mxu0 %v3676_v26  ;;  %3116 = vmatprep.mubr.f32.mxu1 %v4480_v13 }
  0xd8   : > { %3340 = vmatprep.mubr.f32.mxu0 %v4307_v52  ;;  %3681 = vmatprep.subr.bf16.mxu0 %v3680_v34  ;;  %v2609_v52 = vld [vmem:[%s4819_s3 + $0x470] sm:$0xff] }
  0xd9   : > { %3117 = vmatmul.mubr.f32.gmra.mrb[8].mxu1 %v4492_v20  ;;  %3700 = vmatprep.subr.bf16.mxu1 %v3680_v34 }
  0xda   : > { %3341 = vmatmul.mubr.f32.gmra.mrb[8].mxu0 %v4323_v58  ;;  %3708 = vmatpush3.bf16.msra.mxu1 %v3680_v34  ;;  %v3692_v58 = vpack.c.bf16 %v2610_v56, %v2609_v52 }
  0xdb   : > { %3683 = vmatpush3.bf16.msra.mxu0 %v3680_v34  ;;  %3119 = vmatprep.mubr.f32.mxu1 %v4504_v27 }
  0xdc   : > { %3343 = vmatprep.mubr.f32.mxu0 %v4327_v60  ;;  %3685 = vmatprep.subr.bf16.mxu0 %v3684_v42  ;;  %v1824_v60 = vld [vmem:[#allocation2 + $0x1c0] sm:$0xff] }
  0xdd   : > { %3120 = vmatmul.mubr.f32.gmra.mrb[10].mxu1 %v4516_v40  ;;  %3701 = vmatprep.subr.bf16.mxu1 %v3684_v42 }
  0xde   : > { %3344 = vmatmul.mubr.f32.gmra.mrb[10].mxu0 %v4343_v4  ;;  %3709 = vmatpush3.bf16.msra.mxu1 %v3684_v42  ;;  %v2018_v4 = vld [vmem:[#allocation2 + $0x1c1] sm:$0xff] }
  0xdf   : > { %3687 = vmatpush3.bf16.msra.mxu0 %v3684_v42  ;;  %3122 = vmatprep.mubr.f32.mxu1 %v4528_v49 }
  0xe0   : > { %3346 = vmatprep.mubr.f32.mxu0 %v4347_v6  ;;  %3689 = vmatprep.subr.bf16.mxu0 %v3688_v50  ;;  %v2019_v6 = vld [vmem:[#allocation2 + $0x1c9] sm:$0xff] }
  0xe1   : > { %3123 = vmatmul.mubr.f32.gmra.mrb[12].mxu1 %v4540_v63  ;;  %3702 = vmatprep.subr.bf16.mxu1 %v3688_v50 }
  0xe2   : > { %3347 = vmatmul.mubr.f32.gmra.mrb[12].mxu0 %v4363_v12  ;;  %3710 = vmatpush3.bf16.msra.mxu1 %v3688_v50 }
  0xe3   : > { %3691 = vmatpush3.bf16.msra.mxu0 %v3688_v50  ;;  %3125 = vmatprep.mubr.f32.mxu1 %v4647_v59 }
  0xe4   : > { %3349 = vmatprep.mubr.f32.mxu0 %v1824_v60  ;;  %3693 = vmatprep.subr.bf16.mxu0 %v3692_v58 }
  0xe5   : > { %3126 = vmatmul.mubr.f32.gmra.mrb[14].mxu1 %v4663_v10  ;;  %3703 = vmatprep.subr.bf16.mxu1 %v3692_v58 }
  0xe6   : > { %3350 = vmatmul.mubr.f32.gmra.mrb[14].mxu0 %v1825_v62  ;;  %3711 = vmatpush3.bf16.msra.mxu1 %v3692_v58 }
  0xe7   : > { %3695 = vmatpush3.bf16.msra.mxu0 %v3692_v58  ;;  %3384 = vmatprep.mubr.f32.mxu0 %v4387_v25 }
  0xe8   : > { %3396 = vmatprep.mubr.f32.mxu1 %v4483_v16 }
  0xe9   : > { %3397 = vmatmul.mubr.f32.vlgmr.msra.gmra.mrb[16].mxu1 %v4501_v2 }
  0xea   : > { %3385 = vmatmul.mubr.f32.vlgmr.msra.gmra.mrb[0].mxu0 %v4405_v33  ;;  %3399 = vmatprep.mubr.f32.mxu1 %v4507_v31 }
  0xeb   : > { %3387 = vmatprep.mubr.f32.mxu0 %v4411_v38 }
  0xed   : > { %3400 = vmatmul.mubr.f32.gmra.mrb[18].mxu1 %v4525_v46 }
  0xee   : > { %3388 = vmatmul.mubr.f32.gmra.mrb[2].mxu0 %v4429_v47  ;;  %3402 = vmatprep.mubr.f32.mxu1 %v4531_v54 }
  0xef   : > { %3390 = vmatprep.mubr.f32.mxu0 %v4435_v51 }
  0xf1   : > { %3403 = vmatmul.mubr.f32.gmra.mrb[20].mxu1 %v4549_v7 }
  0xf2   : > { %3391 = vmatmul.mubr.f32.gmra.mrb[4].mxu0 %v4453_v61  ;;  %3405 = vmatprep.mubr.f32.mxu1 %v2018_v4 }
  0xf3   : > { %3393 = vmatprep.mubr.f32.mxu0 %v4459_v0 }
  0xf5   : > { %3406 = vmatmul.mubr.f32.gmra.mrb[22].mxu1 %v2019_v6 }
  0xf6   : > { %3394 = vmatmul.mubr.f32.gmra.mrb[6].mxu0 %v4477_v11 }
 0x19c   : > { %v3106_v12 = vpop.f32.mrb[0].mxu1 }
 0x19d   : > { %v1132_v25 = vpop.f32.mrb[1].mxu1 }
 0x1a0   : > { %v3109_v33 = vpop.f32.mrb[2].mxu1 }
 0x1a1   : > { %v1142_v38 = vpop.f32.mrb[3].mxu1 }
 0x1a4   : > { %v3112_v47 = vpop.f32.mrb[4].mxu1 }
 0x1a5   : > { %v4762_v8 = vpop.f32.mrb[5].mxu1 }
 0x1a8   : > { %v4764_v51 = vpop.f32.mrb[6].mxu1 }
 0x1a9   : > { %v4766_v13 = vpop.f32.mrb[7].mxu1 }
 0x1ac   : > { %v3118_v16 = vpop.f32.mrb[8].mxu1 }
 0x1ad   : > { %v3342_v61 = vpop.f32.mrb[8].mxu0  ;;  %v1172_v20 = vpop.f32.mrb[9].mxu1 }
 0x1ae   : > { %v3720_v2 = vadd.f32 %v3342_v61, %v3118_v16  ;;  %v1949_v27 = vpop.f32.mrb[9].mxu0 }
 0x1af   : > { %v3722_v0 = vadd.f32 %v1949_v27, %v1172_v20 }
 0x1b0   : > { %v3121_v31 = vpop.f32.mrb[10].mxu1 }
 0x1b1   : > { %v3345_v40 = vpop.f32.mrb[10].mxu0  ;;  %v1182_v11 = vpop.f32.mrb[11].mxu1 }
 0x1b2   : > { %v3724_v46 = vadd.f32 %v3345_v40, %v3121_v31  ;;  %v1959_v49 = vpop.f32.mrb[11].mxu0 }
 0x1b3   : > { %v3726_v54 = vadd.f32 %v1959_v49, %v1182_v11 }
 0x1b4   : > { %v3124_v63 = vpop.f32.mrb[12].mxu1 }
 0x1b5   : > { %v3348_v7 = vpop.f32.mrb[12].mxu0  ;;  %v1192_v53 = vpop.f32.mrb[13].mxu1 }
 0x1b6   : > { %v3728_v55 = vadd.f32 %v3348_v7, %v3124_v63  ;;  %v1969_v57 = vpop.f32.mrb[13].mxu0 }
 0x1b7   : > { %v3730_v59 = vadd.f32 %v1969_v57, %v1192_v53 }
 0x1b8   : > { %v3127_v15 = vpop.f32.mrb[14].mxu1 }
 0x1b9   : > { %v3351_v23 = vpop.f32.mrb[14].mxu0  ;;  %v1202_v3 = vpop.f32.mrb[15].mxu1 }
 0x1ba   : > { %v3732_v5 = vadd.f32 %v3351_v23, %v3127_v15  ;;  %v1979_v9 = vpop.f32.mrb[15].mxu0 }
 0x1bb   : > { %v3734_v10 = vadd.f32 %v1979_v9, %v1202_v3 }
 0x1bc   : > { %v3398_v14 = vpop.f32.mrb[16].mxu1 }
 0x1bd   : > { %v3386_v17 = vpop.f32.mrb[0].mxu0  ;;  %v4768_v18 = vadd.f32 %v3720_v2, %v3398_v14  ;;  %v2143_v19 = vpop.f32.mrb[17].mxu1 }
 0x1be   : > { %v3712_v21 = vadd.f32 %v3386_v17, %v3106_v12  ;;  %v2103_v1 = vpop.f32.mrb[1].mxu0  ;;  %v4770_v29 = vadd.f32 %v3722_v0, %v2143_v19 }
 0x1bf   : > { %2207 = vst [vmem:[%s4019_s20 + $0x48] sm:$0xff] %v4768_v18  ;;  %v3713_v32 = vadd.f32 %v2103_v1, %v1132_v25 }
 0x1c0   : > { %2199 = vst [vmem:[%s4019_s20 + $0x8] sm:$0xff] %v3712_v21  ;;  %v2231_v37 = vmul.f32 %v3712_v21, %v3712_v21  ;;  %2206 = vst [vmem:[%s4019_s20 + $0x40] sm:$0xff] %v4770_v29  ;;  %v3401_v39 = vpop.f32.mrb[18].mxu1 }
 0x1c1   : > { %2198 = vst [vmem:[%s4019_s20] sm:$0xff] %v3713_v32  ;;  %v2214_v41 = vadd.f32 %v3713_v32, %v3712_v21  ;;  %v2230_v45 = vmul.f32 %v3713_v32, %v3713_v32  ;;  %v3389_v22 = vpop.f32.mrb[2].mxu0  ;;  %v3725_v24 = vadd.f32 %v3724_v46, %v3401_v39  ;;  %v2153_v30 = vpop.f32.mrb[19].mxu1 }
 0x1c2   : > { %v3714_v26 = vadd.f32 %v3389_v22, %v3109_v33  ;;  %v2113_v28 = vpop.f32.mrb[3].mxu0  ;;  %v3727_v35 = vadd.f32 %v3726_v54, %v2153_v30 }
 0x1c3   : > { %v2246_v34 = vadd.f32 %v2231_v37, %v2230_v45  ;;  %2209 = vst [vmem:[%s4019_s20 + $0x58] sm:$0xff] %v3725_v24  ;;  %v3715_v36 = vadd.f32 %v2113_v28, %v1142_v38  ;;  %v2241_v9 = vmul.f32 %v3725_v24, %v3725_v24 }
 0x1c4   : > { %2201 = vst [vmem:[%s4019_s20 + $0x18] sm:$0xff] %v3714_v26  ;;  %2208 = vst [vmem:[%s4019_s20 + $0x50] sm:$0xff] %v3727_v35  ;;  %v3404_v43 = vpop.f32.mrb[20].mxu1  ;;  %v2233_v62 = vmul.f32 %v3714_v26, %v3714_v26  ;;  %v2240_v23 = vmul.f32 %v3727_v35, %v3727_v35 }
 0x1c5   : > { %2200 = vst [vmem:[%s4019_s20 + $0x10] sm:$0xff] %v3715_v36  ;;  %v2215_v42 = vadd.f32 %v3715_v36, %v2214_v41  ;;  %v2232_v44 = vmul.f32 %v3715_v36, %v3715_v36  ;;  %v3392_v48 = vpop.f32.mrb[4].mxu0  ;;  %v3729_v50 = vadd.f32 %v3728_v55, %v3404_v43  ;;  %v2163_v52 = vpop.f32.mrb[21].mxu1 }
 0x1c6   : > { %v3716_v56 = vadd.f32 %v3392_v48, %v3112_v47  ;;  %v2123_v58 = vpop.f32.mrb[5].mxu0  ;;  %v3731_v60 = vadd.f32 %v3730_v59, %v2163_v52  ;;  %v2239_v59 = vmul.f32 %v4768_v18, %v4768_v18 }
 0x1c7   : > { %v2247_v4 = vadd.f32 %v2246_v34, %v2232_v44  ;;  %2211 = vst [vmem:[%s4019_s20 + $0x68] sm:$0xff] %v3729_v50  ;;  %v3717_v6 = vadd.f32 %v2123_v58, %v4762_v8  ;;  %v2216_v12 = vadd.f32 %v3714_v26, %v2215_v42  ;;  %v2243_v1 = vmul.f32 %v3729_v50, %v3729_v50 }
 0x1c8   : > { %2203 = vst [vmem:[%s4019_s20 + $0x28] sm:$0xff] %v3716_v56  ;;  %2210 = vst [vmem:[%s4019_s20 + $0x60] sm:$0xff] %v3731_v60  ;;  %v3407_v25 = vpop.f32.mrb[22].mxu1  ;;  %v2235_v8 = vmul.f32 %v3716_v56, %v3716_v56  ;;  %v2242_v17 = vmul.f32 %v3731_v60, %v3731_v60 }
 0x1c9   : > { %2202 = vst [vmem:[%s4019_s20 + $0x20] sm:$0xff] %v3717_v6  ;;  %v2217_v33 = vadd.f32 %v3717_v6, %v2216_v12  ;;  %v2234_v38 = vmul.f32 %v3717_v6, %v3717_v6  ;;  %v2248_v16 = vadd.f32 %v2247_v4, %v2233_v62  ;;  %v3395_v47 = vpop.f32.mrb[6].mxu0  ;;  %v3733_v61 = vadd.f32 %v3732_v5, %v3407_v25  ;;  %v2173_v20 = vpop.f32.mrb[23].mxu1 }
 0x1ca   : > { %v3718_v2 = vadd.f32 %v3395_v47, %v4764_v51  ;;  %v2133_v27 = vpop.f32.mrb[7].mxu0  ;;  %v3735_v0 = vadd.f32 %v3734_v10, %v2173_v20  ;;  %v2238_v51 = vmul.f32 %v4770_v29, %v4770_v29 }
 0x1cb   : > { %v2249_v31 = vadd.f32 %v2248_v16, %v2234_v38  ;;  %2213 = vst [vmem:[%s4019_s20 + $0x78] sm:$0xff] %v3733_v61  ;;  %v3719_v40 = vadd.f32 %v2133_v27, %v4766_v13  ;;  %v2218_v11 = vadd.f32 %v3716_v56, %v2217_v33  ;;  %v2245_v45 = vmul.f32 %v3733_v61, %v3733_v61 }
 0x1cc   : > { %2205 = vst [vmem:[%s4019_s20 + $0x38] sm:$0xff] %v3718_v2  ;;  %2212 = vst [vmem:[%s4019_s20 + $0x70] sm:$0xff] %v3735_v0  ;;  %v2237_v63 = vmul.f32 %v3718_v2, %v3718_v2  ;;  %v2244_v39 = vmul.f32 %v3735_v0, %v3735_v0 }
 0x1cd   : > { %2204 = vst [vmem:[%s4019_s20 + $0x30] sm:$0xff] %v3719_v40  ;;  %v2219_v46 = vadd.f32 %v3719_v40, %v2218_v11  ;;  %v2236_v49 = vmul.f32 %v3719_v40, %v3719_v40  ;;  %v2250_v54 = vadd.f32 %v2249_v31, %v2235_v8 }
 0x1cf   : > { %v2220_v7 = vadd.f32 %v3718_v2, %v2219_v46  ;;  %v2251_v53 = vadd.f32 %v2250_v54, %v2236_v49 }
 0x1d1   : > { %v2221_v55 = vadd.f32 %v4770_v29, %v2220_v7  ;;  %v2252_v57 = vadd.f32 %v2251_v53, %v2237_v63 }
 0x1d3   : > { %v2222_v13 = vadd.f32 %v4768_v18, %v2221_v55  ;;  %v2253_v15 = vadd.f32 %v2252_v57, %v2238_v51 }
 0x1d5   : > { %v2254_v3 = vadd.f32 %v2253_v15, %v2239_v59  ;;  %v2223_v5 = vadd.f32 %v3727_v35, %v2222_v13 }
 0x1d7   : > { %v2224_v10 = vadd.f32 %v3725_v24, %v2223_v5  ;;  %v2255_v14 = vadd.f32 %v2254_v3, %v2240_v23 }
 0x1d9   : > { %v2225_v19 = vadd.f32 %v3731_v60, %v2224_v10  ;;  %v2256_v21 = vadd.f32 %v2255_v14, %v2241_v9 }
 0x1db   : > { %v2226_v29 = vadd.f32 %v3729_v50, %v2225_v19  ;;  %v2257_v32 = vadd.f32 %v2256_v21, %v2242_v17 }
 0x1dd   : > { %v2227_v37 = vadd.f32 %v3735_v0, %v2226_v29  ;;  %v2258_v41 = vadd.f32 %v2257_v32, %v2243_v1 }
 0x1df   : > { %v2228_v18 = vadd.f32 %v3733_v61, %v2227_v37  ;;  %v2259_v22 = vadd.f32 %v2258_v41, %v2244_v39 }
 0x1e1   : > { %2229 = vst [vmem:[%s4053_s11] sm:$0xff] %v2228_v18  ;;  %v2260_v30 = vadd.f32 %v2259_v22, %v2245_v45 }
 0x1e3   : > { %2261 = vst [vmem:[%s4058_s14] sm:$0xff] %v2260_v30 }
 0x1e4 PF: > { %s17_s25 = sadd.s32 1, %s3921_s25   ;;  %s4824_s20 = sld [smem:[#allocation3_spill]] }
 0x1e5   : > { %p14_p12 = scmp.ge.s32.totalorder %s17_s25, 6   ;;  %s4825_s21 = smov %s3913_s23 }
 0x1e6   : > { %s4826_s22 = smov %s3917_s24  ;;  %s4827_s23 = smov %s4830_s26 }
 0x1e7   :  { %16 = sbr.rel (!%p14_p12) target bundleno = 3 (0x3), region = 121 }
 0x1ea   : > { %s4828_s24 = smov %s4824_s20 }

</bundles_post_ra>
